<compile_context>
chip_gen: v5e
topology: v5e:2x2
jax: 0.10.0
libtpu: 0.0.40
codegen_flags: <defaults>
</compile_context>

<pallas_src>
import functools
import math

import jax
import jax.numpy as jnp
from jax.experimental import pallas as pl
from jax.experimental.pallas import tpu as pltpu


_INV_SQRT2 = 1.0 / math.sqrt(2.0)


def _exact_gelu(x):
    # PyTorch nn.GELU(approximate='none'): 0.5 * x * (1 + erf(x / sqrt(2))).
    return 0.5 * x * (1.0 + jax.lax.erf(x * _INV_SQRT2))


def mlp_kernel(x_ref, w_ref, b_ref, o_ref, *, num_layers):
    # x_ref: (tb, F) compute dtype; w_ref: (L, F, F) compute dtype, (in, out);
    # b_ref: (L, 1, F) f32;         o_ref: (tb, F) output dtype.
    h = x_ref[...]
    for l in range(num_layers):  # static unroll; num_layers is small (e.g. 2)
        z = jnp.dot(h, w_ref[l], preferred_element_type=jnp.float32) + b_ref[l]
        z = _exact_gelu(z)  # f32
        # Cast back to the MXU compute dtype between layers; keep f32 after
        # the final layer (o_ref cast below decides the output dtype).
        h = z.astype(x_ref.dtype) if l + 1 < num_layers else z
    # TODO(synk): dropout with p>0 (training mode) would need pltpu.prng_*;
    # the default module has p=0.0 so it is the identity.
    o_ref[...] = h.astype(o_ref.dtype)


def _choose_tile_b(batch, feat, in_itemsize, out_itemsize, w_bytes):
    """MXU-native batch tile, giving >=2 grid steps whenever the batch allows."""
    tile_b = 256 if batch >= 1024 else 128

    def est(tb):  # double-buffered x/out tiles + f32 intermediates + resident weights
        return (2 * tb * feat * in_itemsize
                + 2 * tb * feat * out_itemsize
                + 2 * tb * feat * 4
                + w_bytes)

    while tile_b > 128 and est(tile_b) > 24 * 2**20:
        tile_b //= 2
    return tile_b


def _pallas_mlp(x_pad, w_stack, b3, *, tile_b, out_dtype, single_buffer_weights,
                vmem_limit_bytes, cost_estimate):
    Bp, F = x_pad.shape
    L = w_stack.shape[0]
    const_map = lambda i: (0, 0, 0)

    spec_kwargs = {}
    if single_buffer_weights:
        # Weight/bias blocks never change across grid steps -> no double buffering.
        spec_kwargs = dict(pipeline_mode=pl.Buffered(1))
    w_spec = pl.BlockSpec((L, F, F), const_map, **spec_kwargs)
    b_spec = pl.BlockSpec((L, 1, F), const_map, **spec_kwargs)

    kernel = functools.partial(mlp_kernel, num_layers=L)
    return pl.pallas_call(
        kernel,
        out_shape=jax.ShapeDtypeStruct((Bp, F), out_dtype),
        grid_spec=pltpu.PrefetchScalarGridSpec(
            num_scalar_prefetch=0,
            grid=(Bp // tile_b,),
            in_specs=[
                pl.BlockSpec((tile_b, F), lambda i: (i, 0)),  # x tile (pipelined)
                w_spec,                                        # all layer weights
                b_spec,                                        # all layer biases
            ],
            out_specs=pl.BlockSpec((tile_b, F), lambda i: (i, 0)),
        ),
        compiler_params=pltpu.CompilerParams(
            dimension_semantics=("parallel",),  # batch tiles shard across cores
            vmem_limit_bytes=vmem_limit_bytes,
        ),
        cost_estimate=cost_estimate,
    )(x_pad, w_stack, b3)


def mlp_forward(x, w_stack, b_stack, *, tile_b=None, compute_dtype=jnp.bfloat16):
    """MLP forward.

    x:        (..., F)  input; output keeps this dtype and leading shape.
    w_stack:  (L, F, F) per-layer weights stored (in_features, out_features),
                        i.e. PyTorch's W.T, so the kernel computes x @ W directly.
    b_stack:  (L, F)    per-layer biases.
    compute_dtype:      dtype fed to the MXU (bfloat16 recommended);
                        accumulation, bias add and GELU are always float32.
    """
    lead_shape = x.shape[:-1]
    F = x.shape[-1]
    L, Fi, Fo = w_stack.shape
    assert Fi == F and Fo == F and b_stack.shape == (L, F)

    x2 = x.reshape(-1, F)
    B = x2.shape[0]
    out_dtype = x.dtype

    w = w_stack.astype(compute_dtype)
    b3 = b_stack.astype(jnp.float32).reshape(L, 1, F)
    x_c = x2.astype(compute_dtype)

    w_bytes = w.size * w.dtype.itemsize + b3.size * b3.dtype.itemsize
    out_itemsize = jnp.dtype(out_dtype).itemsize
    if tile_b is None:
        tile_b = _choose_tile_b(B, F, x_c.dtype.itemsize, out_itemsize, w_bytes)

    # Zero-pad ragged batches to a tile multiple (rows are independent; padded
    # rows are discarded below).
    Bp = -(-B // tile_b) * tile_b
    if Bp != B:
        x_c = jnp.pad(x_c, ((0, Bp - B), (0, 0)))

    per_step = (2 * tile_b * F * x_c.dtype.itemsize
                + 2 * tile_b * F * out_itemsize
                + 2 * tile_b * F * 4)
    vmem_limit = int(min(96 * 2**20, max(16 * 2**20, 1.5 * (per_step + w_bytes))))

    cost = pl.CostEstimate(
        flops=2 * Bp * F * F * L,
        transcendentals=Bp * F * L,
        bytes_accessed=int(x_c.size * x_c.dtype.itemsize + w_bytes
                           + Bp * F * out_itemsize),
    )

    call = functools.partial(
        _pallas_mlp, x_c, w, b3,
        tile_b=tile_b, out_dtype=out_dtype,
        vmem_limit_bytes=vmem_limit, cost_estimate=cost)
    try:
        out = call(single_buffer_weights=True)
    except Exception:
        # Some jax builds reject pipeline_mode=pl.Buffered(1) on a top-level
        # pallas_call BlockSpec; fall back to default (double) buffering.
        out = call(single_buffer_weights=False)
    return out[:B].reshape(*lead_shape, F)


def mlp_reference_f32(x, w_stack, b_stack):
    # Pure f32 PyTorch-equivalent math.
    h = x.astype(jnp.float32)
    for l in range(w_stack.shape[0]):
        h = _exact_gelu(h @ w_stack[l].astype(jnp.float32)
                        + b_stack[l].astype(jnp.float32))
    return h


def mlp_reference_mixed(x, w_stack, b_stack, compute_dtype=jnp.bfloat16):
    # Mirrors the kernel's mixed precision (bf16 operands, f32 accumulate).
    L = w_stack.shape[0]
    h = x.astype(compute_dtype)
    for l in range(L):
        z = jnp.dot(h, w_stack[l].astype(compute_dtype),
                    preferred_element_type=jnp.float32)
        z = _exact_gelu(z + b_stack[l].astype(jnp.float32))
        h = z.astype(compute_dtype) if l + 1 < L else z
    return h.astype(x.dtype)


if __name__ == "__main__":
    # Small shapes consistent with the module: feature_size=128, layers=2.
    # B=300 is deliberately not a tile multiple (exercises the padding path)
    # and still gives several parallel 128-row grid steps.
    B, F, L = 300, 128, 2
    key = jax.random.PRNGKey(0)
    kx, kw, kb = jax.random.split(key, 3)

    x = jax.random.normal(kx, (B, F), dtype=jnp.float32)

    # Deterministic param init mimicking nn.Linear bounds U(-1/sqrt(F), 1/sqrt(F)).
    bound = 1.0 / math.sqrt(F)
    # Stored as (layer, in_features, out_features) == PyTorch W.T stacked.
    w_stack = jax.random.uniform(kw, (L, F, F), minval=-bound, maxval=bound,
                                 dtype=jnp.float32)
    b_stack = jax.random.uniform(kb, (L, F), minval=-bound, maxval=bound,
                                 dtype=jnp.float32)

    out = jax.block_until_ready(mlp_forward(x, w_stack, b_stack))
    assert out.shape == (B, F) and out.dtype == x.dtype

    # Kernel-vs-XLA check at matching precision (bf16 operands, f32 accumulate).
    ref_mixed = mlp_reference_mixed(x, w_stack, b_stack)
    assert jnp.allclose(out, ref_mixed, atol=1e-3, rtol=1e-3), \
        "mismatch vs mixed-precision reference"

    # Sanity check against full-f32 PyTorch-equivalent math (loose tolerance
    # because MXU operands are bf16).
    ref_f32 = mlp_reference_f32(x, w_stack, b_stack)
    assert jnp.allclose(out, ref_f32, atol=3e-2, rtol=3e-2), \
        "mismatch vs f32 reference"

    print("KERNEL_OK")
</pallas_src>

<mosaic_0001>
module attributes {stable_mosaic.version = 11 : i64} {
  func.func @mlp_kernel(%arg0: i32, %arg1: memref<128x128xbf16, #tpu.memory_space<vmem>>, %arg2: memref<2x128x128xbf16, #tpu.memory_space<vmem>>, %arg3: memref<2x1x128xf32, #tpu.memory_space<vmem>>, %arg4: memref<128x128xf32, #tpu.memory_space<vmem>>) attributes {dimension_semantics = [#tpu.dimension_semantics<parallel>], iteration_bounds = array<i64: 3>, scalar_prefetch = 0 : i64, scratch_operands = 0 : i64, tpu.core_type = #tpu.core_type<tc>, window_params = [{transform_indices = @transform_0, window_bounds = array<i64: 128, 128>}, {pipeline_mode = #tpu.pipeline_mode<synchronous>, transform_indices = @transform_1, window_bounds = array<i64: 2, 128, 128>}, {pipeline_mode = #tpu.pipeline_mode<synchronous>, transform_indices = @transform_2, window_bounds = array<i64: 2, 1, 128>}, {transform_indices = @transform_3, window_bounds = array<i64: 128, 128>}]} {
    %c0 = arith.constant 0 : index
    %c0_0 = arith.constant 0 : index
    %0 = vector.load %arg1[%c0, %c0_0] : memref<128x128xbf16, #tpu.memory_space<vmem>>, vector<128x128xbf16>
    %c0_1 = arith.constant 0 : index
    %c0_2 = arith.constant 0 : index
    %c0_3 = arith.constant 0 : index
    %1 = vector.load %arg2[%c0_1, %c0_2, %c0_3] : memref<2x128x128xbf16, #tpu.memory_space<vmem>>, vector<1x128x128xbf16>
    %2 = vector.shape_cast %1 : vector<1x128x128xbf16> to vector<128x128xbf16>
    %cst = arith.constant dense<0.000000e+00> : vector<128x128xf32>
    %3 = tpu.matmul %0, %2, %cst {dimension_numbers = #tpu.dot_dimension_numbers<[1], [0], [0], [1], [0, 0, 1, 1], [], []>} : vector<128x128xbf16>, vector<128x128xbf16>, vector<128x128xf32> -> vector<128x128xf32>
    %c0_4 = arith.constant 0 : index
    %c0_5 = arith.constant 0 : index
    %c0_6 = arith.constant 0 : index
    %4 = vector.load %arg3[%c0_4, %c0_5, %c0_6] : memref<2x1x128xf32, #tpu.memory_space<vmem>>, vector<1x1x128xf32>
    %5 = vector.shape_cast %4 : vector<1x1x128xf32> to vector<1x128xf32>
    %6 = vector.broadcast %5 : vector<1x128xf32> to vector<128x128xf32>
    %7 = arith.addf %3, %6 : vector<128x128xf32>
    %cst_7 = arith.constant 5.000000e-01 : f32
    %8 = vector.broadcast %cst_7 : f32 to vector<128x128xf32>
    %9 = arith.mulf %8, %7 : vector<128x128xf32>
    %cst_8 = arith.constant 0.707106769 : f32
    %10 = vector.broadcast %cst_8 : f32 to vector<128x128xf32>
    %11 = arith.mulf %7, %10 : vector<128x128xf32>
    %12 = math.erf %11 : vector<128x128xf32>
    %cst_9 = arith.constant 1.000000e+00 : f32
    %13 = vector.broadcast %cst_9 : f32 to vector<128x128xf32>
    %14 = arith.addf %13, %12 : vector<128x128xf32>
    %15 = arith.mulf %9, %14 : vector<128x128xf32>
    %16 = arith.truncf %15 : vector<128x128xf32> to vector<128x128xbf16>
    %c1 = arith.constant 1 : index
    %c0_10 = arith.constant 0 : index
    %c0_11 = arith.constant 0 : index
    %17 = vector.load %arg2[%c1, %c0_10, %c0_11] : memref<2x128x128xbf16, #tpu.memory_space<vmem>>, vector<1x128x128xbf16>
    %18 = vector.shape_cast %17 : vector<1x128x128xbf16> to vector<128x128xbf16>
    %cst_12 = arith.constant dense<0.000000e+00> : vector<128x128xf32>
    %19 = tpu.matmul %16, %18, %cst_12 {dimension_numbers = #tpu.dot_dimension_numbers<[1], [0], [0], [1], [0, 0, 1, 1], [], []>} : vector<128x128xbf16>, vector<128x128xbf16>, vector<128x128xf32> -> vector<128x128xf32>
    %c1_13 = arith.constant 1 : index
    %c0_14 = arith.constant 0 : index
    %c0_15 = arith.constant 0 : index
    %20 = vector.load %arg3[%c1_13, %c0_14, %c0_15] : memref<2x1x128xf32, #tpu.memory_space<vmem>>, vector<1x1x128xf32>
    %21 = vector.shape_cast %20 : vector<1x1x128xf32> to vector<1x128xf32>
    %22 = vector.broadcast %21 : vector<1x128xf32> to vector<128x128xf32>
    %23 = arith.addf %19, %22 : vector<128x128xf32>
    %cst_16 = arith.constant 5.000000e-01 : f32
    %24 = vector.broadcast %cst_16 : f32 to vector<128x128xf32>
    %25 = arith.mulf %24, %23 : vector<128x128xf32>
    %cst_17 = arith.constant 0.707106769 : f32
    %26 = vector.broadcast %cst_17 : f32 to vector<128x128xf32>
    %27 = arith.mulf %23, %26 : vector<128x128xf32>
    %28 = math.erf %27 : vector<128x128xf32>
    %cst_18 = arith.constant 1.000000e+00 : f32
    %29 = vector.broadcast %cst_18 : f32 to vector<128x128xf32>
    %30 = arith.addf %29, %28 : vector<128x128xf32>
    %31 = arith.mulf %25, %30 : vector<128x128xf32>
    %c0_19 = arith.constant 0 : index
    %c0_20 = arith.constant 0 : index
    %32 = vector.load %arg4[%c0_19, %c0_20] : memref<128x128xf32, #tpu.memory_space<vmem>>, vector<128x128xf32>
    tpu.vector_store %arg4[%c0_19, %c0_20], %31 {strides = array<i32>} : memref<128x128xf32, #tpu.memory_space<vmem>>, vector<128x128xf32>,
    return
  }
  func.func @transform_0(%arg0: i32) -> (i32, i32) {
    %c0_i32 = arith.constant 0 : i32
    %c0_i32_0 = arith.constant 0 : i32
    return %arg0, %c0_i32 : i32, i32
  }
  func.func @transform_1(%arg0: i32) -> (i32, i32, i32) {
    %c0_i32 = arith.constant 0 : i32
    %c0_i32_0 = arith.constant 0 : i32
    %c0_i32_1 = arith.constant 0 : i32
    %c0_i32_2 = arith.constant 0 : i32
    return %c0_i32, %c0_i32_0, %c0_i32_1 : i32, i32, i32
  }
  func.func @transform_2(%arg0: i32) -> (i32, i32, i32) {
    %c0_i32 = arith.constant 0 : i32
    %c0_i32_0 = arith.constant 0 : i32
    %c0_i32_1 = arith.constant 0 : i32
    %c0_i32_2 = arith.constant 0 : i32
    return %c0_i32, %c0_i32_0, %c0_i32_1 : i32, i32, i32
  }
  func.func @transform_3(%arg0: i32) -> (i32, i32) {
    %c0_i32 = arith.constant 0 : i32
    %c0_i32_0 = arith.constant 0 : i32
    return %arg0, %c0_i32 : i32, i32
  }
}

module attributes {stable_mosaic.version = 11 : i64} {
  func.func @mlp_kernel(%arg0: i32, %arg1: memref<128x128xbf16, #tpu.memory_space<vmem>>, %arg2: memref<2x128x128xbf16, #tpu.memory_space<vmem>>, %arg3: memref<2x1x128xf32, #tpu.memory_space<vmem>>, %arg4: memref<128x128xf32, #tpu.memory_space<vmem>>) attributes {dimension_semantics = [#tpu.dimension_semantics<parallel>], iteration_bounds = array<i64: 3>, scalar_prefetch = 0 : i64, scratch_operands = 0 : i64, tpu.core_type = #tpu.core_type<tc>, window_params = [{transform_indices = @transform_0, window_bounds = array<i64: 128, 128>}, {pipeline_mode = #tpu.pipeline_mode<synchronous>, transform_indices = @transform_1, window_bounds = array<i64: 2, 128, 128>}, {pipeline_mode = #tpu.pipeline_mode<synchronous>, transform_indices = @transform_2, window_bounds = array<i64: 2, 1, 128>}, {transform_indices = @transform_3, window_bounds = array<i64: 128, 128>}]} {
    %c0 = arith.constant 0 : index
    %c0_0 = arith.constant 0 : index
    %0 = vector.load %arg1[%c0, %c0_0] : memref<128x128xbf16, #tpu.memory_space<vmem>>, vector<128x128xbf16>
    %c0_1 = arith.constant 0 : index
    %c0_2 = arith.constant 0 : index
    %c0_3 = arith.constant 0 : index
    %1 = vector.load %arg2[%c0_1, %c0_2, %c0_3] : memref<2x128x128xbf16, #tpu.memory_space<vmem>>, vector<1x128x128xbf16>
    %2 = vector.shape_cast %1 : vector<1x128x128xbf16> to vector<128x128xbf16>
    %cst = arith.constant dense<0.000000e+00> : vector<128x128xf32>
    %3 = tpu.matmul %0, %2, %cst {dimension_numbers = #tpu.dot_dimension_numbers<[1], [0], [0], [1], [0, 0, 1, 1], [], []>} : vector<128x128xbf16>, vector<128x128xbf16>, vector<128x128xf32> -> vector<128x128xf32>
    %c0_4 = arith.constant 0 : index
    %c0_5 = arith.constant 0 : index
    %c0_6 = arith.constant 0 : index
    %4 = vector.load %arg3[%c0_4, %c0_5, %c0_6] : memref<2x1x128xf32, #tpu.memory_space<vmem>>, vector<1x1x128xf32>
    %5 = vector.shape_cast %4 : vector<1x1x128xf32> to vector<1x128xf32>
    %6 = vector.broadcast %5 : vector<1x128xf32> to vector<128x128xf32>
    %7 = arith.addf %3, %6 : vector<128x128xf32>
    %cst_7 = arith.constant 5.000000e-01 : f32
    %8 = vector.broadcast %cst_7 : f32 to vector<128x128xf32>
    %9 = arith.mulf %8, %7 : vector<128x128xf32>
    %cst_8 = arith.constant 0.707106769 : f32
    %10 = vector.broadcast %cst_8 : f32 to vector<128x128xf32>
    %11 = arith.mulf %7, %10 : vector<128x128xf32>
    %12 = math.erf %11 : vector<128x128xf32>
    %cst_9 = arith.constant 1.000000e+00 : f32
    %13 = vector.broadcast %cst_9 : f32 to vector<128x128xf32>
    %14 = arith.addf %13, %12 : vector<128x128xf32>
    %15 = arith.mulf %9, %14 : vector<128x128xf32>
    %16 = arith.truncf %15 : vector<128x128xf32> to vector<128x128xbf16>
    %c1 = arith.constant 1 : index
    %c0_10 = arith.constant 0 : index
    %c0_11 = arith.constant 0 : index
    %17 = vector.load %arg2[%c1, %c0_10, %c0_11] : memref<2x128x128xbf16, #tpu.memory_space<vmem>>, vector<1x128x128xbf16>
    %18 = vector.shape_cast %17 : vector<1x128x128xbf16> to vector<128x128xbf16>
    %cst_12 = arith.constant dense<0.000000e+00> : vector<128x128xf32>
    %19 = tpu.matmul %16, %18, %cst_12 {dimension_numbers = #tpu.dot_dimension_numbers<[1], [0], [0], [1], [0, 0, 1, 1], [], []>} : vector<128x128xbf16>, vector<128x128xbf16>, vector<128x128xf32> -> vector<128x128xf32>
    %c1_13 = arith.constant 1 : index
    %c0_14 = arith.constant 0 : index
    %c0_15 = arith.constant 0 : index
    %20 = vector.load %arg3[%c1_13, %c0_14, %c0_15] : memref<2x1x128xf32, #tpu.memory_space<vmem>>, vector<1x1x128xf32>
    %21 = vector.shape_cast %20 : vector<1x1x128xf32> to vector<1x128xf32>
    %22 = vector.broadcast %21 : vector<1x128xf32> to vector<128x128xf32>
    %23 = arith.addf %19, %22 : vector<128x128xf32>
    %cst_16 = arith.constant 5.000000e-01 : f32
    %24 = vector.broadcast %cst_16 : f32 to vector<128x128xf32>
    %25 = arith.mulf %24, %23 : vector<128x128xf32>
    %cst_17 = arith.constant 0.707106769 : f32
    %26 = vector.broadcast %cst_17 : f32 to vector<128x128xf32>
    %27 = arith.mulf %23, %26 : vector<128x128xf32>
    %28 = math.erf %27 : vector<128x128xf32>
    %cst_18 = arith.constant 1.000000e+00 : f32
    %29 = vector.broadcast %cst_18 : f32 to vector<128x128xf32>
    %30 = arith.addf %29, %28 : vector<128x128xf32>
    %31 = arith.mulf %25, %30 : vector<128x128xf32>
    %c0_19 = arith.constant 0 : index
    %c0_20 = arith.constant 0 : index
    %32 = vector.load %arg4[%c0_19, %c0_20] : memref<128x128xf32, #tpu.memory_space<vmem>>, vector<128x128xf32>
    tpu.vector_store %arg4[%c0_19, %c0_20], %31 {strides = array<i32>} : memref<128x128xf32, #tpu.memory_space<vmem>>, vector<128x128xf32>,
    return
  }
  func.func @transform_0(%arg0: i32) -> (i32, i32) {
    %c0_i32 = arith.constant 0 : i32
    %c0_i32_0 = arith.constant 0 : i32
    return %arg0, %c0_i32 : i32, i32
  }
  func.func @transform_1(%arg0: i32) -> (i32, i32, i32) {
    %c0_i32 = arith.constant 0 : i32
    %c0_i32_0 = arith.constant 0 : i32
    %c0_i32_1 = arith.constant 0 : i32
    %c0_i32_2 = arith.constant 0 : i32
    return %c0_i32, %c0_i32_0, %c0_i32_1 : i32, i32, i32
  }
  func.func @transform_2(%arg0: i32) -> (i32, i32, i32) {
    %c0_i32 = arith.constant 0 : i32
    %c0_i32_0 = arith.constant 0 : i32
    %c0_i32_1 = arith.constant 0 : i32
    %c0_i32_2 = arith.constant 0 : i32
    return %c0_i32, %c0_i32_0, %c0_i32_1 : i32, i32, i32
  }
  func.func @transform_3(%arg0: i32) -> (i32, i32) {
    %c0_i32 = arith.constant 0 : i32
    %c0_i32_0 = arith.constant 0 : i32
    return %arg0, %c0_i32 : i32, i32
  }
}

</mosaic_0001>

<bundles_post_ra>
// kernel: tpu_custom_call.1
= control target key start
LH: loop header
LB: loop body
LE: loop exit
PB: predicated region body
PF: predicated region fallthrough
CT: control target
= control target key end

     0   :  { %8 = vsyncpa [#allocation3], 0  ;;  %s3936_s0 = inlined_call_operand.hbm [shape: bf16[384,128], index: 0, kind: input, shape index: {}]   ;;  %s3937_s1 = inlined_call_operand.hbm [shape: bf16[2,128,128], index: 1, kind: input, shape index: {}]   ;;  %s3938_s2 = inlined_call_operand.hbm [shape: f32[2,1,128], index: 2, kind: input, shape index: {}]   ;;  %s3939_s3 = inlined_call_operand.hbm [shape: f32[384,128], index: 3, kind: output, shape index: {}]  }
   0x1   :  { %10 = vsyncpa [#allocation3 + $0x1], 0 }
   0x2   :  { %11 = vsyncpa [#allocation6], 0 }
   0x3   :  { %12 = vsyncpa [#allocation4], 0 }
   0x4   :  { %14 = vsyncpa [#allocation4 + $0x1], 0  ;;  %s2584_s12 = smov 0   ;;  %s2586_s13 = smov 0  }
   0x5   :  { %s2588_s14 = smov 0   ;;  %s2590_s15 = smov 0  }
   0x6 LB: > { %s2605_s16 = sadd.s32 4294967295, %s2554_s15   ;;  %s2066_s17 = sadd.s32 4294967294, %s2554_s15   ;;  %s2554_s15 = sphi %s2590_s15, %s4018_s15   ;;  %s2550_s14 = sphi %s2588_s14, %s4017_s14   ;;  %s2546_s13 = sphi %s2586_s13, %s4016_s13   ;;  %s2542_s12 = sphi %s2584_s12, %s4015_s12  }
   0x7   : > { %p40_p0 = scmp.ne.s32.totalorder %s2546_s13, %s2542_s12  ;;  %p41_p1 = scmp.eq.s32.totalorder %s2605_s16, 0 }
   0x8   : > { %p106_p2 = scmp.eq.s32.totalorder %s2605_s16, 2  ;;  %p112_p3 = scmp.eq.s32.totalorder %s2066_s17, 2 }
   0x9   : > { %p2614_p4 = por %p41_p1, %p40_p0  ;;  %p2067_p5 = scmp.ge.s32.totalorder %s2554_s15, 1 }
   0xa   : > { %p2619_p6 = por %p112_p3, %p40_p0  ;;  %p119_p7 = scmp.lt.s32.totalorder %s2554_s15, 4 }
   0xb   : > { %s130_s22 = sshll.u32 %s3937_s1, 4  ;;  %s2556_s24 = smov [#allocation5]   ;;  %s131_s22 = int_to_ptr.hbm [resolvable:$true] %s130_s22 }
   0xc   : > { %p2627_p8 = pnand %p2067_p5, %p119_p7  ;;  %s132_s25 = sshll.u32 %s2556_s24, 4  ;;  %s133_s25 = int_to_ptr.vmem [resolvable:$true] %s132_s25 }
   0xd   : > { %s144_s28 = sshll.u32 %s3938_s2, 4  ;;  %s2557_s29 = smov 64   ;;  %s145_s28 = int_to_ptr.hbm [resolvable:$true] %s144_s28 }
   0xe   : > { %p2266_p9 = pneg %p2627_p8  ;;  %s2558_s30 = smov 4  }
   0xf   : > { %s2559_s4 = smov [#allocation7]   ;;  %s2560_s6 = smov 16  }
  0x10   : > { %p2267_p10 = pnand %p2266_p9, %p41_p1  ;;  %s146_s5 = sshll.u32 %s2559_s4, 4  ;;  %s147_s5 = int_to_ptr.vmem [resolvable:$true] %s146_s5 }
  0x11   : > { %s2561_s7 = smov 1   ;;  %s2642_s8 = sadd.s32 1, %s2554_s15  }
  0x12   : > { %2269 = dma.hbm_to_vmem [thread:$0]  (!%p2267_p10), %s131_s22, 2048, %s133_s25, [#allocation6], %s2557_s29, %s2557_s29, %s2558_s30  }
  0x13   : > { %2272 = dma.hbm_to_vmem [thread:$0]  (!%p2267_p10), %s145_s28, 32, %s147_s5, [#allocation6], %s2560_s6, %s2560_s6, %s2561_s7  }
  0x14   : > { %s24_s9 = ssub.s32 %s2554_s15, %s2642_s8  ;;  %s27_s10 = sadd.s32 1, %s2550_s14 }
  0x15   : > { %p25_p11 = scmp.eq.s32.totalorder %s24_s9, 0  ;;  %p34_p12 = scmp.ne.s32.totalorder %s2550_s14, %s2546_s13 }
  0x16   : > { %p35_p13 = scmp.eq.s32.totalorder %s2554_s15, 0  ;;  %p2283_p5 = scmp.lt.s32.totalorder %s2554_s15, 3 }
  0x17   : > { %s2651_s11 = scalar_select %p25_p11, %s2550_s14, %s27_s10  }
  0x18   : > { %p36_p0 = por %p35_p13, %p34_p12  ;;  %p2655_p3 = por %p106_p2, %p34_p12 }
  0x19   : > { %s160_s20 = sand.u32 1, %s2550_s14   ;;  %s2212_s22 = sshll.u32 %s2554_s15, 6 }
  0x1a   : > { %s2071_s21 = sshll.u32 %s160_s20, 6  ;;  %s169_s26 = scalar_lea.hbm %s3936_s0, %s2212_s22 }
  0x1b   : > { %s164_s27 = scalar_lea.vmem [#allocation2], %s2071_s21  ;;  %s170_s4 = sshll.u32 %s169_s26, 4  ;;  %s171_s4 = int_to_ptr.hbm [resolvable:$true] %s170_s4 }
  0x1c   : > { %s172_s28 = sshll.u32 %s164_s27, 4  ;;  %p2665_p7 = pnand %p2283_p5, %p36_p0  ;;  %s173_s28 = int_to_ptr.vmem [resolvable:$true] %s172_s28 }
  0x1d   : > { %s161_s6 = scalar_lea.sflag [#allocation3], %s160_s20  ;;  %s2454_s7 = sshra.s32 %s171_s4, 4  ;;  %s2455_s7 = int_to_ptr.hbm [resolvable:$true] %s2454_s7 }
  0x1e   : > { %s2456_s9 = scalar_lea.hbm %s2455_s7, 64  ;;  %p2458_p9 = pneg %p2665_p7 }
  0x1f   : > { %p2457_p2 = scmp.ne.s32.totalorder %s2455_s7, %s2456_s9  ;;  %s2461_s22 = scalar_lea.hbm %s3936_s0, 192 }
  0x20   : > { %p2462_p12 = scmp.lt.s32.totalorder %s2455_s7, %s3936_s0  ;;  %p2463_p13 = scmp.lt.s32.totalorder %s2461_s22, %s2456_s9 }
  0x21   : > { %p2459_p10 = pnand %p2458_p9, %p2457_p2 }
  0x22   : > { %p2464_p0 = por %p2463_p13, %p2462_p12 }
  0x23   : > { %p2460_p11 = pneg %p2459_p10 }
  0x25   : > { %p2465_p5 = pnand %p2464_p0, %p2460_p11 }
  0x27   : > { %2468 = shalt.err (!%p2465_p5)
}
  0x28   : > { %2276 = dma.hbm_to_vmem [thread:$0]  (!%p2665_p7), %s171_s4, 1024, %s173_s28, %s161_s6, %s2557_s29, %s2557_s29, %s2558_s30  }
  0x29   : > { %184 = sbr.rel (%p2627_p8) target bundleno = 663 (0x297), region = 32 }
  0x2e   : > { %s2685_s20 = sand.u32 1, %s2546_s13  }
  0x2f   : > { %s2075_s26 = sshll.u32 %s2685_s20, 6  ;;  %s187_s27 = scalar_lea.sflag [#allocation3], %s2685_s20 }
  0x30   : > { %s2689_s7 = scalar_lea.vmem [#allocation2], %s2075_s26 }
  0x31   : > { %2529 = dma.done.wait (%p2614_p4), %s187_s27, 1024  }
  0x32   : > { %2531 = vsyncadd (%p2614_p4), %s187_s27, 4294966272 }
  0x33   : > { %2533 = dma.done.wait (%p41_p1), [#allocation6], 2080  }
  0x34   : > { %2535 = vsyncadd (%p41_p1), [#allocation6], 4294965216  ;;  %v2228_v0 = vld [vmem:[#allocation5 + $0x38] sm:$0xff]  ;;  %v2227_v1 = vld [vmem:[#allocation5 + $0x30] sm:$0xff]  ;;  %s2078_s18 = sshll.u32 %s2685_s20, 7  ;;  %s2237_s29 = sshll.u32 %s2605_s16, 7 }
  0x35   : > { %358 = vmatpush.bf16.msra.mxu0 %v2228_v0  ;;  %2238 = vmatpush.bf16.msra.mxu2 %v2228_v0  ;;  %v2226_v2 = vld [vmem:[#allocation5 + $0x28] sm:$0xff]  ;;  %v2225_v3 = vld [vmem:[#allocation5 + $0x20] sm:$0xff]  ;;  %v2224_v4 = vld [vmem:[#allocation5 + $0x18] sm:$0xff]  ;;  %s3489_s23 = scalar_lea.vmem [#allocation8], %s2078_s18  ;;  %s1970_s4 = scalar_lea.hbm %s3939_s3, %s2237_s29 }
  0x36   : > { %v2223_v5 = vld [vmem:[#allocation5 + $0x10] sm:$0xff]  ;;  %v2222_v6 = vld [vmem:[#allocation5 + $0x8] sm:$0xff]  ;;  %v2221_v7 = vld [vmem:[#allocation5] sm:$0xff]  ;;  %s1971_s5 = sshll.u32 %s3489_s23, 4  ;;  %s1973_s6 = sshll.u32 %s1970_s4, 4  ;;  %s1972_s5 = int_to_ptr.vmem [resolvable:$true] %s1971_s5  ;;  %s1974_s6 = int_to_ptr.hbm [resolvable:$true] %s1973_s6 }
  0x37   : > { %v2213_v8 = vld [vmem:[%s2689_s7] sm:$0xff]  ;;  %v2214_v10 = vld [vmem:[%s2689_s7 + $0x8] sm:$0xff]  ;;  %v2215_v12 = vld [vmem:[%s2689_s7 + $0x10] sm:$0xff]  ;;  %s1959_s16 = scalar_lea.sflag [#allocation4], %s2685_s20  ;;  %s2498_s9 = sshra.s32 %s1974_s6, 4  ;;  %s2499_s9 = int_to_ptr.hbm [resolvable:$true] %s2498_s9 }
  0x38   : > { %v2217_v9 = vld [vmem:[%s2689_s7 + $0x20] sm:$0xff]  ;;  %v2218_v11 = vld [vmem:[%s2689_s7 + $0x28] sm:$0xff]  ;;  %v2219_v13 = vld [vmem:[%s2689_s7 + $0x30] sm:$0xff]  ;;  %s2500_s10 = scalar_lea.hbm %s2499_s9, 128  ;;  %s2504_s24 = scalar_lea.hbm %s3939_s3, 384 }
  0x39   : > { %359 = vmatpush.bf16.msra.mxu0 %v2227_v1  ;;  %2239 = vmatpush.bf16.msra.mxu2 %v2227_v1  ;;  %v2216_v14 = vld [vmem:[%s2689_s7 + $0x18] sm:$0xff]  ;;  %v2707_v16 = vld [vmem:[#allocation7] ss:$0 sm:$0xff]  ;;  %v2235_v22 = vld [vmem:[#allocation5 + $0x70] sm:$0xff]  ;;  %p2501_p1 = scmp.ne.s32.totalorder %s2499_s9, %s2500_s10  ;;  %p2505_p7 = scmp.lt.s32.totalorder %s2499_s9, %s3939_s3 }
  0x3a   : > { %v2220_v15 = vld [vmem:[%s2689_s7 + $0x38] sm:$0xff]  ;;  %v2234_v30 = vld [vmem:[#allocation5 + $0x68] sm:$0xff]  ;;  %v2233_v38 = vld [vmem:[#allocation5 + $0x60] sm:$0xff]  ;;  %p2506_p2 = scmp.lt.s32.totalorder %s2504_s24, %s2500_s10 }
  0x3b   : > { %v2236_v19 = vld [vmem:[#allocation5 + $0x78] sm:$0xff]  ;;  %v2231_v57 = vld [vmem:[#allocation5 + $0x50] sm:$0xff]  ;;  %p2502_p4 = pnand %p2501_p1, %p2655_p3 }
  0x3c   : > { %1189 = vmatpush.bf16.msra.mxu1 %v2236_v19  ;;  %2246 = vmatpush.bf16.msra.mxu3 %v2236_v19  ;;  %v2232_v48 = vld [vmem:[#allocation5 + $0x58] sm:$0xff]  ;;  %p2507_p9 = por %p2506_p2, %p2505_p7 }
  0x3d   : > { %360 = vmatpush.bf16.msra.mxu0 %v2226_v2  ;;  %2240 = vmatpush.bf16.msra.mxu2 %v2226_v2  ;;  %p2503_p8 = pneg %p2502_p4 }
  0x3f   : > { %p2508_p10 = pnand %p2507_p9, %p2503_p8 }
  0x40   : > { %1190 = vmatpush.bf16.msra.mxu1 %v2235_v22  ;;  %2247 = vmatpush.bf16.msra.mxu3 %v2235_v22 }
  0x41   : > { %361 = vmatpush.bf16.msra.mxu0 %v2225_v3  ;;  %2241 = vmatpush.bf16.msra.mxu2 %v2225_v3 }
  0x44   : > { %1191 = vmatpush.bf16.msra.mxu1 %v2234_v30  ;;  %2248 = vmatpush.bf16.msra.mxu3 %v2234_v30 }
  0x45   : > { %362 = vmatpush.bf16.msra.mxu0 %v2224_v4  ;;  %2242 = vmatpush.bf16.msra.mxu2 %v2224_v4  ;;  %v2230_v4 = vld [vmem:[#allocation5 + $0x48] sm:$0xff] }
  0x48   : > { %1192 = vmatpush.bf16.msra.mxu1 %v2233_v38  ;;  %2249 = vmatpush.bf16.msra.mxu3 %v2233_v38 }
  0x49   : > { %363 = vmatpush.bf16.msra.mxu0 %v2223_v5  ;;  %2243 = vmatpush.bf16.msra.mxu2 %v2223_v5 }
  0x4c   : > { %1193 = vmatpush.bf16.msra.mxu1 %v2232_v48  ;;  %2250 = vmatpush.bf16.msra.mxu3 %v2232_v48 }
  0x4d   : > { %364 = vmatpush.bf16.msra.mxu0 %v2222_v6  ;;  %2244 = vmatpush.bf16.msra.mxu2 %v2222_v6 }
  0x50   : > { %1194 = vmatpush.bf16.msra.mxu1 %v2231_v57  ;;  %2251 = vmatpush.bf16.msra.mxu3 %v2231_v57 }
  0x51   : > { %365 = vmatpush.bf16.msra.mxu0 %v2221_v7  ;;  %2245 = vmatpush.bf16.msra.mxu2 %v2221_v7 }
  0x54   : > { %366 = vmatmul.bf16.vlgmr.msra.gmra.mxu0 %v2213_v8  ;;  %386 = vmatmul.bf16.vlgmr.msra.gmra.mxu2 %v2217_v9 }
  0x55   : > { %1195 = vmatpush.bf16.msra.mxu1 %v2230_v4  ;;  %2252 = vmatpush.bf16.msra.mxu3 %v2230_v4 }
  0x64   : > { %371 = vmatmul.bf16.gmra.mxu0 %v2214_v10  ;;  %391 = vmatmul.bf16.gmra.mxu2 %v2218_v11 }
  0x74   : > { %376 = vmatmul.bf16.gmra.mxu0 %v2215_v12  ;;  %396 = vmatmul.bf16.gmra.mxu2 %v2219_v13 }
  0x84   : > { %381 = vmatmul.bf16.gmra.mxu0 %v2216_v14  ;;  %401 = vmatmul.bf16.gmra.mxu2 %v2220_v15  ;;  %v2229_v14 = vld [vmem:[#allocation5 + $0x40] sm:$0xff] }
  0x85   : > { %1196 = vmatpush.bf16.msra.mxu1 %v2229_v14  ;;  %2253 = vmatpush.bf16.msra.mxu3 %v2229_v14 }
  0xd1   : > { %v367_v17 = vpop.f32.mrf.mxu0 }
  0xd2   : > { %v2710_v18 = vadd.f32 %v2707_v16, %v367_v17 }
  0xd4   : > { %v2713_v20 = vmul.f32 0.70710677, %v2710_v18 }
  0xd6   : > { %v439_v21 = vmul.f32 %v2713_v20, %v2713_v20 }
  0xd7   : > { %v387_v23 = vpop.f32.mrf.mxu2 }
  0xd8   : > { %v2717_v24 = vmin.f32 %v439_v21, 16.0  ;;  %v2720_v25 = vadd.f32 %v2707_v16, %v387_v23 }
  0xd9   : > { %v369_v26 = vpop.f32.mrf.mxu0 }
  0xda   : > { %v441_v27 = vmul.f32 2.1237322e-06, %v2717_v24  ;;  %v2724_v28 = vmul.f32 0.70710677, %v2720_v25  ;;  %v2727_v29 = vadd.f32 %v2707_v16, %v369_v26  ;;  %v452_v36 = vmul.f32 3.8918573e-05, %v2717_v24 }
  0xdc   : > { %v759_v31 = vmul.f32 %v2724_v28, %v2724_v28  ;;  %v2732_v32 = vmul.f32 0.70710677, %v2727_v29  ;;  %v442_v33 = vadd.f32 0.00028619796, %v441_v27  ;;  %v453_v45 = vadd.f32 0.001143296, %v452_v36 }
  0xdd   : > { %v2801_v36 = vmul.f32 0.5, %v2710_v18  ;;  %v2814_v48 = vmul.f32 0.5, %v2727_v29 }
  0xde   : > { %v2734_v34 = vmin.f32 %v759_v31, 16.0  ;;  %v479_v35 = vmul.f32 %v2732_v32, %v2732_v32  ;;  %v443_v41 = vmul.f32 %v442_v33, %v2717_v24  ;;  %v454_v53 = vmul.f32 %v453_v45, %v2717_v24 }
  0xdf   : > { %v389_v37 = vpop.f32.mrf.mxu2 }
  0xe0   : > { %v2739_v39 = vmin.f32 %v479_v35, 16.0  ;;  %v2742_v40 = vadd.f32 %v2707_v16, %v389_v37  ;;  %v761_v42 = vmul.f32 2.1237322e-06, %v2734_v34  ;;  %v444_v49 = vadd.f32 0.0036580483, %v443_v41 }
  0xe1   : > { %v372_v43 = vpop.f32.mrf.mxu0  ;;  %v455_v63 = vadd.f32 0.014752088, %v454_v53  ;;  %v2804_v37 = vmul.f32 0.5, %v2720_v25 }
  0xe2   : > { %v481_v44 = vmul.f32 2.1237322e-06, %v2739_v39  ;;  %v2748_v46 = vmul.f32 0.70710677, %v2742_v40  ;;  %v2751_v47 = vadd.f32 %v2707_v16, %v372_v43  ;;  %v762_v50 = vadd.f32 0.00028619796, %v761_v42 }
  0xe3   : > { %v445_v59 = vmul.f32 %v444_v49, %v2717_v24  ;;  %v456_v10 = vmul.f32 %v455_v63, %v2717_v24 }
  0xe4   : > { %v2754_v51 = vmul.f32 0.70710677, %v2751_v47  ;;  %v482_v52 = vadd.f32 0.00028619796, %v481_v44  ;;  %v799_v54 = vmul.f32 %v2748_v46, %v2748_v46  ;;  %v763_v60 = vmul.f32 %v762_v50, %v2734_v34 }
  0xe5   : > { %v446_v5 = vadd.f32 0.05243302, %v445_v59  ;;  %v457_v30 = vadd.f32 0.112945676, %v456_v10  ;;  %v2821_v50 = vmul.f32 0.5, %v2742_v40 }
  0xe6   : > { %v519_v55 = vmul.f32 %v2754_v51, %v2754_v51  ;;  %v483_v62 = vmul.f32 %v482_v52, %v2739_v39  ;;  %v2767_v0 = vmin.f32 %v799_v54, 16.0  ;;  %v764_v6 = vadd.f32 0.0036580483, %v763_v60 }
  0xe7   : > { %v392_v56 = vpop.f32.mrf.mxu2  ;;  %v447_v21 = vmul.f32 %v446_v5, %v2717_v24  ;;  %v458_v25 = vmul.f32 %v457_v30, %v2717_v24 }
  0xe8   : > { %v2762_v58 = vadd.f32 %v2707_v16, %v392_v56  ;;  %v2769_v1 = vmin.f32 %v519_v55, 16.0  ;;  %v484_v8 = vadd.f32 0.0036580483, %v483_v62  ;;  %v801_v11 = vmul.f32 2.1237322e-06, %v2767_v0 }
  0xe9   : > { %v374_v61 = vpop.f32.mrf.mxu0  ;;  %v765_v22 = vmul.f32 %v764_v6, %v2734_v34  ;;  %v448_v42 = vadd.f32 0.18741608, %v447_v21  ;;  %v2828_v56 = vmul.f32 0.5, %v2751_v47  ;;  %v459_v6 = vadd.f32 0.4994258, %v458_v25 }
  0xea   : > { %v2772_v2 = vmul.f32 0.70710677, %v2762_v58  ;;  %v2775_v3 = vadd.f32 %v2707_v16, %v374_v61  ;;  %v521_v12 = vmul.f32 2.1237322e-06, %v2769_v1  ;;  %v485_v26 = vmul.f32 %v484_v8, %v2739_v39 }
  0xeb   : > { %v802_v31 = vadd.f32 0.00028619796, %v801_v11  ;;  %v766_v43 = vadd.f32 0.05243302, %v765_v22  ;;  %v449_v40 = vmul.f32 %v448_v42, %v2717_v24  ;;  %v2852_v22 = vmul.f32 0.5, %v2762_v58 }
  0xec   : > { %v839_v7 = vmul.f32 %v2772_v2, %v2772_v2  ;;  %v2780_v9 = vmul.f32 0.70710677, %v2775_v3  ;;  %v522_v33 = vadd.f32 0.00028619796, %v521_v12  ;;  %v486_v18 = vadd.f32 0.05243302, %v485_v26 }
  0xed   : > { %v803_v52 = vmul.f32 %v802_v31, %v2767_v0  ;;  %v767_v60 = vmul.f32 %v766_v43, %v2734_v34  ;;  %3953 = vst [vmem:[#allocation12_spill] sm:$0xff] %v2852_v22 }
  0xee   : > { %v2785_v15 = vmin.f32 %v839_v7, 16.0  ;;  %v559_v17 = vmul.f32 %v2780_v9, %v2780_v9  ;;  %v523_v53 = vmul.f32 %v522_v33, %v2769_v1  ;;  %v487_v4 = vmul.f32 %v486_v18, %v2739_v39 }
  0xef   : > { %v394_v13 = vpop.f32.mrf.mxu2  ;;  %v804_v7 = vadd.f32 0.0036580483, %v803_v52  ;;  %v768_v21 = vadd.f32 0.18741608, %v767_v60 }
  0xf0   : > { %v2790_v19 = vadd.f32 %v2707_v16, %v394_v13  ;;  %v2795_v27 = vmin.f32 %v559_v17, 16.0  ;;  %v841_v38 = vmul.f32 2.1237322e-06, %v2785_v15  ;;  %v524_v8 = vadd.f32 0.0036580483, %v523_v53 }
  0xf1   : > { %v377_v23 = vpop.f32.mrf.mxu0  ;;  %v450_v17 = vadd.f32 1.1283791, %v449_v40  ;;  %v488_v26 = vadd.f32 0.18741608, %v487_v4  ;;  %v769_v53 = vmul.f32 %v768_v21, %v2734_v34 }
  0xf2   : > { %v2798_v35 = vmul.f32 0.70710677, %v2790_v19  ;;  %v2808_v41 = vadd.f32 %v2707_v16, %v377_v23  ;;  %v561_v44 = vmul.f32 2.1237322e-06, %v2795_v27  ;;  %v842_v29 = vadd.f32 0.00028619796, %v841_v38 }
  0xf3   : > { %v805_v38 = vmul.f32 %v804_v7, %v2767_v0  ;;  %v525_v42 = vmul.f32 %v524_v8, %v2769_v1  ;;  %v2890_v21 = vmul.f32 0.5, %v2790_v19 }
  0xf4   : > { %v879_v45 = vmul.f32 %v2798_v35, %v2798_v35  ;;  %v2817_v49 = vmul.f32 0.70710677, %v2808_v41  ;;  %v562_v61 = vadd.f32 0.00028619796, %v561_v44  ;;  %v843_v11 = vmul.f32 %v842_v29, %v2785_v15 }
  0xf5   : > { %3955 = vst [vmem:[#allocation14_spill] sm:$0xff] %v2890_v21 }
  0xf6   : > { %v2825_v54 = vmin.f32 %v879_v45, 16.0  ;;  %v599_v57 = vmul.f32 %v2817_v49, %v2817_v49  ;;  %v563_v23 = vmul.f32 %v562_v61, %v2795_v27  ;;  %v460_v45 = vmul.f32 %v459_v6, %v2717_v24 }
  0xf7   : > { %v397_v55 = vpop.f32.mrf.mxu2  ;;  %v844_v58 = vadd.f32 0.0036580483, %v843_v11  ;;  %v489_v24 = vmul.f32 %v488_v26, %v2739_v39 }
  0xf8   : > { %v2833_v59 = vadd.f32 %v2707_v16, %v397_v55  ;;  %v881_v62 = vmul.f32 2.1237322e-06, %v2825_v54  ;;  %v2839_v5 = vmin.f32 %v599_v57, 16.0  ;;  %v2871_v55 = vmul.f32 0.5, %v2775_v3 }
  0xf9   : > { %v379_v63 = vpop.f32.mrf.mxu0  ;;  %v564_v29 = vadd.f32 0.0036580483, %v563_v23  ;;  %v2881_v7 = vadd.f32 1.0, %v460_v45  ;;  %v526_v3 = vadd.f32 0.05243302, %v525_v42  ;;  %v845_v8 = vmul.f32 %v844_v58, %v2785_v15 }
  0xfa   : > { %v2842_v47 = vmul.f32 0.70710677, %v2833_v59  ;;  %v882_v10 = vadd.f32 0.00028619796, %v881_v62  ;;  %v601_v12 = vmul.f32 2.1237322e-06, %v2839_v5  ;;  %v2849_v14 = vadd.f32 %v2707_v16, %v379_v63 }
  0xfb   : > { %v806_v63 = vadd.f32 0.05243302, %v805_v38  ;;  %v490_v26 = vadd.f32 1.1283791, %v489_v24  ;;  %2329 = vrcp.f32 %v2881_v7  ;;  %vm467_vm1 = vweird.f32 %v2881_v7 }
  0xfc   : > { %v919_v13 = vmul.f32 %v2842_v47, %v2842_v47  ;;  %v883_v30 = vmul.f32 %v882_v10, %v2825_v54  ;;  %v602_v31 = vadd.f32 0.00028619796, %v601_v12  ;;  %v2861_v43 = vmul.f32 0.70710677, %v2849_v14 }
  0xfd   : > { %v770_v12 = vadd.f32 1.1283791, %v769_v53  ;;  %v807_v19 = vmul.f32 %v806_v63, %v2767_v0 }
  0xfe   : > { %v2856_v33 = vmin.f32 %v919_v13, 16.0  ;;  %v603_v18 = vmul.f32 %v602_v31, %v2839_v5  ;;  %v639_v57 = vmul.f32 %v2861_v43, %v2861_v43  ;;  %v884_v60 = vadd.f32 0.0036580483, %v883_v30 }
  0xff   : > { %v399_v44 = vpop.f32.mrf.mxu2  ;;  %v565_v13 = vmul.f32 %v564_v29, %v2795_v27 }
 0x100   : > { %v921_v25 = vmul.f32 2.1237322e-06, %v2856_v33  ;;  %v2867_v52 = vadd.f32 %v2707_v16, %v399_v44  ;;  %v604_v61 = vadd.f32 0.0036580483, %v603_v18  ;;  %v2876_v4 = vmin.f32 %v639_v57, 16.0 }
 0x101   : > { %v382_v40 = vpop.f32.mrf.mxu0  ;;  %v885_v30 = vmul.f32 %v884_v60, %v2825_v54  ;;  %v527_v18 = vmul.f32 %v526_v3, %v2769_v1  ;;  %v566_v29 = vadd.f32 0.05243302, %v565_v13 }
 0x102   : > { %v922_v62 = vadd.f32 0.00028619796, %v921_v25  ;;  %v2879_v6 = vadd.f32 %v2707_v16, %v382_v40  ;;  %v2886_v11 = vmul.f32 0.70710677, %v2867_v52  ;;  %v641_v23 = vmul.f32 2.1237322e-06, %v2876_v4 }
 0x103   : > { %v605_v31 = vmul.f32 %v604_v61, %v2839_v5  ;;  %v846_v25 = vadd.f32 0.05243302, %v845_v8  ;;  %v2912_v61 = vmul.f32 %v450_v17, %v2713_v20  ;;  %v2927_v17 = vpop.eup %2329 }
 0x104   : > { %3954 = vst [vmem:[#allocation13_spill] sm:$0xff] %v2879_v6  ;;  %v923_v10 = vmul.f32 %v922_v62, %v2856_v33  ;;  %v959_v38 = vmul.f32 %v2886_v11, %v2886_v11  ;;  %v642_v44 = vadd.f32 0.00028619796, %v641_v23  ;;  %v2898_v45 = vmul.f32 0.70710677, %v2879_v6 }
 0x105   : > { %v886_v62 = vadd.f32 0.05243302, %v885_v30  ;;  %v606_v63 = vadd.f32 0.05243302, %v605_v31  ;;  %v528_v30 = vadd.f32 0.18741608, %v527_v18  ;;  %v847_v31 = vmul.f32 %v846_v25, %v2785_v15 }
 0x106   : > { %v924_v42 = vadd.f32 0.0036580483, %v923_v10  ;;  %3956 = vst [vmem:[#allocation15_spill] sm:$0xff] %v2898_v45  ;;  %v2903_v53 = vmin.f32 %v959_v38, 16.0  ;;  %v643_v57 = vmul.f32 %v642_v44, %v2876_v4  ;;  %v679_v40 = vmul.f32 %v2898_v45, %v2898_v45 }
 0x107   : > { %v402_v58 = vpop.f32.mrf.mxu2  ;;  %v2922_v38 = vmul.f32 %v770_v12, %v2724_v28  ;;  %v808_v44 = vadd.f32 0.18741608, %v807_v19  ;;  %v607_v19 = vmul.f32 %v606_v63, %v2839_v5  ;;  %vm468_vm0 = vweird.f32 %v2927_v17 }
 0x108   : > { %v2909_v24 = vadd.f32 %v2707_v16, %v402_v58  ;;  %v961_v3 = vmul.f32 2.1237322e-06, %v2903_v53  ;;  %v925_v8 = vmul.f32 %v924_v42, %v2856_v33  ;;  %v644_v10 = vadd.f32 0.0036580483, %v643_v57  ;;  %vm3014_vm2 = vmor %vm467_vm1, %vm468_vm0 }
 0x109   : > { %v384_v60 = vpop.f32.mrf.mxu0  ;;  %v2916_v13 = vmin.f32 %v679_v40, 16.0  ;;  %v567_v40 = vmul.f32 %v566_v29, %v2795_v27  ;;  %v463_v29 = vmul.f32 %v2927_v17, %v2881_v7  ;;  %v608_v22 = vadd.f32 0.18741608, %v607_v19 }
 0x10a   : > { %3957 = vst [vmem:[#allocation16_spill] sm:$0xff] %v2909_v24  ;;  %v2919_v23 = vadd.f32 %v2707_v16, %v384_v60  ;;  %v962_v58 = vadd.f32 0.00028619796, %v961_v3  ;;  %v2925_v20 = vmul.f32 0.70710677, %v2909_v24  ;;  %v645_v42 = vmul.f32 %v644_v10, %v2876_v4 }
 0x10b   : > { %v681_v57 = vmul.f32 2.1237322e-06, %v2916_v13  ;;  %v887_v60 = vmul.f32 %v886_v62, %v2825_v54  ;;  %v926_v3 = vadd.f32 0.05243302, %v925_v8  ;;  %v809_v62 = vmul.f32 %v808_v44, %v2767_v0 }
 0x10c   : > { %3958 = vst [vmem:[#allocation17_spill] sm:$0xff] %v2919_v23  ;;  %v963_v28 = vmul.f32 %v962_v58, %v2903_v53  ;;  %v999_v12 = vmul.f32 %v2925_v20, %v2925_v20  ;;  %v2939_v18 = vmul.f32 0.70710677, %v2919_v23  ;;  %v646_v25 = vadd.f32 0.05243302, %v645_v42 }
 0x10d   : > { %3959 = vst [vmem:[#allocation18_spill] sm:$0xff] %v2925_v20  ;;  %v682_v24 = vadd.f32 0.00028619796, %v681_v57  ;;  %v529_v58 = vmul.f32 %v528_v30, %v2769_v1  ;;  %v2951_v8 = vmul.f32 %v490_v26, %v2732_v32  ;;  %v848_v42 = vadd.f32 0.18741608, %v847_v31 }
 0x10e   : > { %3960 = vst [vmem:[#allocation19_spill] sm:$0xff] %v2939_v18  ;;  %v964_v10 = vadd.f32 0.0036580483, %v963_v28  ;;  %v2941_v6 = vmin.f32 %v999_v12, 16.0  ;;  %v719_v63 = vmul.f32 %v2939_v18, %v2939_v18  ;;  %v568_v12 = vadd.f32 0.18741608, %v567_v40 }
 0x10f   : > { %v404_v21 = vpop.f32.mrf.mxu2  ;;  %v683_v20 = vmul.f32 %v682_v24, %v2916_v13  ;;  %v888_v23 = vadd.f32 0.18741608, %v887_v60  ;;  %v927_v30 = vmul.f32 %v926_v3, %v2856_v33  ;;  %v647_v24 = vmul.f32 %v646_v25, %v2876_v4 }
 0x110   : > { %v965_v57 = vmul.f32 %v964_v10, %v2903_v53  ;;  %v1001_v28 = vmul.f32 2.1237322e-06, %v2941_v6  ;;  %v2956_v44 = vadd.f32 %v2707_v16, %v404_v21  ;;  %v2960_v18 = vmin.f32 %v719_v63, 16.0 }
 0x111   : > { %v684_v45 = vadd.f32 0.0036580483, %v683_v20  ;;  %v810_v32 = vadd.f32 1.1283791, %v809_v62  ;;  %v530_v26 = vadd.f32 1.1283791, %v529_v58  ;;  %v849_v40 = vmul.f32 %v848_v42, %v2785_v15 }
 0x112   : > { %3961 = vst [vmem:[#allocation20_spill] sm:$0xff] %v2956_v44  ;;  %v2963_v31 = vmul.f32 0.5, %v2808_v41  ;;  %v464_v10 = vsub.f32 1.0, %v463_v29  ;;  %v2967_v60 = vmul.f32 0.5, %v2833_v59  ;;  %v966_v16 = vadd.f32 0.05243302, %v965_v57 }
 0x113   : > { %v1002_v21 = vadd.f32 0.00028619796, %v1001_v28  ;;  %v569_v19 = vmul.f32 %v568_v12, %v2795_v27  ;;  %v889_v3 = vmul.f32 %v888_v23, %v2825_v54  ;;  %v609_v20 = vmul.f32 %v608_v22, %v2839_v5 }
 0x114   : > { %3962 = vst [vmem:[#allocation21_spill] sm:$0xff] %v2967_v60  ;;  %v2973_v25 = vmul.f32 0.70710677, %v2956_v44  ;;  %v928_v62 = vadd.f32 0.18741608, %v927_v30  ;;  %v685_v29 = vmul.f32 %v684_v45, %v2916_v13  ;;  %v2978_v59 = vmul.f32 %v810_v32, %v2748_v46 }
 0x115   : > { %v648_v41 = vadd.f32 0.18741608, %v647_v24  ;;  %v721_v58 = vmul.f32 2.1237322e-06, %v2960_v18  ;;  %v2981_v63 = vmul.f32 %v530_v26, %v2754_v51  ;;  %v2984_v42 = vmul.f32 0.5, %v2849_v14 }
 0x116   : > { %3963 = vst [vmem:[#allocation22_spill] sm:$0xff] %v2973_v25  ;;  %v465_v22 = vmul.f32 %v2927_v17, %v464_v10  ;;  %v850_v23 = vadd.f32 1.1283791, %v849_v40  ;;  %v967_v57 = vmul.f32 %v966_v16, %v2903_v53  ;;  %v1003_v28 = vmul.f32 %v1002_v21, %v2941_v6 }
 0x117   : > { %3964 = vst [vmem:[#allocation23_spill] sm:$0xff] %v2984_v42  ;;  %v492_v45 = vmul.f32 3.8918573e-05, %v2739_v39  ;;  %v570_v12 = vadd.f32 1.1283791, %v569_v19  ;;  %v1039_v46 = vmul.f32 %v2973_v25, %v2973_v25  ;;  %v929_v51 = vmul.f32 %v928_v62, %v2856_v33 }
 0x118   : > { %v890_v30 = vadd.f32 1.1283791, %v889_v3  ;;  %v2990_v24 = vadd.f32 1.1283791, %v609_v20  ;;  %v649_v14 = vmul.f32 %v648_v41, %v2876_v4  ;;  %v686_v32 = vadd.f32 0.05243302, %v685_v29 }
 0x119   : > { %v722_v26 = vadd.f32 0.00028619796, %v721_v58  ;;  %v466_v10 = vadd.f32 %v2927_v17, %v465_v22  ;;  %v471_v40 = vand.u32 2147483647, %v2881_v7  ;;  %v493_v16 = vadd.f32 0.001143296, %v492_v45 }
 0x11a   : > { %v3000_v21 = vmul.f32 0.5, %v2867_v52  ;;  %v968_v19 = vadd.f32 0.18741608, %v967_v57  ;;  %v1004_v3 = vadd.f32 0.0036580483, %v1003_v28  ;;  %v473_v20 = vand.u32 2147483648, %v2881_v7 }
 0x11b   : > { %v3003_v44 = vmin.f32 %v1039_v46, 16.0  ;;  %v494_v62 = vmul.f32 %v493_v16, %v2739_v39  ;;  %v772_v41 = vmul.f32 3.8918573e-05, %v2734_v34  ;;  %v930_v29 = vadd.f32 1.1283791, %v929_v51 }
 0x11c   : > { %3965 = vst [vmem:[#allocation24_spill] sm:$0xff] %v3000_v21  ;;  %v3008_v58 = vadd.f32 1.1283791, %v649_v14  ;;  %v687_v22 = vmul.f32 %v686_v32, %v2916_v13  ;;  %v723_v52 = vmul.f32 %v722_v26, %v2960_v18  ;;  %v470_v7 = vsel %vm3014_vm2, %v2927_v17, %v466_v10 }
 0x11d   : > { %vm472_vm3 = vcmp.eq.f32.partialorder %v471_v40, 8.507059e+37  ;;  %v495_v28 = vadd.f32 0.014752088, %v494_v62  ;;  %v773_v45 = vadd.f32 0.001143296, %v772_v41  ;;  %v969_v46 = vmul.f32 %v968_v19, %v2903_v53 }
 0x11e   : > { %v1005_v51 = vmul.f32 %v1004_v3, %v2941_v6  ;;  %v474_v14 = vor.u32 1.1754944e-38, %v473_v20  ;;  %v812_v32 = vmul.f32 3.8918573e-05, %v2767_v0  ;;  %v1041_v26 = vmul.f32 2.1237322e-06, %v3003_v44 }
 0x11f   : > { %v496_v16 = vmul.f32 %v495_v28, %v2739_v39  ;;  %v774_v25 = vmul.f32 %v773_v45, %v2734_v34  ;;  %v532_v21 = vmul.f32 3.8918573e-05, %v2769_v1  ;;  %v688_v57 = vadd.f32 0.18741608, %v687_v22 }
 0x120   : > { %v724_v17 = vadd.f32 0.0036580483, %v723_v52  ;;  %v475_v10 = vsel %vm472_vm3, %v474_v14, %v470_v7  ;;  %v813_v40 = vadd.f32 0.001143296, %v812_v32  ;;  %v3029_v62 = vmul.f32 %v850_v23, %v2772_v2 }
 0x121   : > { %v497_v19 = vadd.f32 0.112945676, %v496_v16  ;;  %v775_v3 = vadd.f32 0.014752088, %v774_v25  ;;  %v533_v20 = vadd.f32 0.001143296, %v532_v21  ;;  %v476_v42 = vmul.f32 %v475_v10, %v2912_v61 }
 0x122   : > { %v3031_v41 = vadd.f32 1.1283791, %v969_v46  ;;  %v3033_v60 = vadd.f32 0.05243302, %v1005_v51  ;;  %v814_v28 = vmul.f32 %v813_v40, %v2767_v0  ;;  %v572_v45 = vmul.f32 3.8918573e-05, %v2795_v27 }
 0x123   : > { %v498_v22 = vmul.f32 %v497_v19, %v2739_v39  ;;  %v776_v52 = vmul.f32 %v775_v3, %v2734_v34  ;;  %v534_v2 = vmul.f32 %v533_v20, %v2769_v1  ;;  %v3042_v23 = vmul.f32 %v570_v12, %v2780_v9 }
 0x124   : > { %3968 = vst [vmem:[#allocation25_spill] sm:$0xff] %v3033_v60  ;;  %v1042_v25 = vadd.f32 0.00028619796, %v1041_v26  ;;  %v815_v21 = vadd.f32 0.014752088, %v814_v28  ;;  %v3045_v46 = vmul.f32 %v890_v30, %v2798_v35  ;;  %v725_v61 = vmul.f32 %v724_v17, %v2960_v18 }
 0x125   : > { %v573_v7 = vadd.f32 0.001143296, %v572_v45  ;;  %v499_v51 = vadd.f32 0.4994258, %v498_v22  ;;  %v777_v14 = vadd.f32 0.112945676, %v776_v52  ;;  %v3056_v35 = vmul.f32 %v2990_v24, %v2817_v49 }
 0x126   : > { %v535_v32 = vadd.f32 0.014752088, %v534_v2  ;;  %v816_v16 = vmul.f32 %v815_v21, %v2767_v0  ;;  %v852_v40 = vmul.f32 3.8918573e-05, %v2785_v15  ;;  %v2143_v19 = vclamps-f32 %v476_v42, 1.0 }
 0x127   : > { %v574_v10 = vmul.f32 %v573_v7, %v2795_v27  ;;  %v500_v9 = vmul.f32 %v499_v51, %v2739_v39  ;;  %v778_v12 = vmul.f32 %v777_v14, %v2734_v34  ;;  %v892_v17 = vmul.f32 3.8918573e-05, %v2825_v54 }
 0x128   : > { %v536_v26 = vmul.f32 %v535_v32, %v2769_v1  ;;  %v817_v30 = vadd.f32 0.112945676, %v816_v16  ;;  %v3060_v20 = vmul.f32 %v930_v29, %v2842_v47  ;;  %v689_v39 = vmul.f32 %v688_v57, %v2916_v13 }
 0x129   : > { %v575_v3 = vadd.f32 0.014752088, %v574_v10  ;;  %v3062_v28 = vadd.f32 1.0, %v500_v9  ;;  %v779_v42 = vadd.f32 0.4994258, %v778_v12  ;;  %v1043_v24 = vmul.f32 %v1042_v25, %v3003_v44 }
 0x12a   : > { %v537_v45 = vadd.f32 0.112945676, %v536_v26  ;;  %v818_v22 = vmul.f32 %v817_v30, %v2767_v0  ;;  %v853_v2 = vadd.f32 0.001143296, %v852_v40  ;;  %v726_v49 = vadd.f32 0.05243302, %v725_v61 }
 0x12b   : > { %v576_v52 = vmul.f32 %v575_v3, %v2795_v27  ;;  %2331 = vrcp.f32 %v3062_v28  ;;  %v1079_v21 = vadd.f32 1.0, %v2143_v19  ;;  %v780_v47 = vmul.f32 %v779_v42, %v2734_v34 }
 0x12c   : > { %v819_v29 = vadd.f32 0.4994258, %v818_v22  ;;  %v538_v7 = vmul.f32 %v537_v45, %v2769_v1  ;;  %v511_v14 = vand.u32 2147483647, %v3062_v28  ;;  %v513_v57 = vand.u32 2147483648, %v3062_v28 }
 0x12d   : > { %v577_v51 = vadd.f32 0.112945676, %v576_v52  ;;  %v854_v32 = vmul.f32 %v853_v2, %v2785_v15  ;;  %v893_v16 = vadd.f32 0.001143296, %v892_v17  ;;  %v3074_v10 = vadd.f32 1.0, %v780_v47 }
 0x12e   : > { %v820_v25 = vmul.f32 %v819_v29, %v2767_v0  ;;  %v539_v61 = vadd.f32 0.4994258, %v538_v7  ;;  %v3080_v34 = vmul.f32 %v3008_v58, %v2861_v43  ;;  %v3082_v19 = vadd.f32 1.1283791, %v689_v39 }
 0x12f   : > { %v578_v40 = vmul.f32 %v577_v51, %v2795_v27  ;;  %v3084_v9 = vadd.f32 0.0036580483, %v1043_v24  ;;  %v855_v12 = vadd.f32 0.014752088, %v854_v32  ;;  %v3087_v26 = vmul.f32 %v726_v49, %v2960_v18 }
 0x130   : > { %v3090_v30 = vmul.f32 %v1079_v21, %v2801_v36  ;;  %2333 = vrcp.f32 %v3074_v10  ;;  %v894_v0 = vmul.f32 %v893_v16, %v2825_v54  ;;  %v3094_v17 = vadd.f32 1.0, %v820_v25 }
 0x131   : > { %v2332_v3 = vpop.eup %2331  ;;  %v540_v43 = vmul.f32 %v539_v61, %v2769_v1  ;;  %v579_v58 = vadd.f32 0.4994258, %v578_v40  ;;  %v856_v42 = vmul.f32 %v855_v12, %v2785_v15  ;;  %vm507_vm4 = vweird.f32 %v3062_v28 }
 0x132   : > { %v503_v45 = vmul.f32 %v2332_v3, %v3062_v28  ;;  %vm3100_vm5 = vcmp.eq.f32.partialorder %v511_v14, 8.507059e+37  ;;  %v514_v36 = vor.u32 1.1754944e-38, %v513_v57  ;;  %v791_v22 = vand.u32 2147483647, %v3074_v10 }
 0x133   : > { %v793_v52 = vand.u32 2147483648, %v3074_v10  ;;  %2335 = vrcp.f32 %v3094_v17  ;;  %v612_v1 = vmul.f32 3.8918573e-05, %v2839_v5  ;;  %v3108_v49 = vadd.f32 1.0, %v540_v43 }
 0x134   : > { %v504_v2 = vsub.f32 1.0, %v503_v45  ;;  %v580_v24 = vmul.f32 %v579_v58, %v2795_v27  ;;  %v857_v21 = vadd.f32 0.112945676, %v856_v42  ;;  %vm508_vm6 = vweird.f32 %v2332_v3 }
 0x135   : > { %vm787_vm7 = vweird.f32 %v3074_v10  ;;  %v895_v47 = vadd.f32 0.014752088, %v894_v0  ;;  %v3113_v29 = vmul.f32 3.8918573e-05, %v2876_v4  ;;  %v831_v14 = vand.u32 2147483647, %v3094_v17  ;;  %vm509_vm10 = vmor %vm507_vm4, %vm508_vm6 }
 0x136   : > { %v2334_v7 = vpop.eup %2333  ;;  %v505_v51 = vmul.f32 %v2332_v3, %v504_v2  ;;  %v833_v57 = vand.u32 2147483648, %v3094_v17  ;;  %2337 = vrcp.f32 %v3108_v49  ;;  %vm3119_vm8 = vcmp.eq.f32.partialorder %v791_v22, 8.507059e+37 }
 0x137   : > { %v783_v32 = vmul.f32 %v2334_v7, %v3074_v10  ;;  %v794_v16 = vor.u32 1.1754944e-38, %v793_v52  ;;  %v3123_v25 = vadd.f32 1.0, %v580_v24  ;;  %vm827_vm9 = vweird.f32 %v3094_v17 }
 0x138   : > { %v506_v61 = vadd.f32 %v2332_v3, %v505_v51  ;;  %v858_v40 = vmul.f32 %v857_v21, %v2785_v15  ;;  %v896_v12 = vmul.f32 %v895_v47, %v2825_v54  ;;  %v551_v58 = vand.u32 2147483647, %v3108_v49 }
 0x139   : > { %v2336_v0 = vpop.eup %2335  ;;  %v784_v43 = vsub.f32 1.0, %v783_v32  ;;  %v553_v42 = vand.u32 2147483648, %v3108_v49  ;;  %2339 = vrcp.f32 %v3123_v25  ;;  %vm3135_vm11 = vcmp.eq.f32.partialorder %v831_v14, 8.507059e+37 }
 0x13a   : > { %v510_v45 = vsel %vm509_vm10, %v2332_v3, %v506_v61  ;;  %v823_v22 = vmul.f32 %v2336_v0, %v3094_v17  ;;  %v834_v2 = vor.u32 1.1754944e-38, %v833_v57  ;;  %v613_v24 = vadd.f32 0.001143296, %v612_v1 }
 0x13b   : > { %v515_v28 = vsel %vm3100_vm5, %v514_v36, %v510_v45  ;;  %v785_v21 = vmul.f32 %v2334_v7, %v784_v43  ;;  %vm788_vm12 = vweird.f32 %v2334_v7  ;;  %vm547_vm13 = vweird.f32 %v3108_v49 }
 0x13c   : > { %v859_v47 = vadd.f32 0.4994258, %v858_v40  ;;  %v2338_v51 = vpop.eup %2337  ;;  %v516_v32 = vmul.f32 %v515_v28, %v2951_v8  ;;  %v824_v3 = vsub.f32 1.0, %v823_v22  ;;  %v591_v61 = vand.u32 2147483647, %v3123_v25  ;;  %vm789_vm0 = vmor %vm787_vm7, %vm788_vm12 }
 0x13d   : > { %v897_v14 = vadd.f32 0.112945676, %v896_v12  ;;  %v786_v60 = vadd.f32 %v2334_v7, %v785_v21  ;;  %vm828_vm14 = vweird.f32 %v2336_v0  ;;  %v543_v57 = vmul.f32 %v2338_v51, %v3108_v49 }
 0x13e   : > { %vm3145_vm15 = vcmp.eq.f32.partialorder %v551_v58, 8.507059e+37  ;;  %v554_v39 = vor.u32 1.1754944e-38, %v553_v42  ;;  %v2144_v36 = vclamps-f32 %v516_v32, 1.0  ;;  %v825_v40 = vmul.f32 %v2336_v0, %v824_v3  ;;  %vm829_vm3 = vmor %vm827_vm9, %vm828_vm14 }
 0x13f   : > { %v860_v8 = vmul.f32 %v859_v47, %v2785_v15  ;;  %v898_v43 = vmul.f32 %v897_v14, %v2825_v54  ;;  %v2340_v45 = vpop.eup %2339  ;;  %v790_v12 = vsel %vm789_vm0, %v2334_v7, %v786_v60  ;;  %v544_v22 = vsub.f32 1.0, %v543_v57 }
 0x140   : > { %vm587_vm1 = vweird.f32 %v3123_v25  ;;  %v593_v58 = vand.u32 2147483648, %v3123_v25  ;;  %v1080_v28 = vadd.f32 1.0, %v2144_v36  ;;  %v795_v42 = vsel %vm3119_vm8, %v794_v16, %v790_v12 }
 0x141   : > { %v826_v21 = vadd.f32 %v2336_v0, %v825_v40  ;;  %v583_v10 = vmul.f32 %v2340_v45, %v3123_v25  ;;  %vm3158_vm2 = vcmp.eq.f32.partialorder %v591_v61, 8.507059e+37  ;;  %v796_v15 = vmul.f32 %v795_v42, %v2922_v38 }
 0x142   : > { %v545_v60 = vmul.f32 %v2338_v51, %v544_v22  ;;  %vm548_vm4 = vweird.f32 %v2338_v51  ;;  %v3166_v7 = vadd.f32 1.0, %v860_v8  ;;  %v1096_v27 = vmul.f32 %v1080_v28, %v2814_v48 }
 0x143   : > { %v830_v16 = vsel %vm829_vm3, %v2336_v0, %v826_v21  ;;  %v584_v47 = vsub.f32 1.0, %v583_v10  ;;  %v899_v3 = vadd.f32 0.4994258, %v898_v43  ;;  %v2151_v14 = vclamps-f32 %v796_v15, 1.0  ;;  %vm549_vm5 = vmor %vm547_vm13, %vm548_vm4 }
 0x144   : > { %v835_v61 = vsel %vm3135_vm11, %v834_v2, %v830_v16  ;;  %v546_v57 = vadd.f32 %v2338_v51, %v545_v60  ;;  %2341 = vrcp.f32 %v3166_v7  ;;  %v1111_v38 = vpack.c.bf16 %v1096_v27, %v3090_v30 }
 0x145   : > { %v836_v17 = vmul.f32 %v835_v61, %v2978_v59  ;;  %v585_v36 = vmul.f32 %v2340_v45, %v584_v47  ;;  %vm588_vm6 = vweird.f32 %v2340_v45  ;;  %v1087_v48 = vadd.f32 1.0, %v2151_v14 }
 0x146   : > { %v550_v0 = vsel %vm549_vm5, %v2338_v51, %v546_v57  ;;  %v614_v40 = vmul.f32 %v613_v24, %v2839_v5  ;;  %v653_v8 = vadd.f32 0.001143296, %v3113_v29  ;;  %1197 = vmatmul.bf16.vlgmr.msra.gmra.mxu1 %v1111_v38  ;;  %v900_v30 = vmul.f32 %v899_v3, %v2825_v54  ;;  %vm589_vm7 = vmor %vm587_vm1, %vm588_vm6 }
 0x147   : > { %v2152_v52 = vclamps-f32 %v836_v17, 1.0  ;;  %v555_v2 = vsel %vm3145_vm15, %v554_v39, %v550_v0  ;;  %v586_v43 = vadd.f32 %v2340_v45, %v585_v36  ;;  %v594_v49 = vor.u32 1.1754944e-38, %v593_v58 }
 0x148   : > { %v556_v59 = vmul.f32 %v555_v2, %v2981_v63  ;;  %v871_v51 = vand.u32 2147483647, %v3166_v7  ;;  %v873_v24 = vand.u32 2147483648, %v3166_v7  ;;  %v1103_v29 = vmul.f32 %v1087_v48, %v2804_v37 }
 0x149   : > { %v1088_v12 = vadd.f32 1.0, %v2152_v52  ;;  %v590_v22 = vsel %vm589_vm7, %v2340_v45, %v586_v43  ;;  %v3187_v28 = vadd.f32 1.0, %v900_v30  ;;  %v615_v63 = vadd.f32 0.014752088, %v614_v40 }
 0x14a   : > { %v2342_v1 = vpop.eup %2341  ;;  %v2145_v39 = vclamps-f32 %v556_v59, 1.0  ;;  %v595_v54 = vsel %vm3158_vm2, %v594_v49, %v590_v22  ;;  %v654_v25 = vmul.f32 %v653_v8, %v2876_v4  ;;  %v932_v10 = vmul.f32 3.8918573e-05, %v2856_v33 }
 0x14b   : > { %v1104_v58 = vmul.f32 %v1088_v12, %v2821_v50  ;;  %v596_v42 = vmul.f32 %v595_v54, %v3042_v23  ;;  %v863_v21 = vmul.f32 %v2342_v1, %v3166_v7  ;;  %vm867_vm8 = vweird.f32 %v3166_v7 }
 0x14c   : > { %vm3197_vm9 = vcmp.eq.f32.partialorder %v871_v51, 8.507059e+37  ;;  %v874_v45 = vor.u32 1.1754944e-38, %v873_v24  ;;  %2343 = vrcp.f32 %v3187_v28  ;;  %v1081_v60 = vadd.f32 1.0, %v2145_v39 }
 0x14d   : > { %v1115_v32 = vpack.c.bf16 %v1104_v58, %v1103_v29  ;;  %v2146_v15 = vclamps-f32 %v596_v42, 1.0  ;;  %v864_v27 = vsub.f32 1.0, %v863_v21  ;;  %vm868_vm10 = vweird.f32 %v2342_v1 }
 0x14e   : > { %v911_v50 = vand.u32 2147483647, %v3187_v28  ;;  %v616_v23 = vmul.f32 %v615_v63, %v2839_v5  ;;  %v655_v16 = vadd.f32 0.014752088, %v654_v25  ;;  %v913_v14 = vand.u32 2147483648, %v3187_v28  ;;  %vm869_vm11 = vmor %vm867_vm8, %vm868_vm10 }
 0x14f   : > { %1217 = vmatmul.bf16.vlgmr.msra.gmra.mxu3 %v1115_v32  ;;  %v1082_v47 = vadd.f32 1.0, %v2146_v15  ;;  %v865_v3 = vmul.f32 %v2342_v1, %v864_v27  ;;  %v933_v61 = vadd.f32 0.001143296, %v932_v10  ;;  %v972_v17 = vmul.f32 3.8918573e-05, %v2903_v53 }
 0x150   : > { %v617_v57 = vadd.f32 0.112945676, %v616_v23  ;;  %v656_v38 = vmul.f32 %v655_v16, %v2876_v4  ;;  %v692_v36 = vmul.f32 3.8918573e-05, %v2916_v13  ;;  %v1097_v48 = vmul.f32 %v1081_v60, %v2828_v56 }
 0x151   : > { %v1098_v0 = vmul.f32 %v1082_v47, %v2871_v55  ;;  %v866_v40 = vadd.f32 %v2342_v1, %v865_v3  ;;  %v934_v8 = vmul.f32 %v933_v61, %v2856_v33  ;;  %v973_v30 = vadd.f32 0.001143296, %v972_v17 }
 0x152   : > { %v2344_v52 = vpop.eup %2343  ;;  %v618_v2 = vmul.f32 %v617_v57, %v2839_v5  ;;  %v657_v43 = vadd.f32 0.112945676, %v656_v38  ;;  %v693_v59 = vadd.f32 0.001143296, %v692_v36  ;;  %v732_v56 = vmul.f32 3.8918573e-05, %v2960_v18 }
 0x153   : > { %v1112_v49 = vpack.c.bf16 %v1098_v0, %v1097_v48  ;;  %v870_v51 = vsel %vm869_vm11, %v2342_v1, %v866_v40  ;;  %v903_v24 = vmul.f32 %v2344_v52, %v3187_v28  ;;  %v935_v22 = vadd.f32 0.014752088, %v934_v8 }
 0x154   : > { %v875_v55 = vsel %vm3197_vm9, %v874_v45, %v870_v51  ;;  %v619_v12 = vadd.f32 0.4994258, %v618_v2  ;;  %v658_v29 = vmul.f32 %v657_v43, %v2876_v4  ;;  %vm908_vm12 = vweird.f32 %v2344_v52 }
 0x155   : > { %v904_v7 = vsub.f32 1.0, %v903_v24  ;;  %v974_v39 = vmul.f32 %v973_v30, %v2903_v53  ;;  %v694_v54 = vmul.f32 %v693_v59, %v2916_v13  ;;  %v876_v63 = vmul.f32 %v875_v55, %v3029_v62  ;;  %v3982_v24 = vld [vmem:[#allocation12_spill] sm:$0xff] }
 0x156   : > { %v620_v1 = vmul.f32 %v619_v12, %v2839_v5  ;;  %v659_v25 = vadd.f32 0.4994258, %v658_v29  ;;  %v936_v58 = vmul.f32 %v935_v22, %v2856_v33  ;;  %1202 = vmatmul.bf16.gmra.mxu1 %v1112_v49  ;;  %v733_v37 = vadd.f32 0.001143296, %v732_v56 }
 0x157   : > { %v905_v42 = vmul.f32 %v2344_v52, %v904_v7  ;;  %v975_v21 = vadd.f32 0.014752088, %v974_v39  ;;  %v695_v10 = vadd.f32 0.014752088, %v694_v54  ;;  %v728_v45 = vadd.f32 0.18741608, %v3087_v26 }
 0x158   : > { %v3226_v32 = vadd.f32 1.0, %v620_v1  ;;  %v660_v15 = vmul.f32 %v659_v25, %v2876_v4  ;;  %v937_v60 = vadd.f32 0.112945676, %v936_v58  ;;  %vm907_vm13 = vweird.f32 %v3187_v28  ;;  %v3983_v7 = vld [vmem:[#allocation14_spill] sm:$0xff] }
 0x159   : > { %v906_v27 = vadd.f32 %v2344_v52, %v905_v42  ;;  %vm912_vm14 = vcmp.eq.f32.partialorder %v911_v50, 8.507059e+37  ;;  %v976_v5 = vmul.f32 %v975_v21, %v2903_v53  ;;  %v2153_v62 = vclamps-f32 %v876_v63, 1.0  ;;  %vm909_vm15 = vmor %vm907_vm13, %vm908_vm12  ;;  %v3981_v50 = vld [vmem:[#allocation15_spill] sm:$0xff] }
 0x15a   : > { %v914_v23 = vor.u32 1.1754944e-38, %v913_v14  ;;  %2345 = vrcp.f32 %v3226_v32  ;;  %v696_v16 = vmul.f32 %v695_v10, %v2916_v13  ;;  %v3234_v47 = vadd.f32 1.0, %v660_v15 }
 0x15b   : > { %v910_v26 = vsel %vm909_vm15, %v2344_v52, %v906_v27  ;;  %v938_v4 = vmul.f32 %v937_v60, %v2856_v33  ;;  %v734_v3 = vmul.f32 %v733_v37, %v2960_v18  ;;  %v3240_v28 = vmul.f32 %v3031_v41, %v2886_v11 }
 0x15c   : > { %v3244_v61 = vmul.f32 %v3082_v19, %v3981_v50  ;;  %v915_v14 = vsel %vm912_vm14, %v914_v23, %v910_v26  ;;  %v977_v57 = vadd.f32 0.112945676, %v976_v5  ;;  %v3247_v38 = vmul.f32 %v728_v45, %v2960_v18 }
 0x15d   : > { %v3251_v17 = vmul.f32 %v3084_v9, %v3003_v44  ;;  %v916_v36 = vmul.f32 %v915_v14, %v3045_v46  ;;  %2347 = vrcp.f32 %v3234_v47  ;;  %v1089_v48 = vadd.f32 1.0, %v2153_v62 }
 0x15e   : > { %v939_v11 = vadd.f32 0.4994258, %v938_v4  ;;  %v978_v41 = vmul.f32 %v977_v57, %v2903_v53  ;;  %v697_v0 = vadd.f32 0.112945676, %v696_v16  ;;  %vm627_vm0 = vweird.f32 %v3226_v32 }
 0x15f   : > { %v2154_v19 = vclamps-f32 %v916_v36, 1.0  ;;  %v735_v40 = vadd.f32 0.014752088, %v734_v3  ;;  %v1012_v8 = vmul.f32 3.8918573e-05, %v2941_v6  ;;  %v633_v49 = vand.u32 2147483648, %v3226_v32 }
 0x160   : > { %v2346_v52 = vpop.eup %2345  ;;  %v631_v2 = vand.u32 2147483647, %v3226_v32  ;;  %v940_v9 = vmul.f32 %v939_v11, %v2856_v33  ;;  %v979_v43 = vadd.f32 0.4994258, %v978_v41  ;;  %v698_v46 = vmul.f32 %v697_v0, %v2916_v13 }
 0x161   : > { %v1090_v30 = vadd.f32 1.0, %v2154_v19  ;;  %v623_v59 = vmul.f32 %v2346_v52, %v3226_v32  ;;  %v736_v51 = vmul.f32 %v735_v40, %v2960_v18  ;;  %v1105_v56 = vmul.f32 %v1089_v48, %v3982_v24 }
 0x162   : > { %v3265_v55 = vadd.f32 1.0, %v940_v9  ;;  %v980_v12 = vmul.f32 %v979_v43, %v2903_v53  ;;  %v699_v29 = vadd.f32 0.4994258, %v698_v46  ;;  %v1013_v63 = vadd.f32 0.001143296, %v1012_v8 }
 0x163   : > { %v2348_v22 = vpop.eup %2347  ;;  %v1106_v33 = vmul.f32 %v1090_v30, %v3983_v7  ;;  %v624_v39 = vsub.f32 1.0, %v623_v59  ;;  %v737_v54 = vadd.f32 0.112945676, %v736_v51  ;;  %vm3269_vm1 = vcmp.eq.f32.partialorder %v631_v2, 8.507059e+37 }
 0x164   : > { %v663_v25 = vmul.f32 %v2348_v22, %v3234_v47  ;;  %v671_v58 = vand.u32 2147483647, %v3234_v47  ;;  %2349 = vrcp.f32 %v3265_v55  ;;  %vm628_vm2 = vweird.f32 %v2346_v52 }
 0x165   : > { %v1116_v42 = vpack.c.bf16 %v1106_v33, %v1105_v56  ;;  %v625_v21 = vmul.f32 %v2346_v52, %v624_v39  ;;  %v673_v53 = vand.u32 2147483648, %v3234_v47  ;;  %v3277_v37 = vadd.f32 1.0, %v980_v12  ;;  %vm629_vm4 = vmor %vm627_vm0, %vm628_vm2 }
 0x166   : > { %v664_v10 = vsub.f32 1.0, %v663_v25  ;;  %v700_v45 = vmul.f32 %v699_v29, %v2916_v13  ;;  %v738_v15 = vmul.f32 %v737_v54, %v2960_v18  ;;  %v634_v27 = vor.u32 1.1754944e-38, %v633_v49 }
 0x167   : > { %1222 = vmatmul.bf16.gmra.mxu3 %v1116_v42  ;;  %v626_v60 = vadd.f32 %v2346_v52, %v625_v21  ;;  %vm667_vm3 = vweird.f32 %v3234_v47  ;;  %v1014_v5 = vmul.f32 %v1013_v63, %v2941_v6  ;;  %vm668_vm5 = vweird.f32 %v2348_v22 }
 0x168   : > { %v665_v62 = vmul.f32 %v2348_v22, %v664_v10  ;;  %v951_v23 = vand.u32 2147483647, %v3265_v55  ;;  %2351 = vrcp.f32 %v3277_v37  ;;  %vm3287_vm6 = vcmp.eq.f32.partialorder %v671_v58, 8.507059e+37  ;;  %vm669_vm7 = vmor %vm667_vm3, %vm668_vm5  ;;  %v3992_v58 = vld [vmem:[#allocation23_spill] sm:$0xff] }
 0x169   : > { %v630_v16 = vsel %vm629_vm4, %v2346_v52, %v626_v60  ;;  %v674_v26 = vor.u32 1.1754944e-38, %v673_v53  ;;  %v3291_v4 = vadd.f32 1.0, %v700_v45  ;;  %v739_v14 = vadd.f32 0.4994258, %v738_v15 }
 0x16a   : > { %v2350_v3 = vpop.eup %2349  ;;  %v635_v50 = vsel %vm3269_vm1, %v634_v27, %v630_v16  ;;  %v666_v32 = vadd.f32 %v2348_v22, %v665_v62  ;;  %v1015_v57 = vadd.f32 0.014752088, %v1014_v5  ;;  %v953_v11 = vand.u32 2147483648, %v3265_v55 }
 0x16b   : > { %v636_v36 = vmul.f32 %v635_v50, %v3056_v35  ;;  %v943_v48 = vmul.f32 %v2350_v3, %v3265_v55  ;;  %v1052_v41 = vmul.f32 3.8918573e-05, %v3003_v44  ;;  %vm947_vm8 = vweird.f32 %v3265_v55 }
 0x16c   : > { %v670_v0 = vsel %vm669_vm7, %v2348_v22, %v666_v32  ;;  %vm3302_vm9 = vcmp.eq.f32.partialorder %v951_v23, 8.507059e+37  ;;  %2353 = vrcp.f32 %v3291_v4  ;;  %v991_v8 = vand.u32 2147483647, %v3277_v37 }
 0x16d   : > { %v2147_v40 = vclamps-f32 %v636_v36, 1.0  ;;  %v675_v35 = vsel %vm3287_vm6, %v674_v26, %v670_v0  ;;  %v944_v47 = vsub.f32 1.0, %v943_v48  ;;  %v993_v9 = vand.u32 2147483648, %v3277_v37 }
 0x16e   : > { %v2352_v52 = vpop.eup %2351  ;;  %v676_v2 = vmul.f32 %v675_v35, %v3080_v34  ;;  %v740_v43 = vmul.f32 %v739_v14, %v2960_v18  ;;  %v1016_v46 = vmul.f32 %v1015_v57, %v2941_v6  ;;  %vm948_vm10 = vweird.f32 %v2350_v3 }
 0x16f   : > { %v945_v30 = vmul.f32 %v2350_v3, %v944_v47  ;;  %v954_v59 = vor.u32 1.1754944e-38, %v953_v11  ;;  %v983_v49 = vmul.f32 %v2352_v52, %v3277_v37  ;;  %v1083_v24 = vadd.f32 1.0, %v2147_v40  ;;  %vm949_vm13 = vmor %vm947_vm8, %vm948_vm10 }
 0x170   : > { %v2148_v51 = vclamps-f32 %v676_v2, 1.0  ;;  %vm987_vm11 = vweird.f32 %v3277_v37  ;;  %v3316_v56 = vadd.f32 1.0, %v740_v43  ;;  %vm3318_vm12 = vcmp.eq.f32.partialorder %v991_v8, 8.507059e+37 }
 0x171   : > { %v946_v12 = vadd.f32 %v2350_v3, %v945_v30  ;;  %v984_v29 = vsub.f32 1.0, %v983_v49  ;;  %v1017_v18 = vadd.f32 0.112945676, %v1016_v46  ;;  %v994_v33 = vor.u32 1.1754944e-38, %v993_v9  ;;  %v3994_v9 = vld [vmem:[#allocation21_spill] sm:$0xff]  ;;  %v3995_v46 = vld [vmem:[#allocation24_spill] sm:$0xff] }
 0x172   : > { %v2354_v22 = vpop.eup %2353  ;;  %v1084_v7 = vadd.f32 1.0, %v2148_v51  ;;  %2355 = vrcp.f32 %v3316_v56  ;;  %v1053_v39 = vadd.f32 0.001143296, %v1052_v41  ;;  %vm988_vm14 = vweird.f32 %v2352_v52  ;;  %v3996_v51 = vld [vmem:[#allocation19_spill] sm:$0xff] }
 0x173   : > { %v950_v54 = vsel %vm949_vm13, %v2350_v3, %v946_v12  ;;  %v985_v63 = vmul.f32 %v2352_v52, %v984_v29  ;;  %v703_v1 = vmul.f32 %v2354_v22, %v3291_v4  ;;  %v1099_v25 = vmul.f32 %v1083_v24, %v2963_v31  ;;  %vm989_vm15 = vmor %vm987_vm11, %vm988_vm14 }
 0x174   : > { %v1100_v42 = vmul.f32 %v1084_v7, %v3992_v58  ;;  %v955_v21 = vsel %vm3302_vm9, %v954_v59, %v950_v54  ;;  %v711_v53 = vand.u32 2147483647, %v3291_v4  ;;  %v1018_v15 = vmul.f32 %v1017_v18, %v2941_v6 }
 0x175   : > { %v956_v55 = vmul.f32 %v955_v21, %v3060_v20  ;;  %v986_v10 = vadd.f32 %v2352_v52, %v985_v63  ;;  %v704_v45 = vsub.f32 1.0, %v703_v1  ;;  %vm708_vm0 = vweird.f32 %v2354_v22 }
 0x176   : > { %v1113_v60 = vpack.c.bf16 %v1100_v42, %v1099_v25  ;;  %v713_v31 = vand.u32 2147483648, %v3291_v4  ;;  %v1054_v27 = vmul.f32 %v1053_v39, %v3003_v44  ;;  %v1019_v16 = vadd.f32 0.4994258, %v1018_v15  ;;  %v3997_v42 = vld [vmem:[#allocation13_spill] sm:$0xff] }
 0x177   : > { %v2155_v5 = vclamps-f32 %v956_v55, 1.0  ;;  %v990_v62 = vsel %vm989_vm15, %v2352_v52, %v986_v10  ;;  %v705_v23 = vmul.f32 %v2354_v22, %v704_v45  ;;  %v730_v20 = vadd.f32 1.1283791, %v3247_v38  ;;  %v3993_v52 = vld [vmem:[#allocation25_spill] sm:$0xff] }
 0x178   : > { %v2356_v13 = vpop.eup %2355  ;;  %1207 = vmatmul.bf16.gmra.mxu1 %v1113_v60  ;;  %v995_v26 = vsel %vm3318_vm12, %v994_v33, %v990_v62  ;;  %vm707_vm1 = vweird.f32 %v3291_v4  ;;  %v1055_v37 = vadd.f32 0.014752088, %v1054_v27  ;;  %vm712_vm2 = vcmp.eq.f32.partialorder %v711_v53, 8.507059e+37  ;;  %v3998_v53 = vld [vmem:[#allocation17_spill] sm:$0xff] }
 0x179   : > { %v996_v3 = vmul.f32 %v995_v26, %v3240_v28  ;;  %v706_v50 = vadd.f32 %v2354_v22, %v705_v23  ;;  %v743_v32 = vmul.f32 %v2356_v13, %v3316_v56  ;;  %vm709_vm3 = vmor %vm707_vm1, %vm708_vm0  ;;  %v714_v14 = vor.u32 1.1754944e-38, %v713_v31 }
 0x17a   : > { %v751_v57 = vand.u32 2147483647, %v3316_v56  ;;  %v1020_v38 = vmul.f32 %v1019_v16, %v2941_v6  ;;  %v1056_v36 = vmul.f32 %v1055_v37, %v3003_v44  ;;  %v1091_v11 = vadd.f32 1.0, %v2155_v5 }
 0x17b   : > { %v2156_v48 = vclamps-f32 %v996_v3, 1.0  ;;  %v710_v41 = vsel %vm709_vm3, %v2354_v22, %v706_v50  ;;  %v744_v4 = vsub.f32 1.0, %v743_v32  ;;  %v753_v28 = vand.u32 2147483648, %v3316_v56 }
 0x17c   : > { %v715_v0 = vsel %vm712_vm2, %v714_v14, %v710_v41  ;;  %v1021_v19 = vadd.f32 1.0, %v1020_v38  ;;  %v1057_v40 = vadd.f32 0.112945676, %v1056_v36  ;;  %vm748_vm4 = vweird.f32 %v2356_v13  ;;  %v3999_v14 = vld [vmem:[#allocation18_spill] sm:$0xff] }
 0x17d   : > { %v1092_v35 = vadd.f32 1.0, %v2156_v48  ;;  %v716_v47 = vmul.f32 %v715_v0, %v3244_v61  ;;  %v745_v8 = vmul.f32 %v2356_v13, %v744_v4  ;;  %v1007_v2 = vmul.f32 %v3993_v52, %v2941_v6 }
 0x17e   : > { %vm747_vm5 = vweird.f32 %v3316_v56  ;;  %2357 = vrcp.f32 %v1021_v19  ;;  %v1107_v43 = vmul.f32 %v1091_v11, %v3994_v9  ;;  %v1058_v49 = vmul.f32 %v1057_v40, %v3003_v44  ;;  %v4001_v9 = vld [vmem:[#allocation16_spill] sm:$0xff] }
 0x17f   : > { %v1108_v30 = vmul.f32 %v1092_v35, %v3995_v46  ;;  %v746_v59 = vadd.f32 %v2356_v13, %v745_v8  ;;  %v731_v24 = vmul.f32 %v730_v20, %v3996_v51  ;;  %v1046_v12 = vadd.f32 0.05243302, %v3251_v17  ;;  %vm749_vm6 = vmor %vm747_vm5, %vm748_vm4  ;;  %v4002_v46 = vld [vmem:[#allocation20_spill] sm:$0xff] }
 0x180   : > { %vm752_vm7 = vcmp.eq.f32.partialorder %v751_v57, 8.507059e+37  ;;  %v754_v61 = vor.u32 1.1754944e-38, %v753_v28  ;;  %v2149_v34 = vclamps-f32 %v716_v47, 1.0  ;;  %v1059_v22 = vadd.f32 0.4994258, %v1058_v49 }
 0x181   : > { %v1117_v29 = vpack.c.bf16 %v1108_v30, %v1107_v43  ;;  %v750_v18 = vsel %vm749_vm6, %v2356_v13, %v746_v59  ;;  %v1008_v54 = vadd.f32 0.18741608, %v1007_v2  ;;  %v1047_v63 = vmul.f32 %v1046_v12, %v3003_v44  ;;  %v3367_v12 = vld [vmem:[#allocation7 + $0x1] ss:$0 sm:$0xff] }
 0x182   : > { %v755_v56 = vsel %vm752_vm7, %v754_v61, %v750_v18  ;;  %v1060_v33 = vmul.f32 %v1059_v22, %v3003_v44  ;;  %v1085_v25 = vadd.f32 1.0, %v2149_v34  ;;  %v413_v21 = vmul.f32 0.5, %v3997_v42 }
 0x183   : > { %1227 = vmatmul.bf16.gmra.mxu3 %v1117_v29  ;;  %v756_v7 = vmul.f32 %v755_v56, %v731_v24  ;;  %v414_v55 = vmul.f32 0.5, %v3998_v53  ;;  %v1009_v15 = vmul.f32 %v1008_v54, %v2941_v6  ;;  %v1048_v60 = vadd.f32 0.18741608, %v1047_v63 }
 0x184   : > { %v2358_v39 = vpop.eup %2357  ;;  %v1061_v17 = vadd.f32 1.0, %v1060_v33  ;;  %v1033_v31 = vand.u32 2147483648, %v1021_v19  ;;  %v1101_v27 = vmul.f32 %v1085_v25, %v413_v21  ;;  %v1031_v23 = vand.u32 2147483647, %v1021_v19 }
 0x185   : > { %v2150_v1 = vclamps-f32 %v756_v7, 1.0  ;;  %v1023_v58 = vmul.f32 %v2358_v39, %v1021_v19  ;;  %vm1028_vm8 = vweird.f32 %v2358_v39  ;;  %vm1027_vm9 = vweird.f32 %v1021_v19 }
 0x186   : > { %2359 = vrcp.f32 %v1061_v17  ;;  %v1010_v20 = vadd.f32 1.1283791, %v1009_v15  ;;  %vm1029_vm10 = vmor %vm1027_vm9, %vm1028_vm8  ;;  %v1049_v37 = vmul.f32 %v1048_v60, %v3003_v44  ;;  %v1034_v50 = vor.u32 1.1754944e-38, %v1033_v31  ;;  %v4000_v44 = vld [vmem:[#allocation22_spill] sm:$0xff] }
 0x187   : > { %v1086_v10 = vadd.f32 1.0, %v2150_v1  ;;  %v1024_v45 = vsub.f32 1.0, %v1023_v58  ;;  %vm1032_vm11 = vcmp.eq.f32.partialorder %v1031_v23, 8.507059e+37  ;;  %v1073_v48 = vand.u32 2147483648, %v1061_v17 }
 0x188   : > { %v1011_v57 = vmul.f32 %v1010_v20, %v3999_v14  ;;  %v1050_v36 = vadd.f32 1.1283791, %v1049_v37  ;;  %v1071_v4 = vand.u32 2147483647, %v1061_v17  ;;  %vm1067_vm13 = vweird.f32 %v1061_v17 }
 0x189   : > { %v1102_v5 = vmul.f32 %v1086_v10, %v414_v55  ;;  %v1025_v62 = vmul.f32 %v2358_v39, %v1024_v45  ;;  %v1074_v28 = vor.u32 1.1754944e-38, %v1073_v48  ;;  %v421_v43 = vmul.f32 0.5, %v4001_v9 }
 0x18a   : > { %v1051_v19 = vmul.f32 %v1050_v36, %v4000_v44  ;;  %vm1072_vm15 = vcmp.eq.f32.partialorder %v1071_v4, 8.507059e+37  ;;  %v422_v30 = vmul.f32 0.5, %v4002_v46 }
 0x18b   : > { %v1114_v16 = vpack.c.bf16 %v1102_v5, %v1101_v27  ;;  %v1026_v13 = vadd.f32 %v2358_v39, %v1025_v62 }
 0x18c   : > { %v2360_v26 = vpop.eup %2359 }
 0x18d   : > { %1212 = vmatmul.bf16.gmra.mxu1 %v1114_v16  ;;  %v1030_v3 = vsel %vm1029_vm10, %v2358_v39, %v1026_v13  ;;  %v1063_v6 = vmul.f32 %v2360_v26, %v1061_v17  ;;  %vm1068_vm12 = vweird.f32 %v2360_v26 }
 0x18e   : > { %v1035_v32 = vsel %vm1032_vm11, %v1034_v50, %v1030_v3  ;;  %vm1069_vm14 = vmor %vm1067_vm13, %vm1068_vm12 }
 0x18f   : > { %v1064_v38 = vsub.f32 1.0, %v1063_v6  ;;  %v1036_v11 = vmul.f32 %v1035_v32, %v1011_v57 }
 0x191   : > { %v1065_v41 = vmul.f32 %v2360_v26, %v1064_v38  ;;  %v2157_v40 = vclamps-f32 %v1036_v11, 1.0 }
 0x193   : > { %v1066_v0 = vadd.f32 %v2360_v26, %v1065_v41  ;;  %v1093_v2 = vadd.f32 1.0, %v2157_v40 }
 0x195   : > { %v1070_v35 = vsel %vm1069_vm14, %v2360_v26, %v1066_v0  ;;  %v1109_v49 = vmul.f32 %v1093_v2, %v421_v43 }
 0x196   : > { %v1075_v47 = vsel %vm1072_vm15, %v1074_v28, %v1070_v35 }
 0x197   : > { %v1076_v8 = vmul.f32 %v1075_v47, %v1051_v19 }
 0x199   : > { %v2158_v52 = vclamps-f32 %v1076_v8, 1.0 }
 0x19b   : > { %v1094_v59 = vadd.f32 1.0, %v2158_v52 }
 0x19d   : > { %v1110_v51 = vmul.f32 %v1094_v59, %v422_v30 }
 0x19f   : > { %v1118_v24 = vpack.c.bf16 %v1110_v51, %v1109_v49 }
 0x1a1   : > { %1232 = vmatmul.bf16.gmra.mxu3 %v1118_v24 }
 0x1c3   : > { %v1198_v61 = vpop.f32.mrf.mxu1 }
 0x1c4   : > { %v3370_v29 = vadd.f32 %v3367_v12, %v1198_v61 }
 0x1c6   : > { %v3373_v34 = vmul.f32 0.70710677, %v3370_v29 }
 0x1c8   : > { %v1270_v18 = vmul.f32 %v3373_v34, %v3373_v34 }
 0x1ca   : > { %v1271_v22 = vmin.f32 %v1270_v18, 16.0 }
 0x1cb   : > { %v1200_v1 = vpop.f32.mrf.mxu1 }
 0x1cc   : > { %v1272_v56 = vmul.f32 2.1237322e-06, %v1271_v22  ;;  %v1283_v7 = vmul.f32 3.8918573e-05, %v1271_v22  ;;  %v3378_v17 = vadd.f32 %v3367_v12, %v1200_v1 }
 0x1ce   : > { %v1273_v33 = vadd.f32 0.00028619796, %v1272_v56  ;;  %v1284_v39 = vadd.f32 0.001143296, %v1283_v7  ;;  %v3381_v53 = vmul.f32 0.70710677, %v3378_v17 }
 0x1d0   : > { %v1274_v54 = vmul.f32 %v1273_v33, %v1271_v22  ;;  %v1285_v63 = vmul.f32 %v1284_v39, %v1271_v22  ;;  %v1310_v15 = vmul.f32 %v3381_v53, %v3381_v53 }
 0x1d2   : > { %v1275_v25 = vadd.f32 0.0036580483, %v1274_v54  ;;  %v1286_v58 = vadd.f32 0.014752088, %v1285_v63  ;;  %v1218_v55 = vpop.f32.mrf.mxu3  ;;  %v3388_v5 = vmin.f32 %v1310_v15, 16.0 }
 0x1d3   : > { %v3386_v60 = vadd.f32 %v3367_v12, %v1218_v55  ;;  %v1203_v23 = vpop.f32.mrf.mxu1 }
 0x1d4   : > { %v1276_v42 = vmul.f32 %v1275_v25, %v1271_v22  ;;  %v1287_v21 = vmul.f32 %v1286_v58, %v1271_v22  ;;  %v1312_v20 = vmul.f32 2.1237322e-06, %v3388_v5  ;;  %v3395_v26 = vadd.f32 %v3367_v12, %v1203_v23 }
 0x1d5   : > { %v3391_v62 = vmul.f32 0.70710677, %v3386_v60  ;;  %v1323_v37 = vmul.f32 3.8918573e-05, %v3388_v5 }
 0x1d6   : > { %v1277_v10 = vadd.f32 0.05243302, %v1276_v42  ;;  %v1288_v45 = vadd.f32 0.112945676, %v1287_v21  ;;  %v1313_v32 = vadd.f32 0.00028619796, %v1312_v20 }
 0x1d7   : > { %v1590_v3 = vmul.f32 %v3391_v62, %v3391_v62  ;;  %v1324_v14 = vadd.f32 0.001143296, %v1323_v37  ;;  %v3403_v38 = vmul.f32 0.70710677, %v3395_v26 }
 0x1d8   : > { %v1278_v31 = vmul.f32 %v1277_v10, %v1271_v22  ;;  %v1289_v27 = vmul.f32 %v1288_v45, %v1271_v22  ;;  %v1314_v11 = vmul.f32 %v1313_v32, %v3388_v5 }
 0x1d9   : > { %v3400_v57 = vmin.f32 %v1590_v3, 16.0  ;;  %v1325_v41 = vmul.f32 %v1324_v14, %v3388_v5  ;;  %v1350_v28 = vmul.f32 %v3403_v38, %v3403_v38 }
 0x1da   : > { %v1279_v16 = vadd.f32 0.18741608, %v1278_v31  ;;  %v1290_v13 = vadd.f32 0.4994258, %v1289_v27  ;;  %v1220_v36 = vpop.f32.mrf.mxu3  ;;  %v1315_v40 = vadd.f32 0.0036580483, %v1314_v11 }
 0x1db   : > { %v1592_v4 = vmul.f32 2.1237322e-06, %v3400_v57  ;;  %v1603_v0 = vmul.f32 3.8918573e-05, %v3400_v57  ;;  %v3415_v19 = vadd.f32 %v3367_v12, %v1220_v36  ;;  %v1326_v35 = vadd.f32 0.014752088, %v1325_v41 }
 0x1dc   : > { %v1280_v50 = vmul.f32 %v1279_v16, %v1271_v22  ;;  %v1291_v6 = vmul.f32 %v1290_v13, %v1271_v22  ;;  %v3417_v47 = vmin.f32 %v1350_v28, 16.0  ;;  %v1316_v43 = vmul.f32 %v1315_v40, %v3388_v5 }
 0x1dd   : > { %v1593_v52 = vadd.f32 0.00028619796, %v1592_v4  ;;  %v1604_v2 = vadd.f32 0.001143296, %v1603_v0  ;;  %v1327_v46 = vmul.f32 %v1326_v35, %v3388_v5  ;;  %v3428_v24 = vmul.f32 0.70710677, %v3415_v19 }
 0x1de   : > { %v3405_v48 = vadd.f32 1.0, %v1291_v6  ;;  %v1281_v44 = vadd.f32 1.1283791, %v1280_v50  ;;  %v1352_v30 = vmul.f32 2.1237322e-06, %v3417_v47 }
 0x1df   : > { %v1594_v59 = vmul.f32 %v1593_v52, %v3400_v57  ;;  %v1605_v49 = vmul.f32 %v1604_v2, %v3400_v57  ;;  %v1363_v51 = vmul.f32 3.8918573e-05, %v3417_v47  ;;  %v1317_v61 = vadd.f32 0.05243302, %v1316_v43 }
 0x1e0   : > { %2361 = vrcp.f32 %v3405_v48  ;;  %v1302_v8 = vand.u32 2147483647, %v3405_v48  ;;  %v1304_v9 = vand.u32 2147483648, %v3405_v48  ;;  %v1328_v18 = vadd.f32 0.112945676, %v1327_v46 }
 0x1e1   : > { %v1353_v22 = vadd.f32 0.00028619796, %v1352_v30  ;;  %v1595_v7 = vadd.f32 0.0036580483, %v1594_v59  ;;  %v1606_v33 = vadd.f32 0.014752088, %v1605_v49  ;;  %v1630_v54 = vmul.f32 %v3428_v24, %v3428_v24  ;;  %v1205_v49 = vpop.f32.mrf.mxu1 }
 0x1e2   : > { %v1364_v39 = vadd.f32 0.001143296, %v1363_v51  ;;  %v1305_v1 = vor.u32 1.1754944e-38, %v1304_v9  ;;  %v1318_v25 = vmul.f32 %v1317_v61, %v3388_v5  ;;  %v1329_v58 = vmul.f32 %v1328_v18, %v3388_v5 }
 0x1e3   : > { %v1596_v42 = vmul.f32 %v1595_v7, %v3400_v57  ;;  %v1607_v21 = vmul.f32 %v1606_v33, %v3400_v57  ;;  %v1354_v55 = vmul.f32 %v1353_v22, %v3417_v47  ;;  %v3439_v27 = vmin.f32 %v1630_v54, 16.0 }
 0x1e4   : > { %v1365_v10 = vmul.f32 %v1364_v39, %v3417_v47  ;;  %v1319_v15 = vadd.f32 0.18741608, %v1318_v25  ;;  %v1330_v31 = vadd.f32 0.4994258, %v1329_v58  ;;  %vm1298_vm0 = vweird.f32 %v3405_v48 }
 0x1e5   : > { %v1597_v23 = vadd.f32 0.05243302, %v1596_v42  ;;  %v1608_v16 = vadd.f32 0.112945676, %v1607_v21  ;;  %v1355_v13 = vadd.f32 0.0036580483, %v1354_v55 }
 0x1e6   : > { %v2362_v56 = vpop.eup %2361  ;;  %v1331_v37 = vmul.f32 %v1330_v31, %v3388_v5  ;;  %v1366_v3 = vadd.f32 0.014752088, %v1365_v10  ;;  %v1320_v50 = vmul.f32 %v1319_v15, %v3388_v5  ;;  %v1632_v4 = vmul.f32 2.1237322e-06, %v3439_v27 }
 0x1e7   : > { %v1294_v63 = vmul.f32 %v2362_v56, %v3405_v48  ;;  %vm1299_vm1 = vweird.f32 %v2362_v56  ;;  %v1598_v6 = vmul.f32 %v1597_v23, %v3400_v57  ;;  %v1609_v32 = vmul.f32 %v1608_v16, %v3400_v57 }
 0x1e8   : > { %v1356_v14 = vmul.f32 %v1355_v13, %v3417_v47  ;;  %v3447_v11 = vadd.f32 1.0, %v1331_v37  ;;  %v1367_v41 = vmul.f32 %v1366_v3, %v3417_v47  ;;  %vm1300_vm2 = vmor %vm1298_vm0, %vm1299_vm1  ;;  %v1282_v5 = vmul.f32 %v1281_v44, %v3373_v34 }
 0x1e9   : > { %v1295_v45 = vsub.f32 1.0, %v1294_v63  ;;  %v1599_v0 = vadd.f32 0.18741608, %v1598_v6  ;;  %v1610_v28 = vadd.f32 0.4994258, %v1609_v32  ;;  %vm1303_vm3 = vcmp.eq.f32.partialorder %v1302_v8, 8.507059e+37 }
 0x1ea   : > { %v1357_v40 = vadd.f32 0.05243302, %v1356_v14  ;;  %2363 = vrcp.f32 %v3447_v11  ;;  %v1238_v52 = vmul.f32 0.5, %v3370_v29  ;;  %v3457_v9 = vmul.f32 0.5, %v3378_v17  ;;  %v1223_v51 = vpop.f32.mrf.mxu3 }
 0x1eb   : > { %v1296_v20 = vmul.f32 %v2362_v56, %v1295_v45  ;;  %v1321_v43 = vadd.f32 1.1283791, %v1320_v50  ;;  %v1611_v48 = vmul.f32 %v1610_v28, %v3400_v57  ;;  %v1368_v59 = vadd.f32 0.112945676, %v1367_v41 }
 0x1ec   : > { %v1358_v30 = vmul.f32 %v1357_v40, %v3417_v47  ;;  %v1342_v34 = vand.u32 2147483647, %v3447_v11  ;;  %v3463_v44 = vmul.f32 0.5, %v3386_v60  ;;  %v1600_v8 = vmul.f32 %v1599_v0, %v3400_v57 }
 0x1ed   : > { %v1297_v36 = vadd.f32 %v2362_v56, %v1296_v20  ;;  %v1633_v29 = vadd.f32 0.00028619796, %v1632_v4  ;;  %v3467_v61 = vadd.f32 1.0, %v1611_v48  ;;  %v1369_v22 = vmul.f32 %v1368_v59, %v3417_v47 }
 0x1ee   : > { %v1359_v18 = vadd.f32 0.18741608, %v1358_v30  ;;  %v1643_v33 = vmul.f32 3.8918573e-05, %v3439_v27  ;;  %v3474_v60 = vadd.f32 %v3367_v12, %v1205_v49  ;;  %v1322_v54 = vmul.f32 %v1321_v43, %v3381_v53 }
 0x1ef   : > { %v1301_v35 = vsel %vm1300_vm2, %v2362_v56, %v1297_v36  ;;  %v1344_v56 = vand.u32 2147483648, %v3447_v11  ;;  %v1634_v7 = vmul.f32 %v1633_v29, %v3439_v27  ;;  %2365 = vrcp.f32 %v3467_v61 }
 0x1f0   : > { %v1306_v2 = vsel %vm1303_vm3, %v1305_v1, %v1301_v35  ;;  %v2364_v39 = vpop.eup %2363  ;;  %v3479_v63 = vadd.f32 %v3367_v12, %v1223_v51  ;;  %vm1338_vm4 = vweird.f32 %v3447_v11  ;;  %vm3483_vm5 = vcmp.eq.f32.partialorder %v1342_v34, 8.507059e+37 }
 0x1f1   : > { %v1307_v46 = vmul.f32 %v1306_v2, %v1282_v5  ;;  %v1334_v1 = vmul.f32 %v2364_v39, %v3447_v11  ;;  %v1360_v58 = vmul.f32 %v1359_v18, %v3417_v47  ;;  %v1601_v21 = vadd.f32 1.1283791, %v1600_v8 }
 0x1f2   : > { %v1370_v55 = vadd.f32 0.4994258, %v1369_v22  ;;  %v1635_v10 = vadd.f32 0.0036580483, %v1634_v7  ;;  %v1345_v45 = vor.u32 1.1754944e-38, %v1344_v56  ;;  %v1624_v23 = vand.u32 2147483648, %v3467_v61 }
 0x1f3   : > { %v2191_v17 = vclamps-f32 %v1307_v46, 1.0  ;;  %v1335_v53 = vsub.f32 1.0, %v1334_v1  ;;  %v1622_v15 = vand.u32 2147483647, %v3467_v61  ;;  %v1644_v31 = vadd.f32 0.001143296, %v1643_v33 }
 0x1f4   : > { %v1371_v16 = vmul.f32 %v1370_v55, %v3417_v47  ;;  %v1636_v13 = vmul.f32 %v1635_v10, %v3439_v27  ;;  %v3496_v20 = vmul.f32 0.70710677, %v3474_v60  ;;  %vm1339_vm6 = vweird.f32 %v2364_v39 }
 0x1f5   : > { %v1910_v57 = vadd.f32 1.0, %v2191_v17  ;;  %v1336_v37 = vmul.f32 %v2364_v39, %v1335_v53  ;;  %v1361_v3 = vadd.f32 1.1283791, %v1360_v58  ;;  %v1645_v50 = vmul.f32 %v1644_v31, %v3439_v27  ;;  %v2366_v6 = vpop.eup %2365  ;;  %v1208_v28 = vpop.f32.mrf.mxu1  ;;  %vm1340_vm9 = vmor %vm1338_vm4, %vm1339_vm6 }
 0x1f6   : > { %v1602_v32 = vmul.f32 %v1601_v21, %v3391_v62  ;;  %vm1618_vm7 = vweird.f32 %v3467_v61  ;;  %v3501_v14 = vadd.f32 1.0, %v1371_v16  ;;  %v1390_v47 = vmul.f32 %v3496_v20, %v3496_v20 }
 0x1f7   : > { %v1926_v42 = vmul.f32 %v1910_v57, %v1238_v52  ;;  %v1337_v36 = vadd.f32 %v2364_v39, %v1336_v37  ;;  %v1614_v41 = vmul.f32 %v2366_v6, %v3467_v61  ;;  %vm3506_vm8 = vcmp.eq.f32.partialorder %v1622_v15, 8.507059e+37 }
 0x1f8   : > { %v1646_v0 = vadd.f32 0.014752088, %v1645_v50  ;;  %v1625_v62 = vor.u32 1.1754944e-38, %v1624_v23  ;;  %2367 = vrcp.f32 %v3501_v14  ;;  %v1637_v40 = vadd.f32 0.05243302, %v1636_v13 }
 0x1f9   : > { %1942 = vst [vmem:[%s3489_s23] sm:$0xff] %v1926_v42  ;;  %v3514_v5 = vmul.f32 0.70710677, %v3479_v63  ;;  %v1341_v35 = vsel %vm1340_vm9, %v2364_v39, %v1337_v36  ;;  %v1615_v52 = vsub.f32 1.0, %v1614_v41  ;;  %v3517_v2 = vmul.f32 %v1361_v3, %v3403_v38 }
 0x1fa   : > { %v1647_v43 = vmul.f32 %v1646_v0, %v3439_v27  ;;  %v1346_v46 = vsel %vm3483_vm5, %v1345_v45, %v1341_v35  ;;  %vm1619_vm10 = vweird.f32 %v2366_v6  ;;  %v3522_v11 = vmin.f32 %v1390_v47, 16.0 }
 0x1fb   : > { %v3525_v48 = vadd.f32 %v3367_v12, %v1208_v28  ;;  %v1347_v30 = vmul.f32 %v1346_v46, %v1322_v54  ;;  %v1616_v59 = vmul.f32 %v2366_v6, %v1615_v52  ;;  %v1382_v49 = vand.u32 2147483647, %v3501_v14  ;;  %vm1620_vm12 = vmor %vm1618_vm7, %vm1619_vm10 }
 0x1fc   : > { %v1648_v34 = vadd.f32 0.112945676, %v1647_v43  ;;  %v1638_v8 = vmul.f32 %v1637_v40, %v3439_v27  ;;  %v1392_v38 = vmul.f32 2.1237322e-06, %v3522_v11  ;;  %v1403_v29 = vmul.f32 3.8918573e-05, %v3522_v11 }
 0x1fd   : > { %v1670_v51 = vmul.f32 %v3514_v5, %v3514_v5  ;;  %v2192_v17 = vclamps-f32 %v1347_v30, 1.0  ;;  %v1617_v18 = vadd.f32 %v2366_v6, %v1616_v59  ;;  %vm1378_vm11 = vweird.f32 %v3501_v14 }
 0x1fe   : > { %v1649_v22 = vmul.f32 %v1648_v34, %v3439_v27  ;;  %v2368_v56 = vpop.eup %2367  ;;  %v1384_v7 = vand.u32 2147483648, %v3501_v14  ;;  %v1393_v33 = vadd.f32 0.00028619796, %v1392_v38  ;;  %v1404_v39 = vadd.f32 0.001143296, %v1403_v29 }
 0x1ff   : > { %v3539_v57 = vmin.f32 %v1670_v51, 16.0  ;;  %v1911_v54 = vadd.f32 1.0, %v2192_v17  ;;  %v1621_v1 = vsel %vm1620_vm12, %v2366_v6, %v1617_v18  ;;  %v1374_v25 = vmul.f32 %v2368_v56, %v3501_v14  ;;  %v1225_v6 = vpop.f32.mrf.mxu3 }
 0x200   : > { %vm3542_vm13 = vcmp.eq.f32.partialorder %v1382_v49, 8.507059e+37  ;;  %v1626_v42 = vsel %vm3506_vm8, %v1625_v62, %v1621_v1  ;;  %v1639_v61 = vadd.f32 0.18741608, %v1638_v8  ;;  %v1650_v21 = vadd.f32 0.4994258, %v1649_v22 }
 0x201   : > { %v1394_v55 = vmul.f32 %v1393_v33, %v3522_v11  ;;  %v1927_v10 = vmul.f32 %v1911_v54, %v3457_v9  ;;  %v1627_v53 = vmul.f32 %v1626_v42, %v1602_v32  ;;  %v1375_v45 = vsub.f32 1.0, %v1374_v25 }
 0x202   : > { %v1405_v15 = vmul.f32 %v1404_v39, %v3522_v11  ;;  %vm1379_vm14 = vweird.f32 %v2368_v56  ;;  %v1651_v31 = vmul.f32 %v1650_v21, %v3439_v27  ;;  %v1672_v16 = vmul.f32 2.1237322e-06, %v3539_v57 }
 0x203   : > { %v1395_v23 = vadd.f32 0.0036580483, %v1394_v55  ;;  %1943 = vst [vmem:[%s3489_s23 + $0x8] sm:$0xff] %v1927_v10  ;;  %v2199_v13 = vclamps-f32 %v1627_v53, 1.0  ;;  %v1376_v37 = vmul.f32 %v2368_v56, %v1375_v45  ;;  %v1683_v50 = vmul.f32 3.8918573e-05, %v3539_v57  ;;  %vm1380_vm15 = vmor %vm1378_vm11, %vm1379_vm14 }
 0x204   : > { %v1406_v3 = vadd.f32 0.014752088, %v1405_v15  ;;  %v1385_v47 = vor.u32 1.1754944e-38, %v1384_v7  ;;  %v3555_v36 = vadd.f32 1.0, %v1651_v31  ;;  %v1673_v32 = vadd.f32 0.00028619796, %v1672_v16 }
 0x205   : > { %v1396_v9 = vmul.f32 %v1395_v23, %v3522_v11  ;;  %v1918_v41 = vadd.f32 1.0, %v2199_v13  ;;  %v1377_v4 = vadd.f32 %v2368_v56, %v1376_v37  ;;  %v1684_v28 = vadd.f32 0.001143296, %v1683_v50 }
 0x206   : > { %v1407_v0 = vmul.f32 %v1406_v3, %v3522_v11  ;;  %v1640_v62 = vmul.f32 %v1639_v61, %v3439_v27  ;;  %2369 = vrcp.f32 %v3555_v36  ;;  %v3565_v40 = vmul.f32 0.70710677, %v3525_v48 }
 0x207   : > { %v3568_v35 = vadd.f32 %v3367_v12, %v1225_v6  ;;  %v1934_v52 = vmul.f32 %v1918_v41, %v3463_v44  ;;  %v1381_v43 = vsel %vm1380_vm15, %v2368_v56, %v1377_v4  ;;  %v1397_v46 = vadd.f32 0.05243302, %v1396_v9 }
 0x208   : > { %v1408_v30 = vadd.f32 0.112945676, %v1407_v0  ;;  %v1240_v59 = vmul.f32 0.5, %v3395_v26  ;;  %v1386_v14 = vsel %vm3542_vm13, %v1385_v47, %v1381_v43  ;;  %v1674_v27 = vmul.f32 %v1673_v32, %v3539_v57 }
 0x209   : > { %1950 = vst [vmem:[%s3489_s23 + $0x40] sm:$0xff] %v1934_v52  ;;  %v1387_v49 = vmul.f32 %v1386_v14, %v3517_v2  ;;  %v1398_v34 = vmul.f32 %v1397_v46, %v3522_v11  ;;  %v1685_v38 = vmul.f32 %v1684_v28, %v3539_v57  ;;  %v1641_v44 = vadd.f32 1.1283791, %v1640_v62 }
 0x20a   : > { %v1409_v8 = vmul.f32 %v1408_v30, %v3522_v11  ;;  %v1675_v29 = vadd.f32 0.0036580483, %v1674_v27  ;;  %v1430_v51 = vmul.f32 %v3565_v40, %v3565_v40  ;;  %v3583_v26 = vmul.f32 0.70710677, %v3568_v35 }
 0x20b   : > { %v2193_v17 = vclamps-f32 %v1387_v49, 1.0  ;;  %v3586_v18 = vmul.f32 0.5, %v3415_v19  ;;  %v1662_v2 = vand.u32 2147483647, %v3555_v36  ;;  %v1399_v7 = vadd.f32 0.18741608, %v1398_v34 }
 0x20c   : > { %v1410_v22 = vadd.f32 0.4994258, %v1409_v8  ;;  %v2370_v56 = vpop.eup %2369  ;;  %v1676_v33 = vmul.f32 %v1675_v29, %v3539_v57  ;;  %v1686_v39 = vadd.f32 0.014752088, %v1685_v38  ;;  %v3590_v54 = vmin.f32 %v1430_v51, 16.0 }
 0x20d   : > { %v1912_v1 = vadd.f32 1.0, %v2193_v17  ;;  %v1654_v25 = vmul.f32 %v2370_v56, %v3555_v36  ;;  %v1664_v58 = vand.u32 2147483648, %v3555_v36  ;;  %v1710_v19 = vmul.f32 %v3583_v26, %v3583_v26 }
 0x20e   : > { %v1411_v42 = vmul.f32 %v1410_v22, %v3522_v11  ;;  %v1677_v61 = vadd.f32 0.05243302, %v1676_v33  ;;  %v1687_v21 = vmul.f32 %v1686_v39, %v3539_v57  ;;  %v1432_v55 = vmul.f32 2.1237322e-06, %v3590_v54 }
 0x20f   : > { %v1928_v10 = vmul.f32 %v1912_v1, %v1240_v59  ;;  %v1655_v53 = vsub.f32 1.0, %v1654_v25  ;;  %vm1659_vm0 = vweird.f32 %v2370_v56  ;;  %v1443_v45 = vmul.f32 3.8918573e-05, %v3590_v54 }
 0x210   : > { %v1400_v15 = vmul.f32 %v1399_v7, %v3522_v11  ;;  %v3601_v31 = vadd.f32 1.0, %v1411_v42  ;;  %v1688_v23 = vadd.f32 0.112945676, %v1687_v21  ;;  %v1433_v16 = vadd.f32 0.00028619796, %v1432_v55 }
 0x211   : > { %1944 = vst [vmem:[%s3489_s23 + $0x10] sm:$0xff] %v1928_v10  ;;  %v1656_v13 = vmul.f32 %v2370_v56, %v1655_v53  ;;  %v1678_v37 = vmul.f32 %v1677_v61, %v3539_v57  ;;  %v1444_v3 = vadd.f32 0.001143296, %v1443_v45  ;;  %v3605_v50 = vmin.f32 %v1710_v19, 16.0 }
 0x212   : > { %v1642_v6 = vmul.f32 %v1641_v44, %v3428_v24  ;;  %vm1658_vm1 = vweird.f32 %v3555_v36  ;;  %v3610_v47 = vmul.f32 0.5, %v3474_v60  ;;  %2371 = vrcp.f32 %v3601_v31  ;;  %v1210_v36 = vpop.f32.mrf.mxu1 }
 0x213   : > { %v1657_v11 = vadd.f32 %v2370_v56, %v1656_v13  ;;  %vm1663_vm2 = vcmp.eq.f32.partialorder %v1662_v2, 8.507059e+37  ;;  %v1689_v9 = vmul.f32 %v1688_v23, %v3539_v57  ;;  %v1434_v32 = vmul.f32 %v1433_v16, %v3590_v54  ;;  %vm1660_vm3 = vmor %vm1658_vm1, %vm1659_vm0 }
 0x214   : > { %v1665_v41 = vor.u32 1.1754944e-38, %v1664_v58  ;;  %v1401_v4 = vadd.f32 1.1283791, %v1400_v15  ;;  %v1445_v0 = vmul.f32 %v1444_v3, %v3590_v54  ;;  %v1712_v24 = vmul.f32 2.1237322e-06, %v3605_v50 }
 0x215   : > { %v1661_v28 = vsel %vm1660_vm3, %v2370_v56, %v1657_v11  ;;  %v1679_v60 = vadd.f32 0.18741608, %v1678_v37  ;;  %v1690_v62 = vadd.f32 0.4994258, %v1689_v9  ;;  %v1435_v52 = vadd.f32 0.0036580483, %v1434_v32 }
 0x216   : > { %v1666_v43 = vsel %vm1663_vm2, %v1665_v41, %v1661_v28  ;;  %v1446_v46 = vadd.f32 0.014752088, %v1445_v0  ;;  %v1713_v30 = vadd.f32 0.00028619796, %v1712_v24  ;;  %v1723_v59 = vmul.f32 3.8918573e-05, %v3605_v50 }
 0x217   : > { %v1667_v14 = vmul.f32 %v1666_v43, %v1642_v6  ;;  %v1691_v27 = vmul.f32 %v1690_v62, %v3539_v57  ;;  %v1436_v49 = vmul.f32 %v1435_v52, %v3590_v54  ;;  %v3622_v34 = vadd.f32 %v3367_v12, %v1210_v36 }
 0x218   : > { %v2372_v8 = vpop.eup %2371  ;;  %v1402_v38 = vmul.f32 %v1401_v4, %v3496_v20  ;;  %v1447_v44 = vmul.f32 %v1446_v46, %v3590_v54  ;;  %v1714_v29 = vmul.f32 %v1713_v30, %v3605_v50  ;;  %v1724_v51 = vadd.f32 0.001143296, %v1723_v59  ;;  %v1228_v46 = vpop.f32.mrf.mxu3 }
 0x219   : > { %v2200_v17 = vclamps-f32 %v1667_v14, 1.0  ;;  %v1414_v2 = vmul.f32 %v2372_v8, %v3601_v31  ;;  %v1422_v22 = vand.u32 2147483647, %v3601_v31  ;;  %v1680_v56 = vmul.f32 %v1679_v60, %v3539_v57 }
 0x21a   : > { %v3630_v7 = vadd.f32 1.0, %v1691_v27  ;;  %v1437_v33 = vadd.f32 0.05243302, %v1436_v49  ;;  %v1448_v39 = vadd.f32 0.112945676, %v1447_v44  ;;  %v1725_v1 = vmul.f32 %v1724_v51, %v3605_v50  ;;  %v1213_v30 = vpop.f32.mrf.mxu1 }
 0x21b   : > { %v1919_v25 = vadd.f32 1.0, %v2200_v17  ;;  %v1415_v20 = vsub.f32 1.0, %v1414_v2  ;;  %v1715_v58 = vadd.f32 0.0036580483, %v1714_v29  ;;  %v3634_v19 = vmul.f32 0.70710677, %v3622_v34 }
 0x21c   : > { %vm1418_vm4 = vweird.f32 %v3601_v31  ;;  %vm1419_vm5 = vweird.f32 %v2372_v8  ;;  %v1424_v42 = vand.u32 2147483648, %v3601_v31  ;;  %2373 = vrcp.f32 %v3630_v7 }
 0x21d   : > { %v1935_v57 = vmul.f32 %v1919_v25, %v3586_v18  ;;  %v1416_v61 = vmul.f32 %v2372_v8, %v1415_v20  ;;  %v1438_v21 = vmul.f32 %v1437_v33, %v3590_v54  ;;  %v1449_v55 = vmul.f32 %v1448_v39, %v3590_v54  ;;  %vm1420_vm7 = vmor %vm1418_vm4, %vm1419_vm5 }
 0x21e   : > { %vm3642_vm6 = vcmp.eq.f32.partialorder %v1422_v22, 8.507059e+37  ;;  %v1681_v53 = vadd.f32 1.1283791, %v1680_v56  ;;  %v1716_v45 = vmul.f32 %v1715_v58, %v3605_v50  ;;  %v1726_v15 = vadd.f32 0.014752088, %v1725_v1 }
 0x21f   : > { %1951 = vst [vmem:[%s3489_s23 + $0x48] sm:$0xff] %v1935_v57  ;;  %v1417_v23 = vadd.f32 %v2372_v8, %v1416_v61  ;;  %v1702_v16 = vand.u32 2147483647, %v3630_v7  ;;  %v1450_v13 = vadd.f32 0.4994258, %v1449_v55  ;;  %v1470_v18 = vmul.f32 %v3634_v19, %v3634_v19 }
 0x220   : > { %v1425_v37 = vor.u32 1.1754944e-38, %v1424_v42  ;;  %v1439_v3 = vadd.f32 0.18741608, %v1438_v21  ;;  %v1717_v6 = vadd.f32 0.05243302, %v1716_v45  ;;  %v1727_v11 = vmul.f32 %v1726_v15, %v3605_v50 }
 0x221   : > { %v1421_v9 = vsel %vm1420_vm7, %v2372_v8, %v1417_v23  ;;  %v1704_v32 = vand.u32 2147483648, %v3630_v7  ;;  %v1451_v41 = vmul.f32 %v1450_v13, %v3590_v54  ;;  %v3657_v4 = vmin.f32 %v1470_v18, 16.0 }
 0x222   : > { %v2374_v0 = vpop.eup %2373  ;;  %v1426_v24 = vsel %vm3642_vm6, %v1425_v37, %v1421_v9  ;;  %v3662_v36 = vmul.f32 0.5, %v3479_v63  ;;  %v1718_v31 = vmul.f32 %v1717_v6, %v3605_v50  ;;  %v1728_v28 = vadd.f32 0.112945676, %v1727_v11 }
 0x223   : > { %v1427_v60 = vmul.f32 %v1426_v24, %v1402_v38  ;;  %v1682_v62 = vmul.f32 %v1681_v53, %v3514_v5  ;;  %v1694_v52 = vmul.f32 %v2374_v0, %v3630_v7  ;;  %vm3667_vm8 = vcmp.eq.f32.partialorder %v1702_v16, 8.507059e+37 }
 0x224   : > { %v1440_v59 = vmul.f32 %v1439_v3, %v3590_v54  ;;  %v3672_v14 = vadd.f32 1.0, %v1451_v41  ;;  %v1729_v63 = vmul.f32 %v1728_v28, %v3605_v50  ;;  %v1472_v27 = vmul.f32 2.1237322e-06, %v3657_v4 }
 0x225   : > { %v2194_v49 = vclamps-f32 %v1427_v60, 1.0  ;;  %v1695_v8 = vsub.f32 1.0, %v1694_v52  ;;  %v1705_v38 = vor.u32 1.1754944e-38, %v1704_v32  ;;  %v1483_v5 = vmul.f32 3.8918573e-05, %v3657_v4 }
 0x226   : > { %2375 = vrcp.f32 %v3672_v14  ;;  %v1719_v44 = vadd.f32 0.18741608, %v1718_v31  ;;  %v3679_v29 = vadd.f32 %v3367_v12, %v1228_v46  ;;  %v3682_v51 = vadd.f32 %v3367_v12, %v1213_v30 }
 0x227   : > { %v1913_v54 = vadd.f32 1.0, %v2194_v49  ;;  %v1696_v17 = vmul.f32 %v2374_v0, %v1695_v8  ;;  %vm1699_vm9 = vweird.f32 %v2374_v0  ;;  %v1730_v2 = vadd.f32 0.4994258, %v1729_v63 }
 0x228   : > { %vm1698_vm10 = vweird.f32 %v3630_v7  ;;  %v1441_v22 = vadd.f32 1.1283791, %v1440_v59  ;;  %v1473_v56 = vadd.f32 0.00028619796, %v1472_v27  ;;  %v1484_v33 = vadd.f32 0.001143296, %v1483_v5 }
 0x229   : > { %v1929_v39 = vmul.f32 %v1913_v54, %v3610_v47  ;;  %v1697_v1 = vadd.f32 %v2374_v0, %v1696_v17  ;;  %v1462_v25 = vand.u32 2147483647, %v3672_v14  ;;  %v1731_v20 = vmul.f32 %v1730_v2, %v3605_v50  ;;  %vm1700_vm11 = vmor %vm1698_vm10, %vm1699_vm9 }
 0x22a   : > { %v1720_v58 = vmul.f32 %v1719_v44, %v3605_v50  ;;  %v1474_v42 = vmul.f32 %v1473_v56, %v3657_v4  ;;  %v1485_v57 = vmul.f32 %v1484_v33, %v3657_v4  ;;  %v3692_v61 = vmul.f32 0.70710677, %v3679_v29 }
 0x22b   : > { %1945 = vst [vmem:[%s3489_s23 + $0x18] sm:$0xff] %v1929_v39  ;;  %v1701_v7 = vsel %vm1700_vm11, %v2374_v0, %v1697_v1  ;;  %v1464_v21 = vand.u32 2147483648, %v3672_v14  ;;  %v3696_v47 = vadd.f32 1.0, %v1731_v20  ;;  %v3699_v55 = vmul.f32 0.70710677, %v3682_v51 }
 0x22c   : > { %v2376_v10 = vpop.eup %2375  ;;  %v1706_v50 = vsel %vm3667_vm8, %v1705_v38, %v1701_v7  ;;  %v1475_v53 = vadd.f32 0.0036580483, %v1474_v42  ;;  %v1486_v45 = vadd.f32 0.014752088, %v1485_v57  ;;  %v1750_v15 = vmul.f32 %v3692_v61, %v3692_v61  ;;  %v1230_v42 = vpop.f32.mrf.mxu3 }
 0x22d   : > { %v1707_v23 = vmul.f32 %v1706_v50, %v1682_v62  ;;  %v3706_v16 = vmul.f32 0.5, %v3525_v48  ;;  %v1454_v13 = vmul.f32 %v2376_v10, %v3672_v14  ;;  %2377 = vrcp.f32 %v3696_v47 }
 0x22e   : > { %v1442_v18 = vmul.f32 %v1441_v22, %v3565_v40  ;;  %vm1458_vm12 = vweird.f32 %v3672_v14  ;;  %v1721_v37 = vadd.f32 1.1283791, %v1720_v58  ;;  %v1476_v3 = vmul.f32 %v1475_v53, %v3657_v4 }
 0x22f   : > { %v2201_v6 = vclamps-f32 %v1707_v23, 1.0  ;;  %v1455_v11 = vsub.f32 1.0, %v1454_v13  ;;  %v1487_v9 = vmul.f32 %v1486_v45, %v3657_v4  ;;  %v3714_v32 = vmin.f32 %v1750_v15, 16.0 }
 0x230   : > { %vm1459_vm13 = vweird.f32 %v2376_v10  ;;  %vm3716_vm14 = vcmp.eq.f32.partialorder %v1462_v25, 8.507059e+37  ;;  %v1465_v41 = vor.u32 1.1754944e-38, %v1464_v21  ;;  %v1510_v40 = vmul.f32 %v3699_v55, %v3699_v55 }
 0x231   : > { %v1920_v0 = vadd.f32 1.0, %v2201_v6  ;;  %v1456_v24 = vmul.f32 %v2376_v10, %v1455_v11  ;;  %v1488_v31 = vadd.f32 0.112945676, %v1487_v9  ;;  %v1752_v28 = vmul.f32 2.1237322e-06, %v3714_v32  ;;  %vm1460_vm15 = vmor %vm1458_vm12, %vm1459_vm13 }
 0x232   : > { %v1722_v60 = vmul.f32 %v1721_v37, %v3583_v26  ;;  %v1477_v62 = vadd.f32 0.05243302, %v1476_v3  ;;  %v1763_v52 = vmul.f32 3.8918573e-05, %v3714_v32  ;;  %v3725_v43 = vmin.f32 %v1510_v40, 16.0 }
 0x233   : > { %v2378_v46 = vpop.eup %2377  ;;  %v1936_v30 = vmul.f32 %v1920_v0, %v3662_v36  ;;  %v1457_v59 = vadd.f32 %v2376_v10, %v1456_v24  ;;  %v1489_v63 = vmul.f32 %v1488_v31, %v3657_v4  ;;  %v1753_v27 = vadd.f32 0.00028619796, %v1752_v28 }
 0x234   : > { %v1734_v49 = vmul.f32 %v2378_v46, %v3696_v47  ;;  %v1742_v26 = vand.u32 2147483647, %v3696_v47  ;;  %v1744_v8 = vand.u32 2147483648, %v3696_v47  ;;  %v1764_v38 = vadd.f32 0.001143296, %v1763_v52 }
 0x235   : > { %1952 = vst [vmem:[%s3489_s23 + $0x50] sm:$0xff] %v1936_v30  ;;  %v1461_v5 = vsel %vm1460_vm15, %v2376_v10, %v1457_v59  ;;  %v1490_v44 = vadd.f32 0.4994258, %v1489_v63  ;;  %v1754_v36 = vmul.f32 %v1753_v27, %v3714_v32  ;;  %v1512_v54 = vmul.f32 2.1237322e-06, %v3725_v43  ;;  %v1215_v27 = vpop.f32.mrf.mxu1 }
 0x236   : > { %v1466_v17 = vsel %vm3716_vm14, %v1465_v41, %v1461_v5  ;;  %v1735_v2 = vsub.f32 1.0, %v1734_v49  ;;  %v1478_v14 = vmul.f32 %v1477_v62, %v3657_v4  ;;  %v1765_v22 = vmul.f32 %v1764_v38, %v3714_v32 }
 0x237   : > { %v1467_v56 = vmul.f32 %v1466_v17, %v1442_v18  ;;  %vm1739_vm0 = vweird.f32 %v2378_v46  ;;  %v1491_v33 = vmul.f32 %v1490_v44, %v3657_v4  ;;  %v1513_v39 = vadd.f32 0.00028619796, %v1512_v54 }
 0x238   : > { %v1736_v1 = vmul.f32 %v2378_v46, %v1735_v2  ;;  %v1755_v25 = vadd.f32 0.0036580483, %v1754_v36  ;;  %v1766_v20 = vadd.f32 0.014752088, %v1765_v22  ;;  %v1523_v58 = vmul.f32 3.8918573e-05, %v3725_v43  ;;  %v1233_v36 = vpop.f32.mrf.mxu3 }
 0x239   : > { %v2195_v57 = vclamps-f32 %v1467_v56, 1.0  ;;  %vm1738_vm1 = vweird.f32 %v3696_v47  ;;  %v3745_v7 = vadd.f32 1.0, %v1491_v33  ;;  %v1514_v21 = vmul.f32 %v1513_v39, %v3725_v43 }
 0x23a   : > { %v1737_v10 = vadd.f32 %v2378_v46, %v1736_v1  ;;  %v1745_v50 = vor.u32 1.1754944e-38, %v1744_v8  ;;  %v1479_v53 = vadd.f32 0.18741608, %v1478_v14  ;;  %v1767_v45 = vmul.f32 %v1766_v20, %v3714_v32  ;;  %vm1740_vm2 = vmor %vm1738_vm1, %vm1739_vm0  ;;  %v3789_v1 = vld [vmem:[#allocation7 + $0x1] ss:$0 sm:$0xff] }
 0x23b   : > { %v1914_v15 = vadd.f32 1.0, %v2195_v57  ;;  %2379 = vrcp.f32 %v3745_v7  ;;  %v1524_v23 = vadd.f32 0.001143296, %v1523_v58  ;;  %v3752_v13 = vadd.f32 %v3367_v12, %v1230_v42 }
 0x23c   : > { %v1741_v47 = vsel %vm1740_vm2, %v2378_v46, %v1737_v10  ;;  %vm1743_vm3 = vcmp.eq.f32.partialorder %v1742_v26, 8.507059e+37  ;;  %v1756_v18 = vmul.f32 %v1755_v25, %v3714_v32  ;;  %v1768_v37 = vadd.f32 0.112945676, %v1767_v45 }
 0x23d   : > { %v1930_v3 = vmul.f32 %v1914_v15, %v3706_v16  ;;  %v1746_v6 = vsel %vm1743_vm3, %v1745_v50, %v1741_v47  ;;  %v1515_v11 = vadd.f32 0.0036580483, %v1514_v21  ;;  %v1480_v48 = vmul.f32 %v1479_v53, %v3657_v4 }
 0x23e   : > { %v1747_v9 = vmul.f32 %v1746_v6, %v1722_v60  ;;  %v1769_v41 = vmul.f32 %v1768_v37, %v3714_v32  ;;  %v1525_v40 = vmul.f32 %v1524_v23, %v3725_v43  ;;  %v3761_v0 = vmul.f32 0.70710677, %v3752_v13 }
 0x23f   : > { %1946 = vst [vmem:[%s3489_s23 + $0x20] sm:$0xff] %v1930_v3  ;;  %v1757_v31 = vadd.f32 0.05243302, %v1756_v18  ;;  %v1249_v52 = vmul.f32 0.5, %v3568_v35  ;;  %v1516_v16 = vmul.f32 %v1515_v11, %v3725_v43  ;;  %v3768_v30 = vmul.f32 0.5, %v3622_v34 }
 0x240   : > { %v2202_v24 = vclamps-f32 %v1747_v9, 1.0  ;;  %v1770_v28 = vadd.f32 0.4994258, %v1769_v41  ;;  %v1526_v46 = vadd.f32 0.014752088, %v1525_v40  ;;  %v1790_v4 = vmul.f32 %v3761_v0, %v3761_v0 }
 0x241   : > { %v2380_v62 = vpop.eup %2379  ;;  %v1481_v59 = vadd.f32 1.1283791, %v1480_v48  ;;  %v1502_v49 = vand.u32 2147483647, %v3745_v7  ;;  %v1504_v44 = vand.u32 2147483648, %v3745_v7  ;;  %v1758_v34 = vmul.f32 %v1757_v31, %v3714_v32 }
 0x242   : > { %v1921_v60 = vadd.f32 1.0, %v2202_v24  ;;  %v1494_v63 = vmul.f32 %v2380_v62, %v3745_v7  ;;  %v1771_v26 = vmul.f32 %v1770_v28, %v3714_v32  ;;  %v1527_v35 = vmul.f32 %v1526_v46, %v3725_v43 }
 0x243   : > { %v3774_v8 = vmin.f32 %v1790_v4, 16.0  ;;  %v1517_v17 = vadd.f32 0.05243302, %v1516_v16  ;;  %v3781_v14 = vadd.f32 %v3367_v12, %v1215_v27  ;;  %vm1499_vm4 = vweird.f32 %v2380_v62 }
 0x244   : > { %v1937_v38 = vmul.f32 %v1921_v60, %v1249_v52  ;;  %v1495_v5 = vsub.f32 1.0, %v1494_v63  ;;  %v3778_v54 = vadd.f32 1.0, %v1771_v26  ;;  %v1528_v2 = vadd.f32 0.112945676, %v1527_v35 }
 0x245   : > { %v1792_v56 = vmul.f32 2.1237322e-06, %v3774_v8  ;;  %v1803_v33 = vmul.f32 3.8918573e-05, %v3774_v8  ;;  %v1482_v39 = vmul.f32 %v1481_v59, %v3634_v19  ;;  %vm1498_vm5 = vweird.f32 %v3745_v7 }
 0x246   : > { %1953 = vst [vmem:[%s3489_s23 + $0x58] sm:$0xff] %v1937_v38  ;;  %v1496_v22 = vmul.f32 %v2380_v62, %v1495_v5  ;;  %2381 = vrcp.f32 %v3778_v54  ;;  %v3792_v25 = vadd.f32 %v3789_v1, %v1233_v36  ;;  %v1759_v20 = vadd.f32 0.18741608, %v1758_v34  ;;  %vm1500_vm6 = vmor %vm1498_vm5, %vm1499_vm4 }
 0x247   : > { %v1529_v58 = vmul.f32 %v1528_v2, %v3725_v43  ;;  %v1793_v42 = vadd.f32 0.00028619796, %v1792_v56  ;;  %vm1503_vm7 = vcmp.eq.f32.partialorder %v1502_v49, 8.507059e+37  ;;  %v1505_v57 = vor.u32 1.1754944e-38, %v1504_v44 }
 0x248   : > { %v1497_v12 = vadd.f32 %v2380_v62, %v1496_v22  ;;  %v1804_v21 = vadd.f32 0.001143296, %v1803_v33  ;;  %v3796_v19 = vmul.f32 0.70710677, %v3781_v14  ;;  %v1518_v10 = vmul.f32 %v1517_v17, %v3725_v43 }
 0x249   : > { %v1530_v50 = vadd.f32 0.4994258, %v1529_v58  ;;  %v1794_v53 = vmul.f32 %v1793_v42, %v3774_v8  ;;  %v3804_v47 = vmul.f32 0.70710677, %v3792_v25  ;;  %v1760_v37 = vmul.f32 %v1759_v20, %v3714_v32 }
 0x24a   : > { %v1501_v7 = vsel %vm1500_vm6, %v2380_v62, %v1497_v12  ;;  %v1805_v15 = vmul.f32 %v1804_v21, %v3774_v8  ;;  %v1550_v23 = vmul.f32 %v3796_v19, %v3796_v19  ;;  %v3809_v9 = vmul.f32 0.5, %v3679_v29 }
 0x24b   : > { %v1506_v45 = vsel %vm1503_vm7, %v1505_v57, %v1501_v7  ;;  %v1531_v3 = vmul.f32 %v1530_v50, %v3725_v43  ;;  %v1795_v6 = vadd.f32 0.0036580483, %v1794_v53  ;;  %v1830_v40 = vmul.f32 %v3804_v47, %v3804_v47 }
 0x24c   : > { %v1507_v18 = vmul.f32 %v1506_v45, %v1482_v39  ;;  %v2382_v11 = vpop.eup %2381  ;;  %v1806_v48 = vadd.f32 0.014752088, %v1805_v15  ;;  %v3811_v41 = vmin.f32 %v1550_v23, 16.0  ;;  %v1519_v28 = vadd.f32 0.18741608, %v1518_v10 }
 0x24d   : > { %v1774_v31 = vmul.f32 %v2382_v11, %v3778_v54  ;;  %v3816_v62 = vadd.f32 1.0, %v1531_v3  ;;  %v1796_v32 = vmul.f32 %v1795_v6, %v3774_v8  ;;  %v1761_v4 = vadd.f32 1.1283791, %v1760_v37 }
 0x24e   : > { %v2196_v24 = vclamps-f32 %v1507_v18, 1.0  ;;  %v1807_v52 = vmul.f32 %v1806_v48, %v3774_v8  ;;  %v1552_v16 = vmul.f32 2.1237322e-06, %v3811_v41  ;;  %v1563_v29 = vmul.f32 3.8918573e-05, %v3811_v41  ;;  %v1235_v18 = vpop.f32.mrf.mxu3 }
 0x24f   : > { %v1775_v60 = vsub.f32 1.0, %v1774_v31  ;;  %2383 = vrcp.f32 %v3816_v62  ;;  %vm1779_vm8 = vweird.f32 %v2382_v11  ;;  %v1782_v59 = vand.u32 2147483647, %v3778_v54 }
 0x250   : > { %v1915_v46 = vadd.f32 1.0, %v2196_v24  ;;  %v1784_v63 = vand.u32 2147483648, %v3778_v54  ;;  %v3825_v27 = vmin.f32 %v1830_v40, 16.0  ;;  %v1808_v35 = vadd.f32 0.112945676, %v1807_v52 }
 0x251   : > { %v1776_v26 = vmul.f32 %v2382_v11, %v1775_v60  ;;  %v1553_v38 = vadd.f32 0.00028619796, %v1552_v16  ;;  %vm1778_vm9 = vweird.f32 %v3778_v54  ;;  %v1520_v5 = vmul.f32 %v1519_v28, %v3725_v43 }
 0x252   : > { %v1931_v49 = vmul.f32 %v1915_v46, %v3768_v30  ;;  %v1797_v44 = vadd.f32 0.05243302, %v1796_v32  ;;  %v1564_v34 = vadd.f32 0.001143296, %v1563_v29  ;;  %v1809_v17 = vmul.f32 %v1808_v35, %v3774_v8  ;;  %vm1780_vm10 = vmor %vm1778_vm9, %vm1779_vm8 }
 0x253   : > { %v1777_v36 = vadd.f32 %v2382_v11, %v1776_v26  ;;  %v1554_v2 = vmul.f32 %v1553_v38, %v3811_v41  ;;  %v1832_v22 = vmul.f32 2.1237322e-06, %v3825_v27  ;;  %v1762_v56 = vmul.f32 %v1761_v4, %v3692_v61 }
 0x254   : > { %1947 = vst [vmem:[%s3489_s23 + $0x28] sm:$0xff] %v1931_v49  ;;  %v1785_v30 = vor.u32 1.1754944e-38, %v1784_v63  ;;  %v1565_v33 = vmul.f32 %v1564_v34, %v3811_v41  ;;  %v1843_v54 = vmul.f32 3.8918573e-05, %v3825_v27  ;;  %vm1783_vm11 = vcmp.eq.f32.partialorder %v1782_v59, 8.507059e+37 }
 0x255   : > { %v2384_v43 = vpop.eup %2383  ;;  %v1781_v39 = vsel %vm1780_vm10, %v2382_v11, %v1777_v36  ;;  %v1810_v12 = vadd.f32 0.4994258, %v1809_v17  ;;  %v1833_v20 = vadd.f32 0.00028619796, %v1832_v22  ;;  %v1521_v42 = vadd.f32 1.1283791, %v1520_v5 }
 0x256   : > { %v1786_v58 = vsel %vm1783_vm11, %v1785_v30, %v1781_v39  ;;  %v1534_v57 = vmul.f32 %v2384_v43, %v3816_v62  ;;  %v1798_v21 = vmul.f32 %v1797_v44, %v3774_v8  ;;  %v1555_v10 = vadd.f32 0.0036580483, %v1554_v2 }
 0x257   : > { %v1787_v7 = vmul.f32 %v1786_v58, %v1762_v56  ;;  %v1811_v61 = vmul.f32 %v1810_v12, %v3774_v8  ;;  %v1566_v50 = vadd.f32 0.014752088, %v1565_v33  ;;  %v1542_v45 = vand.u32 2147483647, %v3816_v62 }
 0x258   : > { %v1535_v53 = vsub.f32 1.0, %v1534_v57  ;;  %v1834_v15 = vmul.f32 %v1833_v20, %v3825_v27  ;;  %v1844_v23 = vadd.f32 0.001143296, %v1843_v54  ;;  %v1544_v3 = vand.u32 2147483648, %v3816_v62 }
 0x259   : > { %v2203_v37 = vclamps-f32 %v1787_v7, 1.0  ;;  %v3844_v6 = vadd.f32 1.0, %v1811_v61  ;;  %v1567_v11 = vmul.f32 %v1566_v50, %v3811_v41  ;;  %vm1539_vm12 = vweird.f32 %v2384_v43 }
 0x25a   : > { %v1536_v48 = vmul.f32 %v2384_v43, %v1535_v53  ;;  %v1799_v40 = vadd.f32 0.18741608, %v1798_v21  ;;  %v1845_v24 = vmul.f32 %v1844_v23, %v3825_v27  ;;  %v1556_v28 = vmul.f32 %v1555_v10, %v3811_v41 }
 0x25b   : > { %v1922_v31 = vadd.f32 1.0, %v2203_v37  ;;  %2385 = vrcp.f32 %v3844_v6  ;;  %v3851_v32 = vadd.f32 %v3789_v1, %v1235_v18  ;;  %vm1538_vm13 = vweird.f32 %v3816_v62 }
 0x25c   : > { %v1537_v52 = vadd.f32 %v2384_v43, %v1536_v48  ;;  %v1568_v16 = vadd.f32 0.112945676, %v1567_v11  ;;  %v1835_v29 = vadd.f32 0.0036580483, %v1834_v15  ;;  %v1522_v4 = vmul.f32 %v1521_v42, %v3699_v55  ;;  %vm1540_vm14 = vmor %vm1538_vm13, %vm1539_vm12 }
 0x25d   : > { %v1938_v46 = vmul.f32 %v1922_v31, %v3809_v9  ;;  %v1545_v60 = vor.u32 1.1754944e-38, %v1544_v3  ;;  %v1846_v59 = vadd.f32 0.014752088, %v1845_v24  ;;  %vm1543_vm15 = vcmp.eq.f32.partialorder %v1542_v45, 8.507059e+37 }
 0x25e   : > { %v1541_v63 = vsel %vm1540_vm14, %v2384_v43, %v1537_v52  ;;  %v1800_v49 = vmul.f32 %v1799_v40, %v3774_v8  ;;  %v1569_v26 = vmul.f32 %v1568_v16, %v3811_v41  ;;  %v1557_v35 = vadd.f32 0.05243302, %v1556_v28 }
 0x25f   : > { %1954 = vst [vmem:[%s3489_s23 + $0x60] sm:$0xff] %v1938_v46  ;;  %v1546_v1 = vsel %vm1543_vm15, %v1545_v60, %v1541_v63  ;;  %v1847_v62 = vmul.f32 %v1846_v59, %v3825_v27  ;;  %v3861_v38 = vmul.f32 0.70710677, %v3851_v32  ;;  %v1836_v55 = vmul.f32 %v1835_v29, %v3825_v27 }
 0x260   : > { %v1547_v9 = vmul.f32 %v1546_v1, %v1522_v4  ;;  %v1570_v5 = vadd.f32 0.4994258, %v1569_v26  ;;  %v1244_v8 = vmul.f32 0.5, %v3682_v51  ;;  %v1801_v2 = vadd.f32 1.1283791, %v1800_v49 }
 0x261   : > { %v2386_v44 = vpop.eup %2385  ;;  %v1848_v34 = vadd.f32 0.112945676, %v1847_v62  ;;  %v1870_v36 = vmul.f32 %v3861_v38, %v3861_v38  ;;  %v1558_v56 = vmul.f32 %v1557_v35, %v3811_v41  ;;  %v1822_v12 = vand.u32 2147483647, %v3844_v6 }
 0x262   : > { %v2197_v17 = vclamps-f32 %v1547_v9, 1.0  ;;  %v1814_v22 = vmul.f32 %v2386_v44, %v3844_v6  ;;  %v1571_v30 = vmul.f32 %v1570_v5, %v3811_v41  ;;  %v1837_v20 = vadd.f32 0.05243302, %v1836_v55 }
 0x263   : > { %v1849_v33 = vmul.f32 %v1848_v34, %v3825_v27  ;;  %v3871_v54 = vmin.f32 %v1870_v36, 16.0  ;;  %v1824_v51 = vand.u32 2147483648, %v3844_v6  ;;  %vm1819_vm0 = vweird.f32 %v2386_v44 }
 0x264   : > { %v1916_v43 = vadd.f32 1.0, %v2197_v17  ;;  %v1815_v39 = vsub.f32 1.0, %v1814_v22  ;;  %v1572_v58 = vadd.f32 1.0, %v1571_v30  ;;  %vm1818_vm1 = vweird.f32 %v3844_v6 }
 0x265   : > { %v1850_v42 = vadd.f32 0.4994258, %v1849_v33  ;;  %v1872_v57 = vmul.f32 2.1237322e-06, %v3871_v54  ;;  %v1883_v61 = vmul.f32 3.8918573e-05, %v3871_v54  ;;  %v1838_v53 = vmul.f32 %v1837_v20, %v3825_v27  ;;  %vm1820_vm2 = vmor %vm1818_vm1, %vm1819_vm0 }
 0x266   : > { %v1932_v21 = vmul.f32 %v1916_v43, %v1244_v8  ;;  %v1816_v7 = vmul.f32 %v2386_v44, %v1815_v39  ;;  %v1559_v10 = vadd.f32 0.18741608, %v1558_v56  ;;  %2387 = vrcp.f32 %v1572_v58 }
 0x267   : > { %v1851_v45 = vmul.f32 %v1850_v42, %v3825_v27  ;;  %v1873_v15 = vadd.f32 0.00028619796, %v1872_v57  ;;  %v1802_v23 = vmul.f32 %v1801_v2, %v3761_v0  ;;  %v1825_v18 = vor.u32 1.1754944e-38, %v1824_v51 }
 0x268   : > { %1948 = vst [vmem:[%s3489_s23 + $0x30] sm:$0xff] %v1932_v21  ;;  %v1817_v50 = vadd.f32 %v2386_v44, %v1816_v7  ;;  %v1884_v37 = vadd.f32 0.001143296, %v1883_v61  ;;  %vm1823_vm3 = vcmp.eq.f32.partialorder %v1822_v12, 8.507059e+37  ;;  %v1560_v31 = vmul.f32 %v1559_v10, %v3811_v41 }
 0x269   : > { %v1852_v11 = vadd.f32 1.0, %v1851_v45  ;;  %v1874_v48 = vmul.f32 %v1873_v15, %v3871_v54  ;;  %v1839_v28 = vadd.f32 0.18741608, %v1838_v53  ;;  %v1251_v4 = vmul.f32 0.5, %v3752_v13 }
 0x26a   : > { %v1821_v3 = vsel %vm1820_vm2, %v2386_v44, %v1817_v50  ;;  %v1885_v40 = vmul.f32 %v1884_v37, %v3871_v54  ;;  %v1561_v63 = vadd.f32 1.1283791, %v1560_v31  ;;  %v1582_v1 = vand.u32 2147483647, %v1572_v58 }
 0x26b   : > { %v1826_v6 = vsel %vm1823_vm3, %v1825_v18, %v1821_v3  ;;  %2389 = vrcp.f32 %v1852_v11  ;;  %v1875_v46 = vadd.f32 0.0036580483, %v1874_v48  ;;  %v1840_v26 = vmul.f32 %v1839_v28, %v3825_v27 }
 0x26c   : > { %v1827_v24 = vmul.f32 %v1826_v6, %v1802_v23  ;;  %v2388_v52 = vpop.eup %2387  ;;  %v1886_v16 = vadd.f32 0.014752088, %v1885_v40  ;;  %v1584_v35 = vand.u32 2147483648, %v1572_v58  ;;  %v1562_v34 = vmul.f32 %v1561_v63, %v3796_v19 }
 0x26d   : > { %v1574_v0 = vmul.f32 %v2388_v52, %v1572_v58  ;;  %vm1579_vm4 = vweird.f32 %v2388_v52  ;;  %v1876_v55 = vmul.f32 %v1875_v46, %v3871_v54  ;;  %vm1578_vm5 = vweird.f32 %v1572_v58 }
 0x26e   : > { %v2204_v29 = vclamps-f32 %v1827_v24, 1.0  ;;  %v1887_v60 = vmul.f32 %v1886_v16, %v3871_v54  ;;  %v1841_v8 = vadd.f32 1.1283791, %v1840_v26  ;;  %vm1580_vm6 = vmor %vm1578_vm5, %vm1579_vm4  ;;  %vm1583_vm7 = vcmp.eq.f32.partialorder %v1582_v1, 8.507059e+37 }
 0x26f   : > { %v1575_v49 = vsub.f32 1.0, %v1574_v0  ;;  %v1585_v27 = vor.u32 1.1754944e-38, %v1584_v35  ;;  %v1862_v56 = vand.u32 2147483647, %v1852_v11  ;;  %v1864_v30 = vand.u32 2147483648, %v1852_v11 }
 0x270   : > { %v1923_v59 = vadd.f32 1.0, %v2204_v29  ;;  %v1888_v41 = vadd.f32 0.112945676, %v1887_v60  ;;  %v1877_v33 = vadd.f32 0.05243302, %v1876_v55  ;;  %vm1858_vm9 = vweird.f32 %v1852_v11 }
 0x271   : > { %v2390_v62 = vpop.eup %2389  ;;  %v1576_v5 = vmul.f32 %v2388_v52, %v1575_v49  ;;  %v1865_v42 = vor.u32 1.1754944e-38, %v1864_v30  ;;  %v1842_v21 = vmul.f32 %v1841_v8, %v3804_v47  ;;  %vm1863_vm11 = vcmp.eq.f32.partialorder %v1862_v56, 8.507059e+37 }
 0x272   : > { %v1939_v9 = vmul.f32 %v1923_v59, %v1251_v4  ;;  %v1854_v44 = vmul.f32 %v2390_v62, %v1852_v11  ;;  %v1889_v13 = vmul.f32 %v1888_v41, %v3871_v54  ;;  %vm1859_vm8 = vweird.f32 %v2390_v62 }
 0x273   : > { %v1577_v36 = vadd.f32 %v2388_v52, %v1576_v5  ;;  %vm1860_vm10 = vmor %vm1858_vm9, %vm1859_vm8  ;;  %v1878_v57 = vmul.f32 %v1877_v33, %v3871_v54  ;;  %v1245_v61 = vmul.f32 0.5, %v3781_v14  ;;  %v1252_v37 = vmul.f32 0.5, %v3792_v25 }
 0x274   : > { %1955 = vst [vmem:[%s3489_s23 + $0x68] sm:$0xff] %v1939_v9  ;;  %v1855_v17 = vsub.f32 1.0, %v1854_v44  ;;  %v1890_v2 = vadd.f32 0.4994258, %v1889_v13  ;;  %v1253_v46 = vmul.f32 0.5, %v3851_v32 }
 0x275   : > { %v1581_v22 = vsel %vm1580_vm6, %v2388_v52, %v1577_v36  ;;  %v1879_v15 = vadd.f32 0.18741608, %v1878_v57 }
 0x276   : > { %v1586_v43 = vsel %vm1583_vm7, %v1585_v27, %v1581_v22  ;;  %v1856_v39 = vmul.f32 %v2390_v62, %v1855_v17  ;;  %v1891_v12 = vmul.f32 %v1890_v2, %v3871_v54 }
 0x277   : > { %v1587_v20 = vmul.f32 %v1586_v43, %v1562_v34  ;;  %v1880_v47 = vmul.f32 %v1879_v15, %v3871_v54 }
 0x278   : > { %v1857_v51 = vadd.f32 %v2390_v62, %v1856_v39  ;;  %v1892_v19 = vadd.f32 1.0, %v1891_v12 }
 0x279   : > { %v2198_v58 = vclamps-f32 %v1587_v20, 1.0  ;;  %v1881_v14 = vadd.f32 1.1283791, %v1880_v47 }
 0x27a   : > { %v1861_v7 = vsel %vm1860_vm10, %v2390_v62, %v1857_v51  ;;  %2391 = vrcp.f32 %v1892_v19  ;;  %v1904_v40 = vand.u32 2147483648, %v1892_v19  ;;  %v1902_v31 = vand.u32 2147483647, %v1892_v19 }
 0x27b   : > { %v1917_v10 = vadd.f32 1.0, %v2198_v58  ;;  %v1866_v50 = vsel %vm1863_vm11, %v1865_v42, %v1861_v7  ;;  %vm1898_vm13 = vweird.f32 %v1892_v19  ;;  %v1882_v25 = vmul.f32 %v1881_v14, %v3861_v38 }
 0x27c   : > { %v1867_v53 = vmul.f32 %v1866_v50, %v1842_v21  ;;  %v1905_v52 = vor.u32 1.1754944e-38, %v1904_v40  ;;  %vm1903_vm15 = vcmp.eq.f32.partialorder %v1902_v31, 8.507059e+37 }
 0x27d   : > { %v1933_v45 = vmul.f32 %v1917_v10, %v1245_v61 }
 0x27e   : > { %v2205_v23 = vclamps-f32 %v1867_v53, 1.0 }
 0x27f   : > { %1949 = vst [vmem:[%s3489_s23 + $0x38] sm:$0xff] %v1933_v45 }
 0x280   : > { %v2392_v18 = vpop.eup %2391  ;;  %v1924_v3 = vadd.f32 1.0, %v2205_v23 }
 0x281   : > { %v1894_v11 = vmul.f32 %v2392_v18, %v1892_v19  ;;  %vm1899_vm12 = vweird.f32 %v2392_v18 }
 0x282   : > { %v1940_v48 = vmul.f32 %v1924_v3, %v1252_v37  ;;  %vm1900_vm14 = vmor %vm1898_vm13, %vm1899_vm12 }
 0x283   : > { %v1895_v6 = vsub.f32 1.0, %v1894_v11 }
 0x284   : > { %1956 = vst [vmem:[%s3489_s23 + $0x70] sm:$0xff] %v1940_v48 }
 0x285   : > { %v1896_v24 = vmul.f32 %v2392_v18, %v1895_v6 }
 0x287   : > { %v1897_v28 = vadd.f32 %v2392_v18, %v1896_v24 }
 0x289   : > { %v1901_v54 = vsel %vm1900_vm14, %v2392_v18, %v1897_v28 }
 0x28a   : > { %v1906_v16 = vsel %vm1903_vm15, %v1905_v52, %v1901_v54 }
 0x28b   : > { %v1907_v29 = vmul.f32 %v1906_v16, %v1882_v25 }
 0x28d   : > { %v2206_v0 = vclamps-f32 %v1907_v29, 1.0 }
 0x28f   : > { %v1925_v4 = vadd.f32 1.0, %v2206_v0 }
 0x291   : > { %v1941_v60 = vmul.f32 %v1925_v4, %v1253_v46 }
 0x293   : > { %1957 = vst [vmem:[%s3489_s23 + $0x78] sm:$0xff] %v1941_v60 }
 0x294   : > { %2511 = shalt.err (!%p2508_p10)
}
 0x295   : > { %s2562_s20 = smov 128   ;;  %s2563_s27 = smov 8  }
 0x296   : > { %2264 = dma.vmem_to_hbm [thread:$0]  (%p2655_p3), %s1972_s5, 2048, %s1974_s6, %s1959_s16, %s2562_s20, %s2562_s20, %s2563_s27  }
 0x297 PF: > { %p2286_p11 = scmp.ge.s32.totalorder %s2554_s15, 2  ;;  %s1988_s7 = sand.u32 1, %s2542_s12  }
 0x298   : > { %s1989_s18 = scalar_lea.sflag [#allocation4], %s1988_s7 }
 0x299   : > { %p2278_p12 = pnand %p2286_p11, %p2619_p6 }
 0x29b   : > { %p2279_p13 = pneg %p2278_p12 }
 0x29d   : > { %2537 = dma.done.wait (%p2279_p13), %s1989_s18, 2048  }
 0x29e   : > { %2539 = vsyncadd (%p2279_p13), %s1989_s18, 4294965248  ;;  %p17_p0 = scmp.ge.s32.totalorder %s2642_s8, 5   ;;  %s4015_s12 = smov %s2546_s13 }
 0x29f   : > { %s4016_s13 = smov %s2550_s14  ;;  %s4017_s14 = smov %s2651_s11 }
 0x2a0   : > { %s4018_s15 = smov %s2642_s8  ;;  %19 = sbr.rel (!%p17_p0) target bundleno = 6 (0x6), region = 87 }
 0x2a5   :  { %1995 = vsyncpa [#allocation3], 1 }
 0x2a6   :  { %1997 = vsyncpa [#allocation3 + $0x1], 1 }
 0x2a7   :  { %1998 = vsyncpa [#allocation6], 1 }
 0x2a8   :  { %1999 = vsyncpa [#allocation4], 1 }
 0x2a9   :  { %2001 = vsyncpa [#allocation4 + $0x1], 1 }

// kernel: tpu_custom_call.1
= control target key start
LH: loop header
LB: loop body
LE: loop exit
PB: predicated region body
PF: predicated region fallthrough
CT: control target
= control target key end

     0   :  { %8 = vsyncpa [#allocation3], 0  ;;  %s3936_s0 = inlined_call_operand.hbm [shape: bf16[384,128], index: 0, kind: input, shape index: {}]   ;;  %s3937_s1 = inlined_call_operand.hbm [shape: bf16[2,128,128], index: 1, kind: input, shape index: {}]   ;;  %s3938_s2 = inlined_call_operand.hbm [shape: f32[2,1,128], index: 2, kind: input, shape index: {}]   ;;  %s3939_s3 = inlined_call_operand.hbm [shape: f32[384,128], index: 3, kind: output, shape index: {}]  }
   0x1   :  { %10 = vsyncpa [#allocation3 + $0x1], 0 }
   0x2   :  { %11 = vsyncpa [#allocation6], 0 }
   0x3   :  { %12 = vsyncpa [#allocation4], 0 }
   0x4   :  { %14 = vsyncpa [#allocation4 + $0x1], 0  ;;  %s2584_s12 = smov 0   ;;  %s2586_s13 = smov 0  }
   0x5   :  { %s2588_s14 = smov 0   ;;  %s2590_s15 = smov 0  }
   0x6 LB: > { %s2605_s16 = sadd.s32 4294967295, %s2554_s15   ;;  %s2066_s17 = sadd.s32 4294967294, %s2554_s15   ;;  %s2554_s15 = sphi %s2590_s15, %s4018_s15   ;;  %s2550_s14 = sphi %s2588_s14, %s4017_s14   ;;  %s2546_s13 = sphi %s2586_s13, %s4016_s13   ;;  %s2542_s12 = sphi %s2584_s12, %s4015_s12  }
   0x7   : > { %p40_p0 = scmp.ne.s32.totalorder %s2546_s13, %s2542_s12  ;;  %p41_p1 = scmp.eq.s32.totalorder %s2605_s16, 0 }
   0x8   : > { %p106_p2 = scmp.eq.s32.totalorder %s2605_s16, 2  ;;  %p112_p3 = scmp.eq.s32.totalorder %s2066_s17, 2 }
   0x9   : > { %p2614_p4 = por %p41_p1, %p40_p0  ;;  %p2067_p5 = scmp.ge.s32.totalorder %s2554_s15, 1 }
   0xa   : > { %p2619_p6 = por %p112_p3, %p40_p0  ;;  %p119_p7 = scmp.lt.s32.totalorder %s2554_s15, 4 }
   0xb   : > { %s130_s22 = sshll.u32 %s3937_s1, 4  ;;  %s2556_s24 = smov [#allocation5]   ;;  %s131_s22 = int_to_ptr.hbm [resolvable:$true] %s130_s22 }
   0xc   : > { %p2627_p8 = pnand %p2067_p5, %p119_p7  ;;  %s132_s25 = sshll.u32 %s2556_s24, 4  ;;  %s133_s25 = int_to_ptr.vmem [resolvable:$true] %s132_s25 }
   0xd   : > { %s144_s28 = sshll.u32 %s3938_s2, 4  ;;  %s2557_s29 = smov 64   ;;  %s145_s28 = int_to_ptr.hbm [resolvable:$true] %s144_s28 }
   0xe   : > { %p2266_p9 = pneg %p2627_p8  ;;  %s2558_s30 = smov 4  }
   0xf   : > { %s2559_s4 = smov [#allocation7]   ;;  %s2560_s6 = smov 16  }
  0x10   : > { %p2267_p10 = pnand %p2266_p9, %p41_p1  ;;  %s146_s5 = sshll.u32 %s2559_s4, 4  ;;  %s147_s5 = int_to_ptr.vmem [resolvable:$true] %s146_s5 }
  0x11   : > { %s2561_s7 = smov 1   ;;  %s2642_s8 = sadd.s32 1, %s2554_s15  }
  0x12   : > { %2269 = dma.hbm_to_vmem [thread:$0]  (!%p2267_p10), %s131_s22, 2048, %s133_s25, [#allocation6], %s2557_s29, %s2557_s29, %s2558_s30  }
  0x13   : > { %2272 = dma.hbm_to_vmem [thread:$0]  (!%p2267_p10), %s145_s28, 32, %s147_s5, [#allocation6], %s2560_s6, %s2560_s6, %s2561_s7  }
  0x14   : > { %s24_s9 = ssub.s32 %s2554_s15, %s2642_s8  ;;  %s27_s10 = sadd.s32 1, %s2550_s14 }
  0x15   : > { %p25_p11 = scmp.eq.s32.totalorder %s24_s9, 0  ;;  %p34_p12 = scmp.ne.s32.totalorder %s2550_s14, %s2546_s13 }
  0x16   : > { %p35_p13 = scmp.eq.s32.totalorder %s2554_s15, 0  ;;  %p2283_p5 = scmp.lt.s32.totalorder %s2554_s15, 3 }
  0x17   : > { %s2651_s11 = scalar_select %p25_p11, %s2550_s14, %s27_s10  }
  0x18   : > { %p36_p0 = por %p35_p13, %p34_p12  ;;  %p2655_p3 = por %p106_p2, %p34_p12 }
  0x19   : > { %s160_s20 = sand.u32 1, %s2550_s14   ;;  %s2212_s22 = sshll.u32 %s2554_s15, 6 }
  0x1a   : > { %s2071_s21 = sshll.u32 %s160_s20, 6  ;;  %s169_s26 = scalar_lea.hbm %s3936_s0, %s2212_s22 }
  0x1b   : > { %s164_s27 = scalar_lea.vmem [#allocation2], %s2071_s21  ;;  %s170_s4 = sshll.u32 %s169_s26, 4  ;;  %s171_s4 = int_to_ptr.hbm [resolvable:$true] %s170_s4 }
  0x1c   : > { %s172_s28 = sshll.u32 %s164_s27, 4  ;;  %p2665_p7 = pnand %p2283_p5, %p36_p0  ;;  %s173_s28 = int_to_ptr.vmem [resolvable:$true] %s172_s28 }
  0x1d   : > { %s161_s6 = scalar_lea.sflag [#allocation3], %s160_s20  ;;  %s2454_s7 = sshra.s32 %s171_s4, 4  ;;  %s2455_s7 = int_to_ptr.hbm [resolvable:$true] %s2454_s7 }
  0x1e   : > { %s2456_s9 = scalar_lea.hbm %s2455_s7, 64  ;;  %p2458_p9 = pneg %p2665_p7 }
  0x1f   : > { %p2457_p2 = scmp.ne.s32.totalorder %s2455_s7, %s2456_s9  ;;  %s2461_s22 = scalar_lea.hbm %s3936_s0, 192 }
  0x20   : > { %p2462_p12 = scmp.lt.s32.totalorder %s2455_s7, %s3936_s0  ;;  %p2463_p13 = scmp.lt.s32.totalorder %s2461_s22, %s2456_s9 }
  0x21   : > { %p2459_p10 = pnand %p2458_p9, %p2457_p2 }
  0x22   : > { %p2464_p0 = por %p2463_p13, %p2462_p12 }
  0x23   : > { %p2460_p11 = pneg %p2459_p10 }
  0x25   : > { %p2465_p5 = pnand %p2464_p0, %p2460_p11 }
  0x27   : > { %2468 = shalt.err (!%p2465_p5)
}
  0x28   : > { %2276 = dma.hbm_to_vmem [thread:$0]  (!%p2665_p7), %s171_s4, 1024, %s173_s28, %s161_s6, %s2557_s29, %s2557_s29, %s2558_s30  }
  0x29   : > { %184 = sbr.rel (%p2627_p8) target bundleno = 663 (0x297), region = 32 }
  0x2e   : > { %s2685_s20 = sand.u32 1, %s2546_s13  }
  0x2f   : > { %s2075_s26 = sshll.u32 %s2685_s20, 6  ;;  %s187_s27 = scalar_lea.sflag [#allocation3], %s2685_s20 }
  0x30   : > { %s2689_s7 = scalar_lea.vmem [#allocation2], %s2075_s26 }
  0x31   : > { %2529 = dma.done.wait (%p2614_p4), %s187_s27, 1024  }
  0x32   : > { %2531 = vsyncadd (%p2614_p4), %s187_s27, 4294966272 }
  0x33   : > { %2533 = dma.done.wait (%p41_p1), [#allocation6], 2080  }
  0x34   : > { %2535 = vsyncadd (%p41_p1), [#allocation6], 4294965216  ;;  %v2228_v0 = vld [vmem:[#allocation5 + $0x38] sm:$0xff]  ;;  %v2227_v1 = vld [vmem:[#allocation5 + $0x30] sm:$0xff]  ;;  %s2078_s18 = sshll.u32 %s2685_s20, 7  ;;  %s2237_s29 = sshll.u32 %s2605_s16, 7 }
  0x35   : > { %358 = vmatpush.bf16.msra.mxu0 %v2228_v0  ;;  %2238 = vmatpush.bf16.msra.mxu2 %v2228_v0  ;;  %v2226_v2 = vld [vmem:[#allocation5 + $0x28] sm:$0xff]  ;;  %v2225_v3 = vld [vmem:[#allocation5 + $0x20] sm:$0xff]  ;;  %v2224_v4 = vld [vmem:[#allocation5 + $0x18] sm:$0xff]  ;;  %s3489_s23 = scalar_lea.vmem [#allocation8], %s2078_s18  ;;  %s1970_s4 = scalar_lea.hbm %s3939_s3, %s2237_s29 }
  0x36   : > { %v2223_v5 = vld [vmem:[#allocation5 + $0x10] sm:$0xff]  ;;  %v2222_v6 = vld [vmem:[#allocation5 + $0x8] sm:$0xff]  ;;  %v2221_v7 = vld [vmem:[#allocation5] sm:$0xff]  ;;  %s1971_s5 = sshll.u32 %s3489_s23, 4  ;;  %s1973_s6 = sshll.u32 %s1970_s4, 4  ;;  %s1972_s5 = int_to_ptr.vmem [resolvable:$true] %s1971_s5  ;;  %s1974_s6 = int_to_ptr.hbm [resolvable:$true] %s1973_s6 }
  0x37   : > { %v2213_v8 = vld [vmem:[%s2689_s7] sm:$0xff]  ;;  %v2214_v10 = vld [vmem:[%s2689_s7 + $0x8] sm:$0xff]  ;;  %v2215_v12 = vld [vmem:[%s2689_s7 + $0x10] sm:$0xff]  ;;  %s1959_s16 = scalar_lea.sflag [#allocation4], %s2685_s20  ;;  %s2498_s9 = sshra.s32 %s1974_s6, 4  ;;  %s2499_s9 = int_to_ptr.hbm [resolvable:$true] %s2498_s9 }
  0x38   : > { %v2217_v9 = vld [vmem:[%s2689_s7 + $0x20] sm:$0xff]  ;;  %v2218_v11 = vld [vmem:[%s2689_s7 + $0x28] sm:$0xff]  ;;  %v2219_v13 = vld [vmem:[%s2689_s7 + $0x30] sm:$0xff]  ;;  %s2500_s10 = scalar_lea.hbm %s2499_s9, 128  ;;  %s2504_s24 = scalar_lea.hbm %s3939_s3, 384 }
  0x39   : > { %359 = vmatpush.bf16.msra.mxu0 %v2227_v1  ;;  %2239 = vmatpush.bf16.msra.mxu2 %v2227_v1  ;;  %v2216_v14 = vld [vmem:[%s2689_s7 + $0x18] sm:$0xff]  ;;  %v2707_v16 = vld [vmem:[#allocation7] ss:$0 sm:$0xff]  ;;  %v2235_v22 = vld [vmem:[#allocation5 + $0x70] sm:$0xff]  ;;  %p2501_p1 = scmp.ne.s32.totalorder %s2499_s9, %s2500_s10  ;;  %p2505_p7 = scmp.lt.s32.totalorder %s2499_s9, %s3939_s3 }
  0x3a   : > { %v2220_v15 = vld [vmem:[%s2689_s7 + $0x38] sm:$0xff]  ;;  %v2234_v30 = vld [vmem:[#allocation5 + $0x68] sm:$0xff]  ;;  %v2233_v38 = vld [vmem:[#allocation5 + $0x60] sm:$0xff]  ;;  %p2506_p2 = scmp.lt.s32.totalorder %s2504_s24, %s2500_s10 }
  0x3b   : > { %v2236_v19 = vld [vmem:[#allocation5 + $0x78] sm:$0xff]  ;;  %v2231_v57 = vld [vmem:[#allocation5 + $0x50] sm:$0xff]  ;;  %p2502_p4 = pnand %p2501_p1, %p2655_p3 }
  0x3c   : > { %1189 = vmatpush.bf16.msra.mxu1 %v2236_v19  ;;  %2246 = vmatpush.bf16.msra.mxu3 %v2236_v19  ;;  %v2232_v48 = vld [vmem:[#allocation5 + $0x58] sm:$0xff]  ;;  %p2507_p9 = por %p2506_p2, %p2505_p7 }
  0x3d   : > { %360 = vmatpush.bf16.msra.mxu0 %v2226_v2  ;;  %2240 = vmatpush.bf16.msra.mxu2 %v2226_v2  ;;  %p2503_p8 = pneg %p2502_p4 }
  0x3f   : > { %p2508_p10 = pnand %p2507_p9, %p2503_p8 }
  0x40   : > { %1190 = vmatpush.bf16.msra.mxu1 %v2235_v22  ;;  %2247 = vmatpush.bf16.msra.mxu3 %v2235_v22 }
  0x41   : > { %361 = vmatpush.bf16.msra.mxu0 %v2225_v3  ;;  %2241 = vmatpush.bf16.msra.mxu2 %v2225_v3 }
  0x44   : > { %1191 = vmatpush.bf16.msra.mxu1 %v2234_v30  ;;  %2248 = vmatpush.bf16.msra.mxu3 %v2234_v30 }
  0x45   : > { %362 = vmatpush.bf16.msra.mxu0 %v2224_v4  ;;  %2242 = vmatpush.bf16.msra.mxu2 %v2224_v4  ;;  %v2230_v4 = vld [vmem:[#allocation5 + $0x48] sm:$0xff] }
  0x48   : > { %1192 = vmatpush.bf16.msra.mxu1 %v2233_v38  ;;  %2249 = vmatpush.bf16.msra.mxu3 %v2233_v38 }
  0x49   : > { %363 = vmatpush.bf16.msra.mxu0 %v2223_v5  ;;  %2243 = vmatpush.bf16.msra.mxu2 %v2223_v5 }
  0x4c   : > { %1193 = vmatpush.bf16.msra.mxu1 %v2232_v48  ;;  %2250 = vmatpush.bf16.msra.mxu3 %v2232_v48 }
  0x4d   : > { %364 = vmatpush.bf16.msra.mxu0 %v2222_v6  ;;  %2244 = vmatpush.bf16.msra.mxu2 %v2222_v6 }
  0x50   : > { %1194 = vmatpush.bf16.msra.mxu1 %v2231_v57  ;;  %2251 = vmatpush.bf16.msra.mxu3 %v2231_v57 }
  0x51   : > { %365 = vmatpush.bf16.msra.mxu0 %v2221_v7  ;;  %2245 = vmatpush.bf16.msra.mxu2 %v2221_v7 }
  0x54   : > { %366 = vmatmul.bf16.vlgmr.msra.gmra.mxu0 %v2213_v8  ;;  %386 = vmatmul.bf16.vlgmr.msra.gmra.mxu2 %v2217_v9 }
  0x55   : > { %1195 = vmatpush.bf16.msra.mxu1 %v2230_v4  ;;  %2252 = vmatpush.bf16.msra.mxu3 %v2230_v4 }
  0x64   : > { %371 = vmatmul.bf16.gmra.mxu0 %v2214_v10  ;;  %391 = vmatmul.bf16.gmra.mxu2 %v2218_v11 }
  0x74   : > { %376 = vmatmul.bf16.gmra.mxu0 %v2215_v12  ;;  %396 = vmatmul.bf16.gmra.mxu2 %v2219_v13 }
  0x84   : > { %381 = vmatmul.bf16.gmra.mxu0 %v2216_v14  ;;  %401 = vmatmul.bf16.gmra.mxu2 %v2220_v15  ;;  %v2229_v14 = vld [vmem:[#allocation5 + $0x40] sm:$0xff] }
  0x85   : > { %1196 = vmatpush.bf16.msra.mxu1 %v2229_v14  ;;  %2253 = vmatpush.bf16.msra.mxu3 %v2229_v14 }
  0xd1   : > { %v367_v17 = vpop.f32.mrf.mxu0 }
  0xd2   : > { %v2710_v18 = vadd.f32 %v2707_v16, %v367_v17 }
  0xd4   : > { %v2713_v20 = vmul.f32 0.70710677, %v2710_v18 }
  0xd6   : > { %v439_v21 = vmul.f32 %v2713_v20, %v2713_v20 }
  0xd7   : > { %v387_v23 = vpop.f32.mrf.mxu2 }
  0xd8   : > { %v2717_v24 = vmin.f32 %v439_v21, 16.0  ;;  %v2720_v25 = vadd.f32 %v2707_v16, %v387_v23 }
  0xd9   : > { %v369_v26 = vpop.f32.mrf.mxu0 }
  0xda   : > { %v441_v27 = vmul.f32 2.1237322e-06, %v2717_v24  ;;  %v2724_v28 = vmul.f32 0.70710677, %v2720_v25  ;;  %v2727_v29 = vadd.f32 %v2707_v16, %v369_v26  ;;  %v452_v36 = vmul.f32 3.8918573e-05, %v2717_v24 }
  0xdc   : > { %v759_v31 = vmul.f32 %v2724_v28, %v2724_v28  ;;  %v2732_v32 = vmul.f32 0.70710677, %v2727_v29  ;;  %v442_v33 = vadd.f32 0.00028619796, %v441_v27  ;;  %v453_v45 = vadd.f32 0.001143296, %v452_v36 }
  0xdd   : > { %v2801_v36 = vmul.f32 0.5, %v2710_v18  ;;  %v2814_v48 = vmul.f32 0.5, %v2727_v29 }
  0xde   : > { %v2734_v34 = vmin.f32 %v759_v31, 16.0  ;;  %v479_v35 = vmul.f32 %v2732_v32, %v2732_v32  ;;  %v443_v41 = vmul.f32 %v442_v33, %v2717_v24  ;;  %v454_v53 = vmul.f32 %v453_v45, %v2717_v24 }
  0xdf   : > { %v389_v37 = vpop.f32.mrf.mxu2 }
  0xe0   : > { %v2739_v39 = vmin.f32 %v479_v35, 16.0  ;;  %v2742_v40 = vadd.f32 %v2707_v16, %v389_v37  ;;  %v761_v42 = vmul.f32 2.1237322e-06, %v2734_v34  ;;  %v444_v49 = vadd.f32 0.0036580483, %v443_v41 }
  0xe1   : > { %v372_v43 = vpop.f32.mrf.mxu0  ;;  %v455_v63 = vadd.f32 0.014752088, %v454_v53  ;;  %v2804_v37 = vmul.f32 0.5, %v2720_v25 }
  0xe2   : > { %v481_v44 = vmul.f32 2.1237322e-06, %v2739_v39  ;;  %v2748_v46 = vmul.f32 0.70710677, %v2742_v40  ;;  %v2751_v47 = vadd.f32 %v2707_v16, %v372_v43  ;;  %v762_v50 = vadd.f32 0.00028619796, %v761_v42 }
  0xe3   : > { %v445_v59 = vmul.f32 %v444_v49, %v2717_v24  ;;  %v456_v10 = vmul.f32 %v455_v63, %v2717_v24 }
  0xe4   : > { %v2754_v51 = vmul.f32 0.70710677, %v2751_v47  ;;  %v482_v52 = vadd.f32 0.00028619796, %v481_v44  ;;  %v799_v54 = vmul.f32 %v2748_v46, %v2748_v46  ;;  %v763_v60 = vmul.f32 %v762_v50, %v2734_v34 }
  0xe5   : > { %v446_v5 = vadd.f32 0.05243302, %v445_v59  ;;  %v457_v30 = vadd.f32 0.112945676, %v456_v10  ;;  %v2821_v50 = vmul.f32 0.5, %v2742_v40 }
  0xe6   : > { %v519_v55 = vmul.f32 %v2754_v51, %v2754_v51  ;;  %v483_v62 = vmul.f32 %v482_v52, %v2739_v39  ;;  %v2767_v0 = vmin.f32 %v799_v54, 16.0  ;;  %v764_v6 = vadd.f32 0.0036580483, %v763_v60 }
  0xe7   : > { %v392_v56 = vpop.f32.mrf.mxu2  ;;  %v447_v21 = vmul.f32 %v446_v5, %v2717_v24  ;;  %v458_v25 = vmul.f32 %v457_v30, %v2717_v24 }
  0xe8   : > { %v2762_v58 = vadd.f32 %v2707_v16, %v392_v56  ;;  %v2769_v1 = vmin.f32 %v519_v55, 16.0  ;;  %v484_v8 = vadd.f32 0.0036580483, %v483_v62  ;;  %v801_v11 = vmul.f32 2.1237322e-06, %v2767_v0 }
  0xe9   : > { %v374_v61 = vpop.f32.mrf.mxu0  ;;  %v765_v22 = vmul.f32 %v764_v6, %v2734_v34  ;;  %v448_v42 = vadd.f32 0.18741608, %v447_v21  ;;  %v2828_v56 = vmul.f32 0.5, %v2751_v47  ;;  %v459_v6 = vadd.f32 0.4994258, %v458_v25 }
  0xea   : > { %v2772_v2 = vmul.f32 0.70710677, %v2762_v58  ;;  %v2775_v3 = vadd.f32 %v2707_v16, %v374_v61  ;;  %v521_v12 = vmul.f32 2.1237322e-06, %v2769_v1  ;;  %v485_v26 = vmul.f32 %v484_v8, %v2739_v39 }
  0xeb   : > { %v802_v31 = vadd.f32 0.00028619796, %v801_v11  ;;  %v766_v43 = vadd.f32 0.05243302, %v765_v22  ;;  %v449_v40 = vmul.f32 %v448_v42, %v2717_v24  ;;  %v2852_v22 = vmul.f32 0.5, %v2762_v58 }
  0xec   : > { %v839_v7 = vmul.f32 %v2772_v2, %v2772_v2  ;;  %v2780_v9 = vmul.f32 0.70710677, %v2775_v3  ;;  %v522_v33 = vadd.f32 0.00028619796, %v521_v12  ;;  %v486_v18 = vadd.f32 0.05243302, %v485_v26 }
  0xed   : > { %v803_v52 = vmul.f32 %v802_v31, %v2767_v0  ;;  %v767_v60 = vmul.f32 %v766_v43, %v2734_v34  ;;  %3953 = vst [vmem:[#allocation12_spill] sm:$0xff] %v2852_v22 }
  0xee   : > { %v2785_v15 = vmin.f32 %v839_v7, 16.0  ;;  %v559_v17 = vmul.f32 %v2780_v9, %v2780_v9  ;;  %v523_v53 = vmul.f32 %v522_v33, %v2769_v1  ;;  %v487_v4 = vmul.f32 %v486_v18, %v2739_v39 }
  0xef   : > { %v394_v13 = vpop.f32.mrf.mxu2  ;;  %v804_v7 = vadd.f32 0.0036580483, %v803_v52  ;;  %v768_v21 = vadd.f32 0.18741608, %v767_v60 }
  0xf0   : > { %v2790_v19 = vadd.f32 %v2707_v16, %v394_v13  ;;  %v2795_v27 = vmin.f32 %v559_v17, 16.0  ;;  %v841_v38 = vmul.f32 2.1237322e-06, %v2785_v15  ;;  %v524_v8 = vadd.f32 0.0036580483, %v523_v53 }
  0xf1   : > { %v377_v23 = vpop.f32.mrf.mxu0  ;;  %v450_v17 = vadd.f32 1.1283791, %v449_v40  ;;  %v488_v26 = vadd.f32 0.18741608, %v487_v4  ;;  %v769_v53 = vmul.f32 %v768_v21, %v2734_v34 }
  0xf2   : > { %v2798_v35 = vmul.f32 0.70710677, %v2790_v19  ;;  %v2808_v41 = vadd.f32 %v2707_v16, %v377_v23  ;;  %v561_v44 = vmul.f32 2.1237322e-06, %v2795_v27  ;;  %v842_v29 = vadd.f32 0.00028619796, %v841_v38 }
  0xf3   : > { %v805_v38 = vmul.f32 %v804_v7, %v2767_v0  ;;  %v525_v42 = vmul.f32 %v524_v8, %v2769_v1  ;;  %v2890_v21 = vmul.f32 0.5, %v2790_v19 }
  0xf4   : > { %v879_v45 = vmul.f32 %v2798_v35, %v2798_v35  ;;  %v2817_v49 = vmul.f32 0.70710677, %v2808_v41  ;;  %v562_v61 = vadd.f32 0.00028619796, %v561_v44  ;;  %v843_v11 = vmul.f32 %v842_v29, %v2785_v15 }
  0xf5   : > { %3955 = vst [vmem:[#allocation14_spill] sm:$0xff] %v2890_v21 }
  0xf6   : > { %v2825_v54 = vmin.f32 %v879_v45, 16.0  ;;  %v599_v57 = vmul.f32 %v2817_v49, %v2817_v49  ;;  %v563_v23 = vmul.f32 %v562_v61, %v2795_v27  ;;  %v460_v45 = vmul.f32 %v459_v6, %v2717_v24 }
  0xf7   : > { %v397_v55 = vpop.f32.mrf.mxu2  ;;  %v844_v58 = vadd.f32 0.0036580483, %v843_v11  ;;  %v489_v24 = vmul.f32 %v488_v26, %v2739_v39 }
  0xf8   : > { %v2833_v59 = vadd.f32 %v2707_v16, %v397_v55  ;;  %v881_v62 = vmul.f32 2.1237322e-06, %v2825_v54  ;;  %v2839_v5 = vmin.f32 %v599_v57, 16.0  ;;  %v2871_v55 = vmul.f32 0.5, %v2775_v3 }
  0xf9   : > { %v379_v63 = vpop.f32.mrf.mxu0  ;;  %v564_v29 = vadd.f32 0.0036580483, %v563_v23  ;;  %v2881_v7 = vadd.f32 1.0, %v460_v45  ;;  %v526_v3 = vadd.f32 0.05243302, %v525_v42  ;;  %v845_v8 = vmul.f32 %v844_v58, %v2785_v15 }
  0xfa   : > { %v2842_v47 = vmul.f32 0.70710677, %v2833_v59  ;;  %v882_v10 = vadd.f32 0.00028619796, %v881_v62  ;;  %v601_v12 = vmul.f32 2.1237322e-06, %v2839_v5  ;;  %v2849_v14 = vadd.f32 %v2707_v16, %v379_v63 }
  0xfb   : > { %v806_v63 = vadd.f32 0.05243302, %v805_v38  ;;  %v490_v26 = vadd.f32 1.1283791, %v489_v24  ;;  %2329 = vrcp.f32 %v2881_v7  ;;  %vm467_vm1 = vweird.f32 %v2881_v7 }
  0xfc   : > { %v919_v13 = vmul.f32 %v2842_v47, %v2842_v47  ;;  %v883_v30 = vmul.f32 %v882_v10, %v2825_v54  ;;  %v602_v31 = vadd.f32 0.00028619796, %v601_v12  ;;  %v2861_v43 = vmul.f32 0.70710677, %v2849_v14 }
  0xfd   : > { %v770_v12 = vadd.f32 1.1283791, %v769_v53  ;;  %v807_v19 = vmul.f32 %v806_v63, %v2767_v0 }
  0xfe   : > { %v2856_v33 = vmin.f32 %v919_v13, 16.0  ;;  %v603_v18 = vmul.f32 %v602_v31, %v2839_v5  ;;  %v639_v57 = vmul.f32 %v2861_v43, %v2861_v43  ;;  %v884_v60 = vadd.f32 0.0036580483, %v883_v30 }
  0xff   : > { %v399_v44 = vpop.f32.mrf.mxu2  ;;  %v565_v13 = vmul.f32 %v564_v29, %v2795_v27 }
 0x100   : > { %v921_v25 = vmul.f32 2.1237322e-06, %v2856_v33  ;;  %v2867_v52 = vadd.f32 %v2707_v16, %v399_v44  ;;  %v604_v61 = vadd.f32 0.0036580483, %v603_v18  ;;  %v2876_v4 = vmin.f32 %v639_v57, 16.0 }
 0x101   : > { %v382_v40 = vpop.f32.mrf.mxu0  ;;  %v885_v30 = vmul.f32 %v884_v60, %v2825_v54  ;;  %v527_v18 = vmul.f32 %v526_v3, %v2769_v1  ;;  %v566_v29 = vadd.f32 0.05243302, %v565_v13 }
 0x102   : > { %v922_v62 = vadd.f32 0.00028619796, %v921_v25  ;;  %v2879_v6 = vadd.f32 %v2707_v16, %v382_v40  ;;  %v2886_v11 = vmul.f32 0.70710677, %v2867_v52  ;;  %v641_v23 = vmul.f32 2.1237322e-06, %v2876_v4 }
 0x103   : > { %v605_v31 = vmul.f32 %v604_v61, %v2839_v5  ;;  %v846_v25 = vadd.f32 0.05243302, %v845_v8  ;;  %v2912_v61 = vmul.f32 %v450_v17, %v2713_v20  ;;  %v2927_v17 = vpop.eup %2329 }
 0x104   : > { %3954 = vst [vmem:[#allocation13_spill] sm:$0xff] %v2879_v6  ;;  %v923_v10 = vmul.f32 %v922_v62, %v2856_v33  ;;  %v959_v38 = vmul.f32 %v2886_v11, %v2886_v11  ;;  %v642_v44 = vadd.f32 0.00028619796, %v641_v23  ;;  %v2898_v45 = vmul.f32 0.70710677, %v2879_v6 }
 0x105   : > { %v886_v62 = vadd.f32 0.05243302, %v885_v30  ;;  %v606_v63 = vadd.f32 0.05243302, %v605_v31  ;;  %v528_v30 = vadd.f32 0.18741608, %v527_v18  ;;  %v847_v31 = vmul.f32 %v846_v25, %v2785_v15 }
 0x106   : > { %v924_v42 = vadd.f32 0.0036580483, %v923_v10  ;;  %3956 = vst [vmem:[#allocation15_spill] sm:$0xff] %v2898_v45  ;;  %v2903_v53 = vmin.f32 %v959_v38, 16.0  ;;  %v643_v57 = vmul.f32 %v642_v44, %v2876_v4  ;;  %v679_v40 = vmul.f32 %v2898_v45, %v2898_v45 }
 0x107   : > { %v402_v58 = vpop.f32.mrf.mxu2  ;;  %v2922_v38 = vmul.f32 %v770_v12, %v2724_v28  ;;  %v808_v44 = vadd.f32 0.18741608, %v807_v19  ;;  %v607_v19 = vmul.f32 %v606_v63, %v2839_v5  ;;  %vm468_vm0 = vweird.f32 %v2927_v17 }
 0x108   : > { %v2909_v24 = vadd.f32 %v2707_v16, %v402_v58  ;;  %v961_v3 = vmul.f32 2.1237322e-06, %v2903_v53  ;;  %v925_v8 = vmul.f32 %v924_v42, %v2856_v33  ;;  %v644_v10 = vadd.f32 0.0036580483, %v643_v57  ;;  %vm3014_vm2 = vmor %vm467_vm1, %vm468_vm0 }
 0x109   : > { %v384_v60 = vpop.f32.mrf.mxu0  ;;  %v2916_v13 = vmin.f32 %v679_v40, 16.0  ;;  %v567_v40 = vmul.f32 %v566_v29, %v2795_v27  ;;  %v463_v29 = vmul.f32 %v2927_v17, %v2881_v7  ;;  %v608_v22 = vadd.f32 0.18741608, %v607_v19 }
 0x10a   : > { %3957 = vst [vmem:[#allocation16_spill] sm:$0xff] %v2909_v24  ;;  %v2919_v23 = vadd.f32 %v2707_v16, %v384_v60  ;;  %v962_v58 = vadd.f32 0.00028619796, %v961_v3  ;;  %v2925_v20 = vmul.f32 0.70710677, %v2909_v24  ;;  %v645_v42 = vmul.f32 %v644_v10, %v2876_v4 }
 0x10b   : > { %v681_v57 = vmul.f32 2.1237322e-06, %v2916_v13  ;;  %v887_v60 = vmul.f32 %v886_v62, %v2825_v54  ;;  %v926_v3 = vadd.f32 0.05243302, %v925_v8  ;;  %v809_v62 = vmul.f32 %v808_v44, %v2767_v0 }
 0x10c   : > { %3958 = vst [vmem:[#allocation17_spill] sm:$0xff] %v2919_v23  ;;  %v963_v28 = vmul.f32 %v962_v58, %v2903_v53  ;;  %v999_v12 = vmul.f32 %v2925_v20, %v2925_v20  ;;  %v2939_v18 = vmul.f32 0.70710677, %v2919_v23  ;;  %v646_v25 = vadd.f32 0.05243302, %v645_v42 }
 0x10d   : > { %3959 = vst [vmem:[#allocation18_spill] sm:$0xff] %v2925_v20  ;;  %v682_v24 = vadd.f32 0.00028619796, %v681_v57  ;;  %v529_v58 = vmul.f32 %v528_v30, %v2769_v1  ;;  %v2951_v8 = vmul.f32 %v490_v26, %v2732_v32  ;;  %v848_v42 = vadd.f32 0.18741608, %v847_v31 }
 0x10e   : > { %3960 = vst [vmem:[#allocation19_spill] sm:$0xff] %v2939_v18  ;;  %v964_v10 = vadd.f32 0.0036580483, %v963_v28  ;;  %v2941_v6 = vmin.f32 %v999_v12, 16.0  ;;  %v719_v63 = vmul.f32 %v2939_v18, %v2939_v18  ;;  %v568_v12 = vadd.f32 0.18741608, %v567_v40 }
 0x10f   : > { %v404_v21 = vpop.f32.mrf.mxu2  ;;  %v683_v20 = vmul.f32 %v682_v24, %v2916_v13  ;;  %v888_v23 = vadd.f32 0.18741608, %v887_v60  ;;  %v927_v30 = vmul.f32 %v926_v3, %v2856_v33  ;;  %v647_v24 = vmul.f32 %v646_v25, %v2876_v4 }
 0x110   : > { %v965_v57 = vmul.f32 %v964_v10, %v2903_v53  ;;  %v1001_v28 = vmul.f32 2.1237322e-06, %v2941_v6  ;;  %v2956_v44 = vadd.f32 %v2707_v16, %v404_v21  ;;  %v2960_v18 = vmin.f32 %v719_v63, 16.0 }
 0x111   : > { %v684_v45 = vadd.f32 0.0036580483, %v683_v20  ;;  %v810_v32 = vadd.f32 1.1283791, %v809_v62  ;;  %v530_v26 = vadd.f32 1.1283791, %v529_v58  ;;  %v849_v40 = vmul.f32 %v848_v42, %v2785_v15 }
 0x112   : > { %3961 = vst [vmem:[#allocation20_spill] sm:$0xff] %v2956_v44  ;;  %v2963_v31 = vmul.f32 0.5, %v2808_v41  ;;  %v464_v10 = vsub.f32 1.0, %v463_v29  ;;  %v2967_v60 = vmul.f32 0.5, %v2833_v59  ;;  %v966_v16 = vadd.f32 0.05243302, %v965_v57 }
 0x113   : > { %v1002_v21 = vadd.f32 0.00028619796, %v1001_v28  ;;  %v569_v19 = vmul.f32 %v568_v12, %v2795_v27  ;;  %v889_v3 = vmul.f32 %v888_v23, %v2825_v54  ;;  %v609_v20 = vmul.f32 %v608_v22, %v2839_v5 }
 0x114   : > { %3962 = vst [vmem:[#allocation21_spill] sm:$0xff] %v2967_v60  ;;  %v2973_v25 = vmul.f32 0.70710677, %v2956_v44  ;;  %v928_v62 = vadd.f32 0.18741608, %v927_v30  ;;  %v685_v29 = vmul.f32 %v684_v45, %v2916_v13  ;;  %v2978_v59 = vmul.f32 %v810_v32, %v2748_v46 }
 0x115   : > { %v648_v41 = vadd.f32 0.18741608, %v647_v24  ;;  %v721_v58 = vmul.f32 2.1237322e-06, %v2960_v18  ;;  %v2981_v63 = vmul.f32 %v530_v26, %v2754_v51  ;;  %v2984_v42 = vmul.f32 0.5, %v2849_v14 }
 0x116   : > { %3963 = vst [vmem:[#allocation22_spill] sm:$0xff] %v2973_v25  ;;  %v465_v22 = vmul.f32 %v2927_v17, %v464_v10  ;;  %v850_v23 = vadd.f32 1.1283791, %v849_v40  ;;  %v967_v57 = vmul.f32 %v966_v16, %v2903_v53  ;;  %v1003_v28 = vmul.f32 %v1002_v21, %v2941_v6 }
 0x117   : > { %3964 = vst [vmem:[#allocation23_spill] sm:$0xff] %v2984_v42  ;;  %v492_v45 = vmul.f32 3.8918573e-05, %v2739_v39  ;;  %v570_v12 = vadd.f32 1.1283791, %v569_v19  ;;  %v1039_v46 = vmul.f32 %v2973_v25, %v2973_v25  ;;  %v929_v51 = vmul.f32 %v928_v62, %v2856_v33 }
 0x118   : > { %v890_v30 = vadd.f32 1.1283791, %v889_v3  ;;  %v2990_v24 = vadd.f32 1.1283791, %v609_v20  ;;  %v649_v14 = vmul.f32 %v648_v41, %v2876_v4  ;;  %v686_v32 = vadd.f32 0.05243302, %v685_v29 }
 0x119   : > { %v722_v26 = vadd.f32 0.00028619796, %v721_v58  ;;  %v466_v10 = vadd.f32 %v2927_v17, %v465_v22  ;;  %v471_v40 = vand.u32 2147483647, %v2881_v7  ;;  %v493_v16 = vadd.f32 0.001143296, %v492_v45 }
 0x11a   : > { %v3000_v21 = vmul.f32 0.5, %v2867_v52  ;;  %v968_v19 = vadd.f32 0.18741608, %v967_v57  ;;  %v1004_v3 = vadd.f32 0.0036580483, %v1003_v28  ;;  %v473_v20 = vand.u32 2147483648, %v2881_v7 }
 0x11b   : > { %v3003_v44 = vmin.f32 %v1039_v46, 16.0  ;;  %v494_v62 = vmul.f32 %v493_v16, %v2739_v39  ;;  %v772_v41 = vmul.f32 3.8918573e-05, %v2734_v34  ;;  %v930_v29 = vadd.f32 1.1283791, %v929_v51 }
 0x11c   : > { %3965 = vst [vmem:[#allocation24_spill] sm:$0xff] %v3000_v21  ;;  %v3008_v58 = vadd.f32 1.1283791, %v649_v14  ;;  %v687_v22 = vmul.f32 %v686_v32, %v2916_v13  ;;  %v723_v52 = vmul.f32 %v722_v26, %v2960_v18  ;;  %v470_v7 = vsel %vm3014_vm2, %v2927_v17, %v466_v10 }
 0x11d   : > { %vm472_vm3 = vcmp.eq.f32.partialorder %v471_v40, 8.507059e+37  ;;  %v495_v28 = vadd.f32 0.014752088, %v494_v62  ;;  %v773_v45 = vadd.f32 0.001143296, %v772_v41  ;;  %v969_v46 = vmul.f32 %v968_v19, %v2903_v53 }
 0x11e   : > { %v1005_v51 = vmul.f32 %v1004_v3, %v2941_v6  ;;  %v474_v14 = vor.u32 1.1754944e-38, %v473_v20  ;;  %v812_v32 = vmul.f32 3.8918573e-05, %v2767_v0  ;;  %v1041_v26 = vmul.f32 2.1237322e-06, %v3003_v44 }
 0x11f   : > { %v496_v16 = vmul.f32 %v495_v28, %v2739_v39  ;;  %v774_v25 = vmul.f32 %v773_v45, %v2734_v34  ;;  %v532_v21 = vmul.f32 3.8918573e-05, %v2769_v1  ;;  %v688_v57 = vadd.f32 0.18741608, %v687_v22 }
 0x120   : > { %v724_v17 = vadd.f32 0.0036580483, %v723_v52  ;;  %v475_v10 = vsel %vm472_vm3, %v474_v14, %v470_v7  ;;  %v813_v40 = vadd.f32 0.001143296, %v812_v32  ;;  %v3029_v62 = vmul.f32 %v850_v23, %v2772_v2 }
 0x121   : > { %v497_v19 = vadd.f32 0.112945676, %v496_v16  ;;  %v775_v3 = vadd.f32 0.014752088, %v774_v25  ;;  %v533_v20 = vadd.f32 0.001143296, %v532_v21  ;;  %v476_v42 = vmul.f32 %v475_v10, %v2912_v61 }
 0x122   : > { %v3031_v41 = vadd.f32 1.1283791, %v969_v46  ;;  %v3033_v60 = vadd.f32 0.05243302, %v1005_v51  ;;  %v814_v28 = vmul.f32 %v813_v40, %v2767_v0  ;;  %v572_v45 = vmul.f32 3.8918573e-05, %v2795_v27 }
 0x123   : > { %v498_v22 = vmul.f32 %v497_v19, %v2739_v39  ;;  %v776_v52 = vmul.f32 %v775_v3, %v2734_v34  ;;  %v534_v2 = vmul.f32 %v533_v20, %v2769_v1  ;;  %v3042_v23 = vmul.f32 %v570_v12, %v2780_v9 }
 0x124   : > { %3968 = vst [vmem:[#allocation25_spill] sm:$0xff] %v3033_v60  ;;  %v1042_v25 = vadd.f32 0.00028619796, %v1041_v26  ;;  %v815_v21 = vadd.f32 0.014752088, %v814_v28  ;;  %v3045_v46 = vmul.f32 %v890_v30, %v2798_v35  ;;  %v725_v61 = vmul.f32 %v724_v17, %v2960_v18 }
 0x125   : > { %v573_v7 = vadd.f32 0.001143296, %v572_v45  ;;  %v499_v51 = vadd.f32 0.4994258, %v498_v22  ;;  %v777_v14 = vadd.f32 0.112945676, %v776_v52  ;;  %v3056_v35 = vmul.f32 %v2990_v24, %v2817_v49 }
 0x126   : > { %v535_v32 = vadd.f32 0.014752088, %v534_v2  ;;  %v816_v16 = vmul.f32 %v815_v21, %v2767_v0  ;;  %v852_v40 = vmul.f32 3.8918573e-05, %v2785_v15  ;;  %v2143_v19 = vclamps-f32 %v476_v42, 1.0 }
 0x127   : > { %v574_v10 = vmul.f32 %v573_v7, %v2795_v27  ;;  %v500_v9 = vmul.f32 %v499_v51, %v2739_v39  ;;  %v778_v12 = vmul.f32 %v777_v14, %v2734_v34  ;;  %v892_v17 = vmul.f32 3.8918573e-05, %v2825_v54 }
 0x128   : > { %v536_v26 = vmul.f32 %v535_v32, %v2769_v1  ;;  %v817_v30 = vadd.f32 0.112945676, %v816_v16  ;;  %v3060_v20 = vmul.f32 %v930_v29, %v2842_v47  ;;  %v689_v39 = vmul.f32 %v688_v57, %v2916_v13 }
 0x129   : > { %v575_v3 = vadd.f32 0.014752088, %v574_v10  ;;  %v3062_v28 = vadd.f32 1.0, %v500_v9  ;;  %v779_v42 = vadd.f32 0.4994258, %v778_v12  ;;  %v1043_v24 = vmul.f32 %v1042_v25, %v3003_v44 }
 0x12a   : > { %v537_v45 = vadd.f32 0.112945676, %v536_v26  ;;  %v818_v22 = vmul.f32 %v817_v30, %v2767_v0  ;;  %v853_v2 = vadd.f32 0.001143296, %v852_v40  ;;  %v726_v49 = vadd.f32 0.05243302, %v725_v61 }
 0x12b   : > { %v576_v52 = vmul.f32 %v575_v3, %v2795_v27  ;;  %2331 = vrcp.f32 %v3062_v28  ;;  %v1079_v21 = vadd.f32 1.0, %v2143_v19  ;;  %v780_v47 = vmul.f32 %v779_v42, %v2734_v34 }
 0x12c   : > { %v819_v29 = vadd.f32 0.4994258, %v818_v22  ;;  %v538_v7 = vmul.f32 %v537_v45, %v2769_v1  ;;  %v511_v14 = vand.u32 2147483647, %v3062_v28  ;;  %v513_v57 = vand.u32 2147483648, %v3062_v28 }
 0x12d   : > { %v577_v51 = vadd.f32 0.112945676, %v576_v52  ;;  %v854_v32 = vmul.f32 %v853_v2, %v2785_v15  ;;  %v893_v16 = vadd.f32 0.001143296, %v892_v17  ;;  %v3074_v10 = vadd.f32 1.0, %v780_v47 }
 0x12e   : > { %v820_v25 = vmul.f32 %v819_v29, %v2767_v0  ;;  %v539_v61 = vadd.f32 0.4994258, %v538_v7  ;;  %v3080_v34 = vmul.f32 %v3008_v58, %v2861_v43  ;;  %v3082_v19 = vadd.f32 1.1283791, %v689_v39 }
 0x12f   : > { %v578_v40 = vmul.f32 %v577_v51, %v2795_v27  ;;  %v3084_v9 = vadd.f32 0.0036580483, %v1043_v24  ;;  %v855_v12 = vadd.f32 0.014752088, %v854_v32  ;;  %v3087_v26 = vmul.f32 %v726_v49, %v2960_v18 }
 0x130   : > { %v3090_v30 = vmul.f32 %v1079_v21, %v2801_v36  ;;  %2333 = vrcp.f32 %v3074_v10  ;;  %v894_v0 = vmul.f32 %v893_v16, %v2825_v54  ;;  %v3094_v17 = vadd.f32 1.0, %v820_v25 }
 0x131   : > { %v2332_v3 = vpop.eup %2331  ;;  %v540_v43 = vmul.f32 %v539_v61, %v2769_v1  ;;  %v579_v58 = vadd.f32 0.4994258, %v578_v40  ;;  %v856_v42 = vmul.f32 %v855_v12, %v2785_v15  ;;  %vm507_vm4 = vweird.f32 %v3062_v28 }
 0x132   : > { %v503_v45 = vmul.f32 %v2332_v3, %v3062_v28  ;;  %vm3100_vm5 = vcmp.eq.f32.partialorder %v511_v14, 8.507059e+37  ;;  %v514_v36 = vor.u32 1.1754944e-38, %v513_v57  ;;  %v791_v22 = vand.u32 2147483647, %v3074_v10 }
 0x133   : > { %v793_v52 = vand.u32 2147483648, %v3074_v10  ;;  %2335 = vrcp.f32 %v3094_v17  ;;  %v612_v1 = vmul.f32 3.8918573e-05, %v2839_v5  ;;  %v3108_v49 = vadd.f32 1.0, %v540_v43 }
 0x134   : > { %v504_v2 = vsub.f32 1.0, %v503_v45  ;;  %v580_v24 = vmul.f32 %v579_v58, %v2795_v27  ;;  %v857_v21 = vadd.f32 0.112945676, %v856_v42  ;;  %vm508_vm6 = vweird.f32 %v2332_v3 }
 0x135   : > { %vm787_vm7 = vweird.f32 %v3074_v10  ;;  %v895_v47 = vadd.f32 0.014752088, %v894_v0  ;;  %v3113_v29 = vmul.f32 3.8918573e-05, %v2876_v4  ;;  %v831_v14 = vand.u32 2147483647, %v3094_v17  ;;  %vm509_vm10 = vmor %vm507_vm4, %vm508_vm6 }
 0x136   : > { %v2334_v7 = vpop.eup %2333  ;;  %v505_v51 = vmul.f32 %v2332_v3, %v504_v2  ;;  %v833_v57 = vand.u32 2147483648, %v3094_v17  ;;  %2337 = vrcp.f32 %v3108_v49  ;;  %vm3119_vm8 = vcmp.eq.f32.partialorder %v791_v22, 8.507059e+37 }
 0x137   : > { %v783_v32 = vmul.f32 %v2334_v7, %v3074_v10  ;;  %v794_v16 = vor.u32 1.1754944e-38, %v793_v52  ;;  %v3123_v25 = vadd.f32 1.0, %v580_v24  ;;  %vm827_vm9 = vweird.f32 %v3094_v17 }
 0x138   : > { %v506_v61 = vadd.f32 %v2332_v3, %v505_v51  ;;  %v858_v40 = vmul.f32 %v857_v21, %v2785_v15  ;;  %v896_v12 = vmul.f32 %v895_v47, %v2825_v54  ;;  %v551_v58 = vand.u32 2147483647, %v3108_v49 }
 0x139   : > { %v2336_v0 = vpop.eup %2335  ;;  %v784_v43 = vsub.f32 1.0, %v783_v32  ;;  %v553_v42 = vand.u32 2147483648, %v3108_v49  ;;  %2339 = vrcp.f32 %v3123_v25  ;;  %vm3135_vm11 = vcmp.eq.f32.partialorder %v831_v14, 8.507059e+37 }
 0x13a   : > { %v510_v45 = vsel %vm509_vm10, %v2332_v3, %v506_v61  ;;  %v823_v22 = vmul.f32 %v2336_v0, %v3094_v17  ;;  %v834_v2 = vor.u32 1.1754944e-38, %v833_v57  ;;  %v613_v24 = vadd.f32 0.001143296, %v612_v1 }
 0x13b   : > { %v515_v28 = vsel %vm3100_vm5, %v514_v36, %v510_v45  ;;  %v785_v21 = vmul.f32 %v2334_v7, %v784_v43  ;;  %vm788_vm12 = vweird.f32 %v2334_v7  ;;  %vm547_vm13 = vweird.f32 %v3108_v49 }
 0x13c   : > { %v859_v47 = vadd.f32 0.4994258, %v858_v40  ;;  %v2338_v51 = vpop.eup %2337  ;;  %v516_v32 = vmul.f32 %v515_v28, %v2951_v8  ;;  %v824_v3 = vsub.f32 1.0, %v823_v22  ;;  %v591_v61 = vand.u32 2147483647, %v3123_v25  ;;  %vm789_vm0 = vmor %vm787_vm7, %vm788_vm12 }
 0x13d   : > { %v897_v14 = vadd.f32 0.112945676, %v896_v12  ;;  %v786_v60 = vadd.f32 %v2334_v7, %v785_v21  ;;  %vm828_vm14 = vweird.f32 %v2336_v0  ;;  %v543_v57 = vmul.f32 %v2338_v51, %v3108_v49 }
 0x13e   : > { %vm3145_vm15 = vcmp.eq.f32.partialorder %v551_v58, 8.507059e+37  ;;  %v554_v39 = vor.u32 1.1754944e-38, %v553_v42  ;;  %v2144_v36 = vclamps-f32 %v516_v32, 1.0  ;;  %v825_v40 = vmul.f32 %v2336_v0, %v824_v3  ;;  %vm829_vm3 = vmor %vm827_vm9, %vm828_vm14 }
 0x13f   : > { %v860_v8 = vmul.f32 %v859_v47, %v2785_v15  ;;  %v898_v43 = vmul.f32 %v897_v14, %v2825_v54  ;;  %v2340_v45 = vpop.eup %2339  ;;  %v790_v12 = vsel %vm789_vm0, %v2334_v7, %v786_v60  ;;  %v544_v22 = vsub.f32 1.0, %v543_v57 }
 0x140   : > { %vm587_vm1 = vweird.f32 %v3123_v25  ;;  %v593_v58 = vand.u32 2147483648, %v3123_v25  ;;  %v1080_v28 = vadd.f32 1.0, %v2144_v36  ;;  %v795_v42 = vsel %vm3119_vm8, %v794_v16, %v790_v12 }
 0x141   : > { %v826_v21 = vadd.f32 %v2336_v0, %v825_v40  ;;  %v583_v10 = vmul.f32 %v2340_v45, %v3123_v25  ;;  %vm3158_vm2 = vcmp.eq.f32.partialorder %v591_v61, 8.507059e+37  ;;  %v796_v15 = vmul.f32 %v795_v42, %v2922_v38 }
 0x142   : > { %v545_v60 = vmul.f32 %v2338_v51, %v544_v22  ;;  %vm548_vm4 = vweird.f32 %v2338_v51  ;;  %v3166_v7 = vadd.f32 1.0, %v860_v8  ;;  %v1096_v27 = vmul.f32 %v1080_v28, %v2814_v48 }
 0x143   : > { %v830_v16 = vsel %vm829_vm3, %v2336_v0, %v826_v21  ;;  %v584_v47 = vsub.f32 1.0, %v583_v10  ;;  %v899_v3 = vadd.f32 0.4994258, %v898_v43  ;;  %v2151_v14 = vclamps-f32 %v796_v15, 1.0  ;;  %vm549_vm5 = vmor %vm547_vm13, %vm548_vm4 }
 0x144   : > { %v835_v61 = vsel %vm3135_vm11, %v834_v2, %v830_v16  ;;  %v546_v57 = vadd.f32 %v2338_v51, %v545_v60  ;;  %2341 = vrcp.f32 %v3166_v7  ;;  %v1111_v38 = vpack.c.bf16 %v1096_v27, %v3090_v30 }
 0x145   : > { %v836_v17 = vmul.f32 %v835_v61, %v2978_v59  ;;  %v585_v36 = vmul.f32 %v2340_v45, %v584_v47  ;;  %vm588_vm6 = vweird.f32 %v2340_v45  ;;  %v1087_v48 = vadd.f32 1.0, %v2151_v14 }
 0x146   : > { %v550_v0 = vsel %vm549_vm5, %v2338_v51, %v546_v57  ;;  %v614_v40 = vmul.f32 %v613_v24, %v2839_v5  ;;  %v653_v8 = vadd.f32 0.001143296, %v3113_v29  ;;  %1197 = vmatmul.bf16.vlgmr.msra.gmra.mxu1 %v1111_v38  ;;  %v900_v30 = vmul.f32 %v899_v3, %v2825_v54  ;;  %vm589_vm7 = vmor %vm587_vm1, %vm588_vm6 }
 0x147   : > { %v2152_v52 = vclamps-f32 %v836_v17, 1.0  ;;  %v555_v2 = vsel %vm3145_vm15, %v554_v39, %v550_v0  ;;  %v586_v43 = vadd.f32 %v2340_v45, %v585_v36  ;;  %v594_v49 = vor.u32 1.1754944e-38, %v593_v58 }
 0x148   : > { %v556_v59 = vmul.f32 %v555_v2, %v2981_v63  ;;  %v871_v51 = vand.u32 2147483647, %v3166_v7  ;;  %v873_v24 = vand.u32 2147483648, %v3166_v7  ;;  %v1103_v29 = vmul.f32 %v1087_v48, %v2804_v37 }
 0x149   : > { %v1088_v12 = vadd.f32 1.0, %v2152_v52  ;;  %v590_v22 = vsel %vm589_vm7, %v2340_v45, %v586_v43  ;;  %v3187_v28 = vadd.f32 1.0, %v900_v30  ;;  %v615_v63 = vadd.f32 0.014752088, %v614_v40 }
 0x14a   : > { %v2342_v1 = vpop.eup %2341  ;;  %v2145_v39 = vclamps-f32 %v556_v59, 1.0  ;;  %v595_v54 = vsel %vm3158_vm2, %v594_v49, %v590_v22  ;;  %v654_v25 = vmul.f32 %v653_v8, %v2876_v4  ;;  %v932_v10 = vmul.f32 3.8918573e-05, %v2856_v33 }
 0x14b   : > { %v1104_v58 = vmul.f32 %v1088_v12, %v2821_v50  ;;  %v596_v42 = vmul.f32 %v595_v54, %v3042_v23  ;;  %v863_v21 = vmul.f32 %v2342_v1, %v3166_v7  ;;  %vm867_vm8 = vweird.f32 %v3166_v7 }
 0x14c   : > { %vm3197_vm9 = vcmp.eq.f32.partialorder %v871_v51, 8.507059e+37  ;;  %v874_v45 = vor.u32 1.1754944e-38, %v873_v24  ;;  %2343 = vrcp.f32 %v3187_v28  ;;  %v1081_v60 = vadd.f32 1.0, %v2145_v39 }
 0x14d   : > { %v1115_v32 = vpack.c.bf16 %v1104_v58, %v1103_v29  ;;  %v2146_v15 = vclamps-f32 %v596_v42, 1.0  ;;  %v864_v27 = vsub.f32 1.0, %v863_v21  ;;  %vm868_vm10 = vweird.f32 %v2342_v1 }
 0x14e   : > { %v911_v50 = vand.u32 2147483647, %v3187_v28  ;;  %v616_v23 = vmul.f32 %v615_v63, %v2839_v5  ;;  %v655_v16 = vadd.f32 0.014752088, %v654_v25  ;;  %v913_v14 = vand.u32 2147483648, %v3187_v28  ;;  %vm869_vm11 = vmor %vm867_vm8, %vm868_vm10 }
 0x14f   : > { %1217 = vmatmul.bf16.vlgmr.msra.gmra.mxu3 %v1115_v32  ;;  %v1082_v47 = vadd.f32 1.0, %v2146_v15  ;;  %v865_v3 = vmul.f32 %v2342_v1, %v864_v27  ;;  %v933_v61 = vadd.f32 0.001143296, %v932_v10  ;;  %v972_v17 = vmul.f32 3.8918573e-05, %v2903_v53 }
 0x150   : > { %v617_v57 = vadd.f32 0.112945676, %v616_v23  ;;  %v656_v38 = vmul.f32 %v655_v16, %v2876_v4  ;;  %v692_v36 = vmul.f32 3.8918573e-05, %v2916_v13  ;;  %v1097_v48 = vmul.f32 %v1081_v60, %v2828_v56 }
 0x151   : > { %v1098_v0 = vmul.f32 %v1082_v47, %v2871_v55  ;;  %v866_v40 = vadd.f32 %v2342_v1, %v865_v3  ;;  %v934_v8 = vmul.f32 %v933_v61, %v2856_v33  ;;  %v973_v30 = vadd.f32 0.001143296, %v972_v17 }
 0x152   : > { %v2344_v52 = vpop.eup %2343  ;;  %v618_v2 = vmul.f32 %v617_v57, %v2839_v5  ;;  %v657_v43 = vadd.f32 0.112945676, %v656_v38  ;;  %v693_v59 = vadd.f32 0.001143296, %v692_v36  ;;  %v732_v56 = vmul.f32 3.8918573e-05, %v2960_v18 }
 0x153   : > { %v1112_v49 = vpack.c.bf16 %v1098_v0, %v1097_v48  ;;  %v870_v51 = vsel %vm869_vm11, %v2342_v1, %v866_v40  ;;  %v903_v24 = vmul.f32 %v2344_v52, %v3187_v28  ;;  %v935_v22 = vadd.f32 0.014752088, %v934_v8 }
 0x154   : > { %v875_v55 = vsel %vm3197_vm9, %v874_v45, %v870_v51  ;;  %v619_v12 = vadd.f32 0.4994258, %v618_v2  ;;  %v658_v29 = vmul.f32 %v657_v43, %v2876_v4  ;;  %vm908_vm12 = vweird.f32 %v2344_v52 }
 0x155   : > { %v904_v7 = vsub.f32 1.0, %v903_v24  ;;  %v974_v39 = vmul.f32 %v973_v30, %v2903_v53  ;;  %v694_v54 = vmul.f32 %v693_v59, %v2916_v13  ;;  %v876_v63 = vmul.f32 %v875_v55, %v3029_v62  ;;  %v3982_v24 = vld [vmem:[#allocation12_spill] sm:$0xff] }
 0x156   : > { %v620_v1 = vmul.f32 %v619_v12, %v2839_v5  ;;  %v659_v25 = vadd.f32 0.4994258, %v658_v29  ;;  %v936_v58 = vmul.f32 %v935_v22, %v2856_v33  ;;  %1202 = vmatmul.bf16.gmra.mxu1 %v1112_v49  ;;  %v733_v37 = vadd.f32 0.001143296, %v732_v56 }
 0x157   : > { %v905_v42 = vmul.f32 %v2344_v52, %v904_v7  ;;  %v975_v21 = vadd.f32 0.014752088, %v974_v39  ;;  %v695_v10 = vadd.f32 0.014752088, %v694_v54  ;;  %v728_v45 = vadd.f32 0.18741608, %v3087_v26 }
 0x158   : > { %v3226_v32 = vadd.f32 1.0, %v620_v1  ;;  %v660_v15 = vmul.f32 %v659_v25, %v2876_v4  ;;  %v937_v60 = vadd.f32 0.112945676, %v936_v58  ;;  %vm907_vm13 = vweird.f32 %v3187_v28  ;;  %v3983_v7 = vld [vmem:[#allocation14_spill] sm:$0xff] }
 0x159   : > { %v906_v27 = vadd.f32 %v2344_v52, %v905_v42  ;;  %vm912_vm14 = vcmp.eq.f32.partialorder %v911_v50, 8.507059e+37  ;;  %v976_v5 = vmul.f32 %v975_v21, %v2903_v53  ;;  %v2153_v62 = vclamps-f32 %v876_v63, 1.0  ;;  %vm909_vm15 = vmor %vm907_vm13, %vm908_vm12  ;;  %v3981_v50 = vld [vmem:[#allocation15_spill] sm:$0xff] }
 0x15a   : > { %v914_v23 = vor.u32 1.1754944e-38, %v913_v14  ;;  %2345 = vrcp.f32 %v3226_v32  ;;  %v696_v16 = vmul.f32 %v695_v10, %v2916_v13  ;;  %v3234_v47 = vadd.f32 1.0, %v660_v15 }
 0x15b   : > { %v910_v26 = vsel %vm909_vm15, %v2344_v52, %v906_v27  ;;  %v938_v4 = vmul.f32 %v937_v60, %v2856_v33  ;;  %v734_v3 = vmul.f32 %v733_v37, %v2960_v18  ;;  %v3240_v28 = vmul.f32 %v3031_v41, %v2886_v11 }
 0x15c   : > { %v3244_v61 = vmul.f32 %v3082_v19, %v3981_v50  ;;  %v915_v14 = vsel %vm912_vm14, %v914_v23, %v910_v26  ;;  %v977_v57 = vadd.f32 0.112945676, %v976_v5  ;;  %v3247_v38 = vmul.f32 %v728_v45, %v2960_v18 }
 0x15d   : > { %v3251_v17 = vmul.f32 %v3084_v9, %v3003_v44  ;;  %v916_v36 = vmul.f32 %v915_v14, %v3045_v46  ;;  %2347 = vrcp.f32 %v3234_v47  ;;  %v1089_v48 = vadd.f32 1.0, %v2153_v62 }
 0x15e   : > { %v939_v11 = vadd.f32 0.4994258, %v938_v4  ;;  %v978_v41 = vmul.f32 %v977_v57, %v2903_v53  ;;  %v697_v0 = vadd.f32 0.112945676, %v696_v16  ;;  %vm627_vm0 = vweird.f32 %v3226_v32 }
 0x15f   : > { %v2154_v19 = vclamps-f32 %v916_v36, 1.0  ;;  %v735_v40 = vadd.f32 0.014752088, %v734_v3  ;;  %v1012_v8 = vmul.f32 3.8918573e-05, %v2941_v6  ;;  %v633_v49 = vand.u32 2147483648, %v3226_v32 }
 0x160   : > { %v2346_v52 = vpop.eup %2345  ;;  %v631_v2 = vand.u32 2147483647, %v3226_v32  ;;  %v940_v9 = vmul.f32 %v939_v11, %v2856_v33  ;;  %v979_v43 = vadd.f32 0.4994258, %v978_v41  ;;  %v698_v46 = vmul.f32 %v697_v0, %v2916_v13 }
 0x161   : > { %v1090_v30 = vadd.f32 1.0, %v2154_v19  ;;  %v623_v59 = vmul.f32 %v2346_v52, %v3226_v32  ;;  %v736_v51 = vmul.f32 %v735_v40, %v2960_v18  ;;  %v1105_v56 = vmul.f32 %v1089_v48, %v3982_v24 }
 0x162   : > { %v3265_v55 = vadd.f32 1.0, %v940_v9  ;;  %v980_v12 = vmul.f32 %v979_v43, %v2903_v53  ;;  %v699_v29 = vadd.f32 0.4994258, %v698_v46  ;;  %v1013_v63 = vadd.f32 0.001143296, %v1012_v8 }
 0x163   : > { %v2348_v22 = vpop.eup %2347  ;;  %v1106_v33 = vmul.f32 %v1090_v30, %v3983_v7  ;;  %v624_v39 = vsub.f32 1.0, %v623_v59  ;;  %v737_v54 = vadd.f32 0.112945676, %v736_v51  ;;  %vm3269_vm1 = vcmp.eq.f32.partialorder %v631_v2, 8.507059e+37 }
 0x164   : > { %v663_v25 = vmul.f32 %v2348_v22, %v3234_v47  ;;  %v671_v58 = vand.u32 2147483647, %v3234_v47  ;;  %2349 = vrcp.f32 %v3265_v55  ;;  %vm628_vm2 = vweird.f32 %v2346_v52 }
 0x165   : > { %v1116_v42 = vpack.c.bf16 %v1106_v33, %v1105_v56  ;;  %v625_v21 = vmul.f32 %v2346_v52, %v624_v39  ;;  %v673_v53 = vand.u32 2147483648, %v3234_v47  ;;  %v3277_v37 = vadd.f32 1.0, %v980_v12  ;;  %vm629_vm4 = vmor %vm627_vm0, %vm628_vm2 }
 0x166   : > { %v664_v10 = vsub.f32 1.0, %v663_v25  ;;  %v700_v45 = vmul.f32 %v699_v29, %v2916_v13  ;;  %v738_v15 = vmul.f32 %v737_v54, %v2960_v18  ;;  %v634_v27 = vor.u32 1.1754944e-38, %v633_v49 }
 0x167   : > { %1222 = vmatmul.bf16.gmra.mxu3 %v1116_v42  ;;  %v626_v60 = vadd.f32 %v2346_v52, %v625_v21  ;;  %vm667_vm3 = vweird.f32 %v3234_v47  ;;  %v1014_v5 = vmul.f32 %v1013_v63, %v2941_v6  ;;  %vm668_vm5 = vweird.f32 %v2348_v22 }
 0x168   : > { %v665_v62 = vmul.f32 %v2348_v22, %v664_v10  ;;  %v951_v23 = vand.u32 2147483647, %v3265_v55  ;;  %2351 = vrcp.f32 %v3277_v37  ;;  %vm3287_vm6 = vcmp.eq.f32.partialorder %v671_v58, 8.507059e+37  ;;  %vm669_vm7 = vmor %vm667_vm3, %vm668_vm5  ;;  %v3992_v58 = vld [vmem:[#allocation23_spill] sm:$0xff] }
 0x169   : > { %v630_v16 = vsel %vm629_vm4, %v2346_v52, %v626_v60  ;;  %v674_v26 = vor.u32 1.1754944e-38, %v673_v53  ;;  %v3291_v4 = vadd.f32 1.0, %v700_v45  ;;  %v739_v14 = vadd.f32 0.4994258, %v738_v15 }
 0x16a   : > { %v2350_v3 = vpop.eup %2349  ;;  %v635_v50 = vsel %vm3269_vm1, %v634_v27, %v630_v16  ;;  %v666_v32 = vadd.f32 %v2348_v22, %v665_v62  ;;  %v1015_v57 = vadd.f32 0.014752088, %v1014_v5  ;;  %v953_v11 = vand.u32 2147483648, %v3265_v55 }
 0x16b   : > { %v636_v36 = vmul.f32 %v635_v50, %v3056_v35  ;;  %v943_v48 = vmul.f32 %v2350_v3, %v3265_v55  ;;  %v1052_v41 = vmul.f32 3.8918573e-05, %v3003_v44  ;;  %vm947_vm8 = vweird.f32 %v3265_v55 }
 0x16c   : > { %v670_v0 = vsel %vm669_vm7, %v2348_v22, %v666_v32  ;;  %vm3302_vm9 = vcmp.eq.f32.partialorder %v951_v23, 8.507059e+37  ;;  %2353 = vrcp.f32 %v3291_v4  ;;  %v991_v8 = vand.u32 2147483647, %v3277_v37 }
 0x16d   : > { %v2147_v40 = vclamps-f32 %v636_v36, 1.0  ;;  %v675_v35 = vsel %vm3287_vm6, %v674_v26, %v670_v0  ;;  %v944_v47 = vsub.f32 1.0, %v943_v48  ;;  %v993_v9 = vand.u32 2147483648, %v3277_v37 }
 0x16e   : > { %v2352_v52 = vpop.eup %2351  ;;  %v676_v2 = vmul.f32 %v675_v35, %v3080_v34  ;;  %v740_v43 = vmul.f32 %v739_v14, %v2960_v18  ;;  %v1016_v46 = vmul.f32 %v1015_v57, %v2941_v6  ;;  %vm948_vm10 = vweird.f32 %v2350_v3 }
 0x16f   : > { %v945_v30 = vmul.f32 %v2350_v3, %v944_v47  ;;  %v954_v59 = vor.u32 1.1754944e-38, %v953_v11  ;;  %v983_v49 = vmul.f32 %v2352_v52, %v3277_v37  ;;  %v1083_v24 = vadd.f32 1.0, %v2147_v40  ;;  %vm949_vm13 = vmor %vm947_vm8, %vm948_vm10 }
 0x170   : > { %v2148_v51 = vclamps-f32 %v676_v2, 1.0  ;;  %vm987_vm11 = vweird.f32 %v3277_v37  ;;  %v3316_v56 = vadd.f32 1.0, %v740_v43  ;;  %vm3318_vm12 = vcmp.eq.f32.partialorder %v991_v8, 8.507059e+37 }
 0x171   : > { %v946_v12 = vadd.f32 %v2350_v3, %v945_v30  ;;  %v984_v29 = vsub.f32 1.0, %v983_v49  ;;  %v1017_v18 = vadd.f32 0.112945676, %v1016_v46  ;;  %v994_v33 = vor.u32 1.1754944e-38, %v993_v9  ;;  %v3994_v9 = vld [vmem:[#allocation21_spill] sm:$0xff]  ;;  %v3995_v46 = vld [vmem:[#allocation24_spill] sm:$0xff] }
 0x172   : > { %v2354_v22 = vpop.eup %2353  ;;  %v1084_v7 = vadd.f32 1.0, %v2148_v51  ;;  %2355 = vrcp.f32 %v3316_v56  ;;  %v1053_v39 = vadd.f32 0.001143296, %v1052_v41  ;;  %vm988_vm14 = vweird.f32 %v2352_v52  ;;  %v3996_v51 = vld [vmem:[#allocation19_spill] sm:$0xff] }
 0x173   : > { %v950_v54 = vsel %vm949_vm13, %v2350_v3, %v946_v12  ;;  %v985_v63 = vmul.f32 %v2352_v52, %v984_v29  ;;  %v703_v1 = vmul.f32 %v2354_v22, %v3291_v4  ;;  %v1099_v25 = vmul.f32 %v1083_v24, %v2963_v31  ;;  %vm989_vm15 = vmor %vm987_vm11, %vm988_vm14 }
 0x174   : > { %v1100_v42 = vmul.f32 %v1084_v7, %v3992_v58  ;;  %v955_v21 = vsel %vm3302_vm9, %v954_v59, %v950_v54  ;;  %v711_v53 = vand.u32 2147483647, %v3291_v4  ;;  %v1018_v15 = vmul.f32 %v1017_v18, %v2941_v6 }
 0x175   : > { %v956_v55 = vmul.f32 %v955_v21, %v3060_v20  ;;  %v986_v10 = vadd.f32 %v2352_v52, %v985_v63  ;;  %v704_v45 = vsub.f32 1.0, %v703_v1  ;;  %vm708_vm0 = vweird.f32 %v2354_v22 }
 0x176   : > { %v1113_v60 = vpack.c.bf16 %v1100_v42, %v1099_v25  ;;  %v713_v31 = vand.u32 2147483648, %v3291_v4  ;;  %v1054_v27 = vmul.f32 %v1053_v39, %v3003_v44  ;;  %v1019_v16 = vadd.f32 0.4994258, %v1018_v15  ;;  %v3997_v42 = vld [vmem:[#allocation13_spill] sm:$0xff] }
 0x177   : > { %v2155_v5 = vclamps-f32 %v956_v55, 1.0  ;;  %v990_v62 = vsel %vm989_vm15, %v2352_v52, %v986_v10  ;;  %v705_v23 = vmul.f32 %v2354_v22, %v704_v45  ;;  %v730_v20 = vadd.f32 1.1283791, %v3247_v38  ;;  %v3993_v52 = vld [vmem:[#allocation25_spill] sm:$0xff] }
 0x178   : > { %v2356_v13 = vpop.eup %2355  ;;  %1207 = vmatmul.bf16.gmra.mxu1 %v1113_v60  ;;  %v995_v26 = vsel %vm3318_vm12, %v994_v33, %v990_v62  ;;  %vm707_vm1 = vweird.f32 %v3291_v4  ;;  %v1055_v37 = vadd.f32 0.014752088, %v1054_v27  ;;  %vm712_vm2 = vcmp.eq.f32.partialorder %v711_v53, 8.507059e+37  ;;  %v3998_v53 = vld [vmem:[#allocation17_spill] sm:$0xff] }
 0x179   : > { %v996_v3 = vmul.f32 %v995_v26, %v3240_v28  ;;  %v706_v50 = vadd.f32 %v2354_v22, %v705_v23  ;;  %v743_v32 = vmul.f32 %v2356_v13, %v3316_v56  ;;  %vm709_vm3 = vmor %vm707_vm1, %vm708_vm0  ;;  %v714_v14 = vor.u32 1.1754944e-38, %v713_v31 }
 0x17a   : > { %v751_v57 = vand.u32 2147483647, %v3316_v56  ;;  %v1020_v38 = vmul.f32 %v1019_v16, %v2941_v6  ;;  %v1056_v36 = vmul.f32 %v1055_v37, %v3003_v44  ;;  %v1091_v11 = vadd.f32 1.0, %v2155_v5 }
 0x17b   : > { %v2156_v48 = vclamps-f32 %v996_v3, 1.0  ;;  %v710_v41 = vsel %vm709_vm3, %v2354_v22, %v706_v50  ;;  %v744_v4 = vsub.f32 1.0, %v743_v32  ;;  %v753_v28 = vand.u32 2147483648, %v3316_v56 }
 0x17c   : > { %v715_v0 = vsel %vm712_vm2, %v714_v14, %v710_v41  ;;  %v1021_v19 = vadd.f32 1.0, %v1020_v38  ;;  %v1057_v40 = vadd.f32 0.112945676, %v1056_v36  ;;  %vm748_vm4 = vweird.f32 %v2356_v13  ;;  %v3999_v14 = vld [vmem:[#allocation18_spill] sm:$0xff] }
 0x17d   : > { %v1092_v35 = vadd.f32 1.0, %v2156_v48  ;;  %v716_v47 = vmul.f32 %v715_v0, %v3244_v61  ;;  %v745_v8 = vmul.f32 %v2356_v13, %v744_v4  ;;  %v1007_v2 = vmul.f32 %v3993_v52, %v2941_v6 }
 0x17e   : > { %vm747_vm5 = vweird.f32 %v3316_v56  ;;  %2357 = vrcp.f32 %v1021_v19  ;;  %v1107_v43 = vmul.f32 %v1091_v11, %v3994_v9  ;;  %v1058_v49 = vmul.f32 %v1057_v40, %v3003_v44  ;;  %v4001_v9 = vld [vmem:[#allocation16_spill] sm:$0xff] }
 0x17f   : > { %v1108_v30 = vmul.f32 %v1092_v35, %v3995_v46  ;;  %v746_v59 = vadd.f32 %v2356_v13, %v745_v8  ;;  %v731_v24 = vmul.f32 %v730_v20, %v3996_v51  ;;  %v1046_v12 = vadd.f32 0.05243302, %v3251_v17  ;;  %vm749_vm6 = vmor %vm747_vm5, %vm748_vm4  ;;  %v4002_v46 = vld [vmem:[#allocation20_spill] sm:$0xff] }
 0x180   : > { %vm752_vm7 = vcmp.eq.f32.partialorder %v751_v57, 8.507059e+37  ;;  %v754_v61 = vor.u32 1.1754944e-38, %v753_v28  ;;  %v2149_v34 = vclamps-f32 %v716_v47, 1.0  ;;  %v1059_v22 = vadd.f32 0.4994258, %v1058_v49 }
 0x181   : > { %v1117_v29 = vpack.c.bf16 %v1108_v30, %v1107_v43  ;;  %v750_v18 = vsel %vm749_vm6, %v2356_v13, %v746_v59  ;;  %v1008_v54 = vadd.f32 0.18741608, %v1007_v2  ;;  %v1047_v63 = vmul.f32 %v1046_v12, %v3003_v44  ;;  %v3367_v12 = vld [vmem:[#allocation7 + $0x1] ss:$0 sm:$0xff] }
 0x182   : > { %v755_v56 = vsel %vm752_vm7, %v754_v61, %v750_v18  ;;  %v1060_v33 = vmul.f32 %v1059_v22, %v3003_v44  ;;  %v1085_v25 = vadd.f32 1.0, %v2149_v34  ;;  %v413_v21 = vmul.f32 0.5, %v3997_v42 }
 0x183   : > { %1227 = vmatmul.bf16.gmra.mxu3 %v1117_v29  ;;  %v756_v7 = vmul.f32 %v755_v56, %v731_v24  ;;  %v414_v55 = vmul.f32 0.5, %v3998_v53  ;;  %v1009_v15 = vmul.f32 %v1008_v54, %v2941_v6  ;;  %v1048_v60 = vadd.f32 0.18741608, %v1047_v63 }
 0x184   : > { %v2358_v39 = vpop.eup %2357  ;;  %v1061_v17 = vadd.f32 1.0, %v1060_v33  ;;  %v1033_v31 = vand.u32 2147483648, %v1021_v19  ;;  %v1101_v27 = vmul.f32 %v1085_v25, %v413_v21  ;;  %v1031_v23 = vand.u32 2147483647, %v1021_v19 }
 0x185   : > { %v2150_v1 = vclamps-f32 %v756_v7, 1.0  ;;  %v1023_v58 = vmul.f32 %v2358_v39, %v1021_v19  ;;  %vm1028_vm8 = vweird.f32 %v2358_v39  ;;  %vm1027_vm9 = vweird.f32 %v1021_v19 }
 0x186   : > { %2359 = vrcp.f32 %v1061_v17  ;;  %v1010_v20 = vadd.f32 1.1283791, %v1009_v15  ;;  %vm1029_vm10 = vmor %vm1027_vm9, %vm1028_vm8  ;;  %v1049_v37 = vmul.f32 %v1048_v60, %v3003_v44  ;;  %v1034_v50 = vor.u32 1.1754944e-38, %v1033_v31  ;;  %v4000_v44 = vld [vmem:[#allocation22_spill] sm:$0xff] }
 0x187   : > { %v1086_v10 = vadd.f32 1.0, %v2150_v1  ;;  %v1024_v45 = vsub.f32 1.0, %v1023_v58  ;;  %vm1032_vm11 = vcmp.eq.f32.partialorder %v1031_v23, 8.507059e+37  ;;  %v1073_v48 = vand.u32 2147483648, %v1061_v17 }
 0x188   : > { %v1011_v57 = vmul.f32 %v1010_v20, %v3999_v14  ;;  %v1050_v36 = vadd.f32 1.1283791, %v1049_v37  ;;  %v1071_v4 = vand.u32 2147483647, %v1061_v17  ;;  %vm1067_vm13 = vweird.f32 %v1061_v17 }
 0x189   : > { %v1102_v5 = vmul.f32 %v1086_v10, %v414_v55  ;;  %v1025_v62 = vmul.f32 %v2358_v39, %v1024_v45  ;;  %v1074_v28 = vor.u32 1.1754944e-38, %v1073_v48  ;;  %v421_v43 = vmul.f32 0.5, %v4001_v9 }
 0x18a   : > { %v1051_v19 = vmul.f32 %v1050_v36, %v4000_v44  ;;  %vm1072_vm15 = vcmp.eq.f32.partialorder %v1071_v4, 8.507059e+37  ;;  %v422_v30 = vmul.f32 0.5, %v4002_v46 }
 0x18b   : > { %v1114_v16 = vpack.c.bf16 %v1102_v5, %v1101_v27  ;;  %v1026_v13 = vadd.f32 %v2358_v39, %v1025_v62 }
 0x18c   : > { %v2360_v26 = vpop.eup %2359 }
 0x18d   : > { %1212 = vmatmul.bf16.gmra.mxu1 %v1114_v16  ;;  %v1030_v3 = vsel %vm1029_vm10, %v2358_v39, %v1026_v13  ;;  %v1063_v6 = vmul.f32 %v2360_v26, %v1061_v17  ;;  %vm1068_vm12 = vweird.f32 %v2360_v26 }
 0x18e   : > { %v1035_v32 = vsel %vm1032_vm11, %v1034_v50, %v1030_v3  ;;  %vm1069_vm14 = vmor %vm1067_vm13, %vm1068_vm12 }
 0x18f   : > { %v1064_v38 = vsub.f32 1.0, %v1063_v6  ;;  %v1036_v11 = vmul.f32 %v1035_v32, %v1011_v57 }
 0x191   : > { %v1065_v41 = vmul.f32 %v2360_v26, %v1064_v38  ;;  %v2157_v40 = vclamps-f32 %v1036_v11, 1.0 }
 0x193   : > { %v1066_v0 = vadd.f32 %v2360_v26, %v1065_v41  ;;  %v1093_v2 = vadd.f32 1.0, %v2157_v40 }
 0x195   : > { %v1070_v35 = vsel %vm1069_vm14, %v2360_v26, %v1066_v0  ;;  %v1109_v49 = vmul.f32 %v1093_v2, %v421_v43 }
 0x196   : > { %v1075_v47 = vsel %vm1072_vm15, %v1074_v28, %v1070_v35 }
 0x197   : > { %v1076_v8 = vmul.f32 %v1075_v47, %v1051_v19 }
 0x199   : > { %v2158_v52 = vclamps-f32 %v1076_v8, 1.0 }
 0x19b   : > { %v1094_v59 = vadd.f32 1.0, %v2158_v52 }
 0x19d   : > { %v1110_v51 = vmul.f32 %v1094_v59, %v422_v30 }
 0x19f   : > { %v1118_v24 = vpack.c.bf16 %v1110_v51, %v1109_v49 }
 0x1a1   : > { %1232 = vmatmul.bf16.gmra.mxu3 %v1118_v24 }
 0x1c3   : > { %v1198_v61 = vpop.f32.mrf.mxu1 }
 0x1c4   : > { %v3370_v29 = vadd.f32 %v3367_v12, %v1198_v61 }
 0x1c6   : > { %v3373_v34 = vmul.f32 0.70710677, %v3370_v29 }
 0x1c8   : > { %v1270_v18 = vmul.f32 %v3373_v34, %v3373_v34 }
 0x1ca   : > { %v1271_v22 = vmin.f32 %v1270_v18, 16.0 }
 0x1cb   : > { %v1200_v1 = vpop.f32.mrf.mxu1 }
 0x1cc   : > { %v1272_v56 = vmul.f32 2.1237322e-06, %v1271_v22  ;;  %v1283_v7 = vmul.f32 3.8918573e-05, %v1271_v22  ;;  %v3378_v17 = vadd.f32 %v3367_v12, %v1200_v1 }
 0x1ce   : > { %v1273_v33 = vadd.f32 0.00028619796, %v1272_v56  ;;  %v1284_v39 = vadd.f32 0.001143296, %v1283_v7  ;;  %v3381_v53 = vmul.f32 0.70710677, %v3378_v17 }
 0x1d0   : > { %v1274_v54 = vmul.f32 %v1273_v33, %v1271_v22  ;;  %v1285_v63 = vmul.f32 %v1284_v39, %v1271_v22  ;;  %v1310_v15 = vmul.f32 %v3381_v53, %v3381_v53 }
 0x1d2   : > { %v1275_v25 = vadd.f32 0.0036580483, %v1274_v54  ;;  %v1286_v58 = vadd.f32 0.014752088, %v1285_v63  ;;  %v1218_v55 = vpop.f32.mrf.mxu3  ;;  %v3388_v5 = vmin.f32 %v1310_v15, 16.0 }
 0x1d3   : > { %v3386_v60 = vadd.f32 %v3367_v12, %v1218_v55  ;;  %v1203_v23 = vpop.f32.mrf.mxu1 }
 0x1d4   : > { %v1276_v42 = vmul.f32 %v1275_v25, %v1271_v22  ;;  %v1287_v21 = vmul.f32 %v1286_v58, %v1271_v22  ;;  %v1312_v20 = vmul.f32 2.1237322e-06, %v3388_v5  ;;  %v3395_v26 = vadd.f32 %v3367_v12, %v1203_v23 }
 0x1d5   : > { %v3391_v62 = vmul.f32 0.70710677, %v3386_v60  ;;  %v1323_v37 = vmul.f32 3.8918573e-05, %v3388_v5 }
 0x1d6   : > { %v1277_v10 = vadd.f32 0.05243302, %v1276_v42  ;;  %v1288_v45 = vadd.f32 0.112945676, %v1287_v21  ;;  %v1313_v32 = vadd.f32 0.00028619796, %v1312_v20 }
 0x1d7   : > { %v1590_v3 = vmul.f32 %v3391_v62, %v3391_v62  ;;  %v1324_v14 = vadd.f32 0.001143296, %v1323_v37  ;;  %v3403_v38 = vmul.f32 0.70710677, %v3395_v26 }
 0x1d8   : > { %v1278_v31 = vmul.f32 %v1277_v10, %v1271_v22  ;;  %v1289_v27 = vmul.f32 %v1288_v45, %v1271_v22  ;;  %v1314_v11 = vmul.f32 %v1313_v32, %v3388_v5 }
 0x1d9   : > { %v3400_v57 = vmin.f32 %v1590_v3, 16.0  ;;  %v1325_v41 = vmul.f32 %v1324_v14, %v3388_v5  ;;  %v1350_v28 = vmul.f32 %v3403_v38, %v3403_v38 }
 0x1da   : > { %v1279_v16 = vadd.f32 0.18741608, %v1278_v31  ;;  %v1290_v13 = vadd.f32 0.4994258, %v1289_v27  ;;  %v1220_v36 = vpop.f32.mrf.mxu3  ;;  %v1315_v40 = vadd.f32 0.0036580483, %v1314_v11 }
 0x1db   : > { %v1592_v4 = vmul.f32 2.1237322e-06, %v3400_v57  ;;  %v1603_v0 = vmul.f32 3.8918573e-05, %v3400_v57  ;;  %v3415_v19 = vadd.f32 %v3367_v12, %v1220_v36  ;;  %v1326_v35 = vadd.f32 0.014752088, %v1325_v41 }
 0x1dc   : > { %v1280_v50 = vmul.f32 %v1279_v16, %v1271_v22  ;;  %v1291_v6 = vmul.f32 %v1290_v13, %v1271_v22  ;;  %v3417_v47 = vmin.f32 %v1350_v28, 16.0  ;;  %v1316_v43 = vmul.f32 %v1315_v40, %v3388_v5 }
 0x1dd   : > { %v1593_v52 = vadd.f32 0.00028619796, %v1592_v4  ;;  %v1604_v2 = vadd.f32 0.001143296, %v1603_v0  ;;  %v1327_v46 = vmul.f32 %v1326_v35, %v3388_v5  ;;  %v3428_v24 = vmul.f32 0.70710677, %v3415_v19 }
 0x1de   : > { %v3405_v48 = vadd.f32 1.0, %v1291_v6  ;;  %v1281_v44 = vadd.f32 1.1283791, %v1280_v50  ;;  %v1352_v30 = vmul.f32 2.1237322e-06, %v3417_v47 }
 0x1df   : > { %v1594_v59 = vmul.f32 %v1593_v52, %v3400_v57  ;;  %v1605_v49 = vmul.f32 %v1604_v2, %v3400_v57  ;;  %v1363_v51 = vmul.f32 3.8918573e-05, %v3417_v47  ;;  %v1317_v61 = vadd.f32 0.05243302, %v1316_v43 }
 0x1e0   : > { %2361 = vrcp.f32 %v3405_v48  ;;  %v1302_v8 = vand.u32 2147483647, %v3405_v48  ;;  %v1304_v9 = vand.u32 2147483648, %v3405_v48  ;;  %v1328_v18 = vadd.f32 0.112945676, %v1327_v46 }
 0x1e1   : > { %v1353_v22 = vadd.f32 0.00028619796, %v1352_v30  ;;  %v1595_v7 = vadd.f32 0.0036580483, %v1594_v59  ;;  %v1606_v33 = vadd.f32 0.014752088, %v1605_v49  ;;  %v1630_v54 = vmul.f32 %v3428_v24, %v3428_v24  ;;  %v1205_v49 = vpop.f32.mrf.mxu1 }
 0x1e2   : > { %v1364_v39 = vadd.f32 0.001143296, %v1363_v51  ;;  %v1305_v1 = vor.u32 1.1754944e-38, %v1304_v9  ;;  %v1318_v25 = vmul.f32 %v1317_v61, %v3388_v5  ;;  %v1329_v58 = vmul.f32 %v1328_v18, %v3388_v5 }
 0x1e3   : > { %v1596_v42 = vmul.f32 %v1595_v7, %v3400_v57  ;;  %v1607_v21 = vmul.f32 %v1606_v33, %v3400_v57  ;;  %v1354_v55 = vmul.f32 %v1353_v22, %v3417_v47  ;;  %v3439_v27 = vmin.f32 %v1630_v54, 16.0 }
 0x1e4   : > { %v1365_v10 = vmul.f32 %v1364_v39, %v3417_v47  ;;  %v1319_v15 = vadd.f32 0.18741608, %v1318_v25  ;;  %v1330_v31 = vadd.f32 0.4994258, %v1329_v58  ;;  %vm1298_vm0 = vweird.f32 %v3405_v48 }
 0x1e5   : > { %v1597_v23 = vadd.f32 0.05243302, %v1596_v42  ;;  %v1608_v16 = vadd.f32 0.112945676, %v1607_v21  ;;  %v1355_v13 = vadd.f32 0.0036580483, %v1354_v55 }
 0x1e6   : > { %v2362_v56 = vpop.eup %2361  ;;  %v1331_v37 = vmul.f32 %v1330_v31, %v3388_v5  ;;  %v1366_v3 = vadd.f32 0.014752088, %v1365_v10  ;;  %v1320_v50 = vmul.f32 %v1319_v15, %v3388_v5  ;;  %v1632_v4 = vmul.f32 2.1237322e-06, %v3439_v27 }
 0x1e7   : > { %v1294_v63 = vmul.f32 %v2362_v56, %v3405_v48  ;;  %vm1299_vm1 = vweird.f32 %v2362_v56  ;;  %v1598_v6 = vmul.f32 %v1597_v23, %v3400_v57  ;;  %v1609_v32 = vmul.f32 %v1608_v16, %v3400_v57 }
 0x1e8   : > { %v1356_v14 = vmul.f32 %v1355_v13, %v3417_v47  ;;  %v3447_v11 = vadd.f32 1.0, %v1331_v37  ;;  %v1367_v41 = vmul.f32 %v1366_v3, %v3417_v47  ;;  %vm1300_vm2 = vmor %vm1298_vm0, %vm1299_vm1  ;;  %v1282_v5 = vmul.f32 %v1281_v44, %v3373_v34 }
 0x1e9   : > { %v1295_v45 = vsub.f32 1.0, %v1294_v63  ;;  %v1599_v0 = vadd.f32 0.18741608, %v1598_v6  ;;  %v1610_v28 = vadd.f32 0.4994258, %v1609_v32  ;;  %vm1303_vm3 = vcmp.eq.f32.partialorder %v1302_v8, 8.507059e+37 }
 0x1ea   : > { %v1357_v40 = vadd.f32 0.05243302, %v1356_v14  ;;  %2363 = vrcp.f32 %v3447_v11  ;;  %v1238_v52 = vmul.f32 0.5, %v3370_v29  ;;  %v3457_v9 = vmul.f32 0.5, %v3378_v17  ;;  %v1223_v51 = vpop.f32.mrf.mxu3 }
 0x1eb   : > { %v1296_v20 = vmul.f32 %v2362_v56, %v1295_v45  ;;  %v1321_v43 = vadd.f32 1.1283791, %v1320_v50  ;;  %v1611_v48 = vmul.f32 %v1610_v28, %v3400_v57  ;;  %v1368_v59 = vadd.f32 0.112945676, %v1367_v41 }
 0x1ec   : > { %v1358_v30 = vmul.f32 %v1357_v40, %v3417_v47  ;;  %v1342_v34 = vand.u32 2147483647, %v3447_v11  ;;  %v3463_v44 = vmul.f32 0.5, %v3386_v60  ;;  %v1600_v8 = vmul.f32 %v1599_v0, %v3400_v57 }
 0x1ed   : > { %v1297_v36 = vadd.f32 %v2362_v56, %v1296_v20  ;;  %v1633_v29 = vadd.f32 0.00028619796, %v1632_v4  ;;  %v3467_v61 = vadd.f32 1.0, %v1611_v48  ;;  %v1369_v22 = vmul.f32 %v1368_v59, %v3417_v47 }
 0x1ee   : > { %v1359_v18 = vadd.f32 0.18741608, %v1358_v30  ;;  %v1643_v33 = vmul.f32 3.8918573e-05, %v3439_v27  ;;  %v3474_v60 = vadd.f32 %v3367_v12, %v1205_v49  ;;  %v1322_v54 = vmul.f32 %v1321_v43, %v3381_v53 }
 0x1ef   : > { %v1301_v35 = vsel %vm1300_vm2, %v2362_v56, %v1297_v36  ;;  %v1344_v56 = vand.u32 2147483648, %v3447_v11  ;;  %v1634_v7 = vmul.f32 %v1633_v29, %v3439_v27  ;;  %2365 = vrcp.f32 %v3467_v61 }
 0x1f0   : > { %v1306_v2 = vsel %vm1303_vm3, %v1305_v1, %v1301_v35  ;;  %v2364_v39 = vpop.eup %2363  ;;  %v3479_v63 = vadd.f32 %v3367_v12, %v1223_v51  ;;  %vm1338_vm4 = vweird.f32 %v3447_v11  ;;  %vm3483_vm5 = vcmp.eq.f32.partialorder %v1342_v34, 8.507059e+37 }
 0x1f1   : > { %v1307_v46 = vmul.f32 %v1306_v2, %v1282_v5  ;;  %v1334_v1 = vmul.f32 %v2364_v39, %v3447_v11  ;;  %v1360_v58 = vmul.f32 %v1359_v18, %v3417_v47  ;;  %v1601_v21 = vadd.f32 1.1283791, %v1600_v8 }
 0x1f2   : > { %v1370_v55 = vadd.f32 0.4994258, %v1369_v22  ;;  %v1635_v10 = vadd.f32 0.0036580483, %v1634_v7  ;;  %v1345_v45 = vor.u32 1.1754944e-38, %v1344_v56  ;;  %v1624_v23 = vand.u32 2147483648, %v3467_v61 }
 0x1f3   : > { %v2191_v17 = vclamps-f32 %v1307_v46, 1.0  ;;  %v1335_v53 = vsub.f32 1.0, %v1334_v1  ;;  %v1622_v15 = vand.u32 2147483647, %v3467_v61  ;;  %v1644_v31 = vadd.f32 0.001143296, %v1643_v33 }
 0x1f4   : > { %v1371_v16 = vmul.f32 %v1370_v55, %v3417_v47  ;;  %v1636_v13 = vmul.f32 %v1635_v10, %v3439_v27  ;;  %v3496_v20 = vmul.f32 0.70710677, %v3474_v60  ;;  %vm1339_vm6 = vweird.f32 %v2364_v39 }
 0x1f5   : > { %v1910_v57 = vadd.f32 1.0, %v2191_v17  ;;  %v1336_v37 = vmul.f32 %v2364_v39, %v1335_v53  ;;  %v1361_v3 = vadd.f32 1.1283791, %v1360_v58  ;;  %v1645_v50 = vmul.f32 %v1644_v31, %v3439_v27  ;;  %v2366_v6 = vpop.eup %2365  ;;  %v1208_v28 = vpop.f32.mrf.mxu1  ;;  %vm1340_vm9 = vmor %vm1338_vm4, %vm1339_vm6 }
 0x1f6   : > { %v1602_v32 = vmul.f32 %v1601_v21, %v3391_v62  ;;  %vm1618_vm7 = vweird.f32 %v3467_v61  ;;  %v3501_v14 = vadd.f32 1.0, %v1371_v16  ;;  %v1390_v47 = vmul.f32 %v3496_v20, %v3496_v20 }
 0x1f7   : > { %v1926_v42 = vmul.f32 %v1910_v57, %v1238_v52  ;;  %v1337_v36 = vadd.f32 %v2364_v39, %v1336_v37  ;;  %v1614_v41 = vmul.f32 %v2366_v6, %v3467_v61  ;;  %vm3506_vm8 = vcmp.eq.f32.partialorder %v1622_v15, 8.507059e+37 }
 0x1f8   : > { %v1646_v0 = vadd.f32 0.014752088, %v1645_v50  ;;  %v1625_v62 = vor.u32 1.1754944e-38, %v1624_v23  ;;  %2367 = vrcp.f32 %v3501_v14  ;;  %v1637_v40 = vadd.f32 0.05243302, %v1636_v13 }
 0x1f9   : > { %1942 = vst [vmem:[%s3489_s23] sm:$0xff] %v1926_v42  ;;  %v3514_v5 = vmul.f32 0.70710677, %v3479_v63  ;;  %v1341_v35 = vsel %vm1340_vm9, %v2364_v39, %v1337_v36  ;;  %v1615_v52 = vsub.f32 1.0, %v1614_v41  ;;  %v3517_v2 = vmul.f32 %v1361_v3, %v3403_v38 }
 0x1fa   : > { %v1647_v43 = vmul.f32 %v1646_v0, %v3439_v27  ;;  %v1346_v46 = vsel %vm3483_vm5, %v1345_v45, %v1341_v35  ;;  %vm1619_vm10 = vweird.f32 %v2366_v6  ;;  %v3522_v11 = vmin.f32 %v1390_v47, 16.0 }
 0x1fb   : > { %v3525_v48 = vadd.f32 %v3367_v12, %v1208_v28  ;;  %v1347_v30 = vmul.f32 %v1346_v46, %v1322_v54  ;;  %v1616_v59 = vmul.f32 %v2366_v6, %v1615_v52  ;;  %v1382_v49 = vand.u32 2147483647, %v3501_v14  ;;  %vm1620_vm12 = vmor %vm1618_vm7, %vm1619_vm10 }
 0x1fc   : > { %v1648_v34 = vadd.f32 0.112945676, %v1647_v43  ;;  %v1638_v8 = vmul.f32 %v1637_v40, %v3439_v27  ;;  %v1392_v38 = vmul.f32 2.1237322e-06, %v3522_v11  ;;  %v1403_v29 = vmul.f32 3.8918573e-05, %v3522_v11 }
 0x1fd   : > { %v1670_v51 = vmul.f32 %v3514_v5, %v3514_v5  ;;  %v2192_v17 = vclamps-f32 %v1347_v30, 1.0  ;;  %v1617_v18 = vadd.f32 %v2366_v6, %v1616_v59  ;;  %vm1378_vm11 = vweird.f32 %v3501_v14 }
 0x1fe   : > { %v1649_v22 = vmul.f32 %v1648_v34, %v3439_v27  ;;  %v2368_v56 = vpop.eup %2367  ;;  %v1384_v7 = vand.u32 2147483648, %v3501_v14  ;;  %v1393_v33 = vadd.f32 0.00028619796, %v1392_v38  ;;  %v1404_v39 = vadd.f32 0.001143296, %v1403_v29 }
 0x1ff   : > { %v3539_v57 = vmin.f32 %v1670_v51, 16.0  ;;  %v1911_v54 = vadd.f32 1.0, %v2192_v17  ;;  %v1621_v1 = vsel %vm1620_vm12, %v2366_v6, %v1617_v18  ;;  %v1374_v25 = vmul.f32 %v2368_v56, %v3501_v14  ;;  %v1225_v6 = vpop.f32.mrf.mxu3 }
 0x200   : > { %vm3542_vm13 = vcmp.eq.f32.partialorder %v1382_v49, 8.507059e+37  ;;  %v1626_v42 = vsel %vm3506_vm8, %v1625_v62, %v1621_v1  ;;  %v1639_v61 = vadd.f32 0.18741608, %v1638_v8  ;;  %v1650_v21 = vadd.f32 0.4994258, %v1649_v22 }
 0x201   : > { %v1394_v55 = vmul.f32 %v1393_v33, %v3522_v11  ;;  %v1927_v10 = vmul.f32 %v1911_v54, %v3457_v9  ;;  %v1627_v53 = vmul.f32 %v1626_v42, %v1602_v32  ;;  %v1375_v45 = vsub.f32 1.0, %v1374_v25 }
 0x202   : > { %v1405_v15 = vmul.f32 %v1404_v39, %v3522_v11  ;;  %vm1379_vm14 = vweird.f32 %v2368_v56  ;;  %v1651_v31 = vmul.f32 %v1650_v21, %v3439_v27  ;;  %v1672_v16 = vmul.f32 2.1237322e-06, %v3539_v57 }
 0x203   : > { %v1395_v23 = vadd.f32 0.0036580483, %v1394_v55  ;;  %1943 = vst [vmem:[%s3489_s23 + $0x8] sm:$0xff] %v1927_v10  ;;  %v2199_v13 = vclamps-f32 %v1627_v53, 1.0  ;;  %v1376_v37 = vmul.f32 %v2368_v56, %v1375_v45  ;;  %v1683_v50 = vmul.f32 3.8918573e-05, %v3539_v57  ;;  %vm1380_vm15 = vmor %vm1378_vm11, %vm1379_vm14 }
 0x204   : > { %v1406_v3 = vadd.f32 0.014752088, %v1405_v15  ;;  %v1385_v47 = vor.u32 1.1754944e-38, %v1384_v7  ;;  %v3555_v36 = vadd.f32 1.0, %v1651_v31  ;;  %v1673_v32 = vadd.f32 0.00028619796, %v1672_v16 }
 0x205   : > { %v1396_v9 = vmul.f32 %v1395_v23, %v3522_v11  ;;  %v1918_v41 = vadd.f32 1.0, %v2199_v13  ;;  %v1377_v4 = vadd.f32 %v2368_v56, %v1376_v37  ;;  %v1684_v28 = vadd.f32 0.001143296, %v1683_v50 }
 0x206   : > { %v1407_v0 = vmul.f32 %v1406_v3, %v3522_v11  ;;  %v1640_v62 = vmul.f32 %v1639_v61, %v3439_v27  ;;  %2369 = vrcp.f32 %v3555_v36  ;;  %v3565_v40 = vmul.f32 0.70710677, %v3525_v48 }
 0x207   : > { %v3568_v35 = vadd.f32 %v3367_v12, %v1225_v6  ;;  %v1934_v52 = vmul.f32 %v1918_v41, %v3463_v44  ;;  %v1381_v43 = vsel %vm1380_vm15, %v2368_v56, %v1377_v4  ;;  %v1397_v46 = vadd.f32 0.05243302, %v1396_v9 }
 0x208   : > { %v1408_v30 = vadd.f32 0.112945676, %v1407_v0  ;;  %v1240_v59 = vmul.f32 0.5, %v3395_v26  ;;  %v1386_v14 = vsel %vm3542_vm13, %v1385_v47, %v1381_v43  ;;  %v1674_v27 = vmul.f32 %v1673_v32, %v3539_v57 }
 0x209   : > { %1950 = vst [vmem:[%s3489_s23 + $0x40] sm:$0xff] %v1934_v52  ;;  %v1387_v49 = vmul.f32 %v1386_v14, %v3517_v2  ;;  %v1398_v34 = vmul.f32 %v1397_v46, %v3522_v11  ;;  %v1685_v38 = vmul.f32 %v1684_v28, %v3539_v57  ;;  %v1641_v44 = vadd.f32 1.1283791, %v1640_v62 }
 0x20a   : > { %v1409_v8 = vmul.f32 %v1408_v30, %v3522_v11  ;;  %v1675_v29 = vadd.f32 0.0036580483, %v1674_v27  ;;  %v1430_v51 = vmul.f32 %v3565_v40, %v3565_v40  ;;  %v3583_v26 = vmul.f32 0.70710677, %v3568_v35 }
 0x20b   : > { %v2193_v17 = vclamps-f32 %v1387_v49, 1.0  ;;  %v3586_v18 = vmul.f32 0.5, %v3415_v19  ;;  %v1662_v2 = vand.u32 2147483647, %v3555_v36  ;;  %v1399_v7 = vadd.f32 0.18741608, %v1398_v34 }
 0x20c   : > { %v1410_v22 = vadd.f32 0.4994258, %v1409_v8  ;;  %v2370_v56 = vpop.eup %2369  ;;  %v1676_v33 = vmul.f32 %v1675_v29, %v3539_v57  ;;  %v1686_v39 = vadd.f32 0.014752088, %v1685_v38  ;;  %v3590_v54 = vmin.f32 %v1430_v51, 16.0 }
 0x20d   : > { %v1912_v1 = vadd.f32 1.0, %v2193_v17  ;;  %v1654_v25 = vmul.f32 %v2370_v56, %v3555_v36  ;;  %v1664_v58 = vand.u32 2147483648, %v3555_v36  ;;  %v1710_v19 = vmul.f32 %v3583_v26, %v3583_v26 }
 0x20e   : > { %v1411_v42 = vmul.f32 %v1410_v22, %v3522_v11  ;;  %v1677_v61 = vadd.f32 0.05243302, %v1676_v33  ;;  %v1687_v21 = vmul.f32 %v1686_v39, %v3539_v57  ;;  %v1432_v55 = vmul.f32 2.1237322e-06, %v3590_v54 }
 0x20f   : > { %v1928_v10 = vmul.f32 %v1912_v1, %v1240_v59  ;;  %v1655_v53 = vsub.f32 1.0, %v1654_v25  ;;  %vm1659_vm0 = vweird.f32 %v2370_v56  ;;  %v1443_v45 = vmul.f32 3.8918573e-05, %v3590_v54 }
 0x210   : > { %v1400_v15 = vmul.f32 %v1399_v7, %v3522_v11  ;;  %v3601_v31 = vadd.f32 1.0, %v1411_v42  ;;  %v1688_v23 = vadd.f32 0.112945676, %v1687_v21  ;;  %v1433_v16 = vadd.f32 0.00028619796, %v1432_v55 }
 0x211   : > { %1944 = vst [vmem:[%s3489_s23 + $0x10] sm:$0xff] %v1928_v10  ;;  %v1656_v13 = vmul.f32 %v2370_v56, %v1655_v53  ;;  %v1678_v37 = vmul.f32 %v1677_v61, %v3539_v57  ;;  %v1444_v3 = vadd.f32 0.001143296, %v1443_v45  ;;  %v3605_v50 = vmin.f32 %v1710_v19, 16.0 }
 0x212   : > { %v1642_v6 = vmul.f32 %v1641_v44, %v3428_v24  ;;  %vm1658_vm1 = vweird.f32 %v3555_v36  ;;  %v3610_v47 = vmul.f32 0.5, %v3474_v60  ;;  %2371 = vrcp.f32 %v3601_v31  ;;  %v1210_v36 = vpop.f32.mrf.mxu1 }
 0x213   : > { %v1657_v11 = vadd.f32 %v2370_v56, %v1656_v13  ;;  %vm1663_vm2 = vcmp.eq.f32.partialorder %v1662_v2, 8.507059e+37  ;;  %v1689_v9 = vmul.f32 %v1688_v23, %v3539_v57  ;;  %v1434_v32 = vmul.f32 %v1433_v16, %v3590_v54  ;;  %vm1660_vm3 = vmor %vm1658_vm1, %vm1659_vm0 }
 0x214   : > { %v1665_v41 = vor.u32 1.1754944e-38, %v1664_v58  ;;  %v1401_v4 = vadd.f32 1.1283791, %v1400_v15  ;;  %v1445_v0 = vmul.f32 %v1444_v3, %v3590_v54  ;;  %v1712_v24 = vmul.f32 2.1237322e-06, %v3605_v50 }
 0x215   : > { %v1661_v28 = vsel %vm1660_vm3, %v2370_v56, %v1657_v11  ;;  %v1679_v60 = vadd.f32 0.18741608, %v1678_v37  ;;  %v1690_v62 = vadd.f32 0.4994258, %v1689_v9  ;;  %v1435_v52 = vadd.f32 0.0036580483, %v1434_v32 }
 0x216   : > { %v1666_v43 = vsel %vm1663_vm2, %v1665_v41, %v1661_v28  ;;  %v1446_v46 = vadd.f32 0.014752088, %v1445_v0  ;;  %v1713_v30 = vadd.f32 0.00028619796, %v1712_v24  ;;  %v1723_v59 = vmul.f32 3.8918573e-05, %v3605_v50 }
 0x217   : > { %v1667_v14 = vmul.f32 %v1666_v43, %v1642_v6  ;;  %v1691_v27 = vmul.f32 %v1690_v62, %v3539_v57  ;;  %v1436_v49 = vmul.f32 %v1435_v52, %v3590_v54  ;;  %v3622_v34 = vadd.f32 %v3367_v12, %v1210_v36 }
 0x218   : > { %v2372_v8 = vpop.eup %2371  ;;  %v1402_v38 = vmul.f32 %v1401_v4, %v3496_v20  ;;  %v1447_v44 = vmul.f32 %v1446_v46, %v3590_v54  ;;  %v1714_v29 = vmul.f32 %v1713_v30, %v3605_v50  ;;  %v1724_v51 = vadd.f32 0.001143296, %v1723_v59  ;;  %v1228_v46 = vpop.f32.mrf.mxu3 }
 0x219   : > { %v2200_v17 = vclamps-f32 %v1667_v14, 1.0  ;;  %v1414_v2 = vmul.f32 %v2372_v8, %v3601_v31  ;;  %v1422_v22 = vand.u32 2147483647, %v3601_v31  ;;  %v1680_v56 = vmul.f32 %v1679_v60, %v3539_v57 }
 0x21a   : > { %v3630_v7 = vadd.f32 1.0, %v1691_v27  ;;  %v1437_v33 = vadd.f32 0.05243302, %v1436_v49  ;;  %v1448_v39 = vadd.f32 0.112945676, %v1447_v44  ;;  %v1725_v1 = vmul.f32 %v1724_v51, %v3605_v50  ;;  %v1213_v30 = vpop.f32.mrf.mxu1 }
 0x21b   : > { %v1919_v25 = vadd.f32 1.0, %v2200_v17  ;;  %v1415_v20 = vsub.f32 1.0, %v1414_v2  ;;  %v1715_v58 = vadd.f32 0.0036580483, %v1714_v29  ;;  %v3634_v19 = vmul.f32 0.70710677, %v3622_v34 }
 0x21c   : > { %vm1418_vm4 = vweird.f32 %v3601_v31  ;;  %vm1419_vm5 = vweird.f32 %v2372_v8  ;;  %v1424_v42 = vand.u32 2147483648, %v3601_v31  ;;  %2373 = vrcp.f32 %v3630_v7 }
 0x21d   : > { %v1935_v57 = vmul.f32 %v1919_v25, %v3586_v18  ;;  %v1416_v61 = vmul.f32 %v2372_v8, %v1415_v20  ;;  %v1438_v21 = vmul.f32 %v1437_v33, %v3590_v54  ;;  %v1449_v55 = vmul.f32 %v1448_v39, %v3590_v54  ;;  %vm1420_vm7 = vmor %vm1418_vm4, %vm1419_vm5 }
 0x21e   : > { %vm3642_vm6 = vcmp.eq.f32.partialorder %v1422_v22, 8.507059e+37  ;;  %v1681_v53 = vadd.f32 1.1283791, %v1680_v56  ;;  %v1716_v45 = vmul.f32 %v1715_v58, %v3605_v50  ;;  %v1726_v15 = vadd.f32 0.014752088, %v1725_v1 }
 0x21f   : > { %1951 = vst [vmem:[%s3489_s23 + $0x48] sm:$0xff] %v1935_v57  ;;  %v1417_v23 = vadd.f32 %v2372_v8, %v1416_v61  ;;  %v1702_v16 = vand.u32 2147483647, %v3630_v7  ;;  %v1450_v13 = vadd.f32 0.4994258, %v1449_v55  ;;  %v1470_v18 = vmul.f32 %v3634_v19, %v3634_v19 }
 0x220   : > { %v1425_v37 = vor.u32 1.1754944e-38, %v1424_v42  ;;  %v1439_v3 = vadd.f32 0.18741608, %v1438_v21  ;;  %v1717_v6 = vadd.f32 0.05243302, %v1716_v45  ;;  %v1727_v11 = vmul.f32 %v1726_v15, %v3605_v50 }
 0x221   : > { %v1421_v9 = vsel %vm1420_vm7, %v2372_v8, %v1417_v23  ;;  %v1704_v32 = vand.u32 2147483648, %v3630_v7  ;;  %v1451_v41 = vmul.f32 %v1450_v13, %v3590_v54  ;;  %v3657_v4 = vmin.f32 %v1470_v18, 16.0 }
 0x222   : > { %v2374_v0 = vpop.eup %2373  ;;  %v1426_v24 = vsel %vm3642_vm6, %v1425_v37, %v1421_v9  ;;  %v3662_v36 = vmul.f32 0.5, %v3479_v63  ;;  %v1718_v31 = vmul.f32 %v1717_v6, %v3605_v50  ;;  %v1728_v28 = vadd.f32 0.112945676, %v1727_v11 }
 0x223   : > { %v1427_v60 = vmul.f32 %v1426_v24, %v1402_v38  ;;  %v1682_v62 = vmul.f32 %v1681_v53, %v3514_v5  ;;  %v1694_v52 = vmul.f32 %v2374_v0, %v3630_v7  ;;  %vm3667_vm8 = vcmp.eq.f32.partialorder %v1702_v16, 8.507059e+37 }
 0x224   : > { %v1440_v59 = vmul.f32 %v1439_v3, %v3590_v54  ;;  %v3672_v14 = vadd.f32 1.0, %v1451_v41  ;;  %v1729_v63 = vmul.f32 %v1728_v28, %v3605_v50  ;;  %v1472_v27 = vmul.f32 2.1237322e-06, %v3657_v4 }
 0x225   : > { %v2194_v49 = vclamps-f32 %v1427_v60, 1.0  ;;  %v1695_v8 = vsub.f32 1.0, %v1694_v52  ;;  %v1705_v38 = vor.u32 1.1754944e-38, %v1704_v32  ;;  %v1483_v5 = vmul.f32 3.8918573e-05, %v3657_v4 }
 0x226   : > { %2375 = vrcp.f32 %v3672_v14  ;;  %v1719_v44 = vadd.f32 0.18741608, %v1718_v31  ;;  %v3679_v29 = vadd.f32 %v3367_v12, %v1228_v46  ;;  %v3682_v51 = vadd.f32 %v3367_v12, %v1213_v30 }
 0x227   : > { %v1913_v54 = vadd.f32 1.0, %v2194_v49  ;;  %v1696_v17 = vmul.f32 %v2374_v0, %v1695_v8  ;;  %vm1699_vm9 = vweird.f32 %v2374_v0  ;;  %v1730_v2 = vadd.f32 0.4994258, %v1729_v63 }
 0x228   : > { %vm1698_vm10 = vweird.f32 %v3630_v7  ;;  %v1441_v22 = vadd.f32 1.1283791, %v1440_v59  ;;  %v1473_v56 = vadd.f32 0.00028619796, %v1472_v27  ;;  %v1484_v33 = vadd.f32 0.001143296, %v1483_v5 }
 0x229   : > { %v1929_v39 = vmul.f32 %v1913_v54, %v3610_v47  ;;  %v1697_v1 = vadd.f32 %v2374_v0, %v1696_v17  ;;  %v1462_v25 = vand.u32 2147483647, %v3672_v14  ;;  %v1731_v20 = vmul.f32 %v1730_v2, %v3605_v50  ;;  %vm1700_vm11 = vmor %vm1698_vm10, %vm1699_vm9 }
 0x22a   : > { %v1720_v58 = vmul.f32 %v1719_v44, %v3605_v50  ;;  %v1474_v42 = vmul.f32 %v1473_v56, %v3657_v4  ;;  %v1485_v57 = vmul.f32 %v1484_v33, %v3657_v4  ;;  %v3692_v61 = vmul.f32 0.70710677, %v3679_v29 }
 0x22b   : > { %1945 = vst [vmem:[%s3489_s23 + $0x18] sm:$0xff] %v1929_v39  ;;  %v1701_v7 = vsel %vm1700_vm11, %v2374_v0, %v1697_v1  ;;  %v1464_v21 = vand.u32 2147483648, %v3672_v14  ;;  %v3696_v47 = vadd.f32 1.0, %v1731_v20  ;;  %v3699_v55 = vmul.f32 0.70710677, %v3682_v51 }
 0x22c   : > { %v2376_v10 = vpop.eup %2375  ;;  %v1706_v50 = vsel %vm3667_vm8, %v1705_v38, %v1701_v7  ;;  %v1475_v53 = vadd.f32 0.0036580483, %v1474_v42  ;;  %v1486_v45 = vadd.f32 0.014752088, %v1485_v57  ;;  %v1750_v15 = vmul.f32 %v3692_v61, %v3692_v61  ;;  %v1230_v42 = vpop.f32.mrf.mxu3 }
 0x22d   : > { %v1707_v23 = vmul.f32 %v1706_v50, %v1682_v62  ;;  %v3706_v16 = vmul.f32 0.5, %v3525_v48  ;;  %v1454_v13 = vmul.f32 %v2376_v10, %v3672_v14  ;;  %2377 = vrcp.f32 %v3696_v47 }
 0x22e   : > { %v1442_v18 = vmul.f32 %v1441_v22, %v3565_v40  ;;  %vm1458_vm12 = vweird.f32 %v3672_v14  ;;  %v1721_v37 = vadd.f32 1.1283791, %v1720_v58  ;;  %v1476_v3 = vmul.f32 %v1475_v53, %v3657_v4 }
 0x22f   : > { %v2201_v6 = vclamps-f32 %v1707_v23, 1.0  ;;  %v1455_v11 = vsub.f32 1.0, %v1454_v13  ;;  %v1487_v9 = vmul.f32 %v1486_v45, %v3657_v4  ;;  %v3714_v32 = vmin.f32 %v1750_v15, 16.0 }
 0x230   : > { %vm1459_vm13 = vweird.f32 %v2376_v10  ;;  %vm3716_vm14 = vcmp.eq.f32.partialorder %v1462_v25, 8.507059e+37  ;;  %v1465_v41 = vor.u32 1.1754944e-38, %v1464_v21  ;;  %v1510_v40 = vmul.f32 %v3699_v55, %v3699_v55 }
 0x231   : > { %v1920_v0 = vadd.f32 1.0, %v2201_v6  ;;  %v1456_v24 = vmul.f32 %v2376_v10, %v1455_v11  ;;  %v1488_v31 = vadd.f32 0.112945676, %v1487_v9  ;;  %v1752_v28 = vmul.f32 2.1237322e-06, %v3714_v32  ;;  %vm1460_vm15 = vmor %vm1458_vm12, %vm1459_vm13 }
 0x232   : > { %v1722_v60 = vmul.f32 %v1721_v37, %v3583_v26  ;;  %v1477_v62 = vadd.f32 0.05243302, %v1476_v3  ;;  %v1763_v52 = vmul.f32 3.8918573e-05, %v3714_v32  ;;  %v3725_v43 = vmin.f32 %v1510_v40, 16.0 }
 0x233   : > { %v2378_v46 = vpop.eup %2377  ;;  %v1936_v30 = vmul.f32 %v1920_v0, %v3662_v36  ;;  %v1457_v59 = vadd.f32 %v2376_v10, %v1456_v24  ;;  %v1489_v63 = vmul.f32 %v1488_v31, %v3657_v4  ;;  %v1753_v27 = vadd.f32 0.00028619796, %v1752_v28 }
 0x234   : > { %v1734_v49 = vmul.f32 %v2378_v46, %v3696_v47  ;;  %v1742_v26 = vand.u32 2147483647, %v3696_v47  ;;  %v1744_v8 = vand.u32 2147483648, %v3696_v47  ;;  %v1764_v38 = vadd.f32 0.001143296, %v1763_v52 }
 0x235   : > { %1952 = vst [vmem:[%s3489_s23 + $0x50] sm:$0xff] %v1936_v30  ;;  %v1461_v5 = vsel %vm1460_vm15, %v2376_v10, %v1457_v59  ;;  %v1490_v44 = vadd.f32 0.4994258, %v1489_v63  ;;  %v1754_v36 = vmul.f32 %v1753_v27, %v3714_v32  ;;  %v1512_v54 = vmul.f32 2.1237322e-06, %v3725_v43  ;;  %v1215_v27 = vpop.f32.mrf.mxu1 }
 0x236   : > { %v1466_v17 = vsel %vm3716_vm14, %v1465_v41, %v1461_v5  ;;  %v1735_v2 = vsub.f32 1.0, %v1734_v49  ;;  %v1478_v14 = vmul.f32 %v1477_v62, %v3657_v4  ;;  %v1765_v22 = vmul.f32 %v1764_v38, %v3714_v32 }
 0x237   : > { %v1467_v56 = vmul.f32 %v1466_v17, %v1442_v18  ;;  %vm1739_vm0 = vweird.f32 %v2378_v46  ;;  %v1491_v33 = vmul.f32 %v1490_v44, %v3657_v4  ;;  %v1513_v39 = vadd.f32 0.00028619796, %v1512_v54 }
 0x238   : > { %v1736_v1 = vmul.f32 %v2378_v46, %v1735_v2  ;;  %v1755_v25 = vadd.f32 0.0036580483, %v1754_v36  ;;  %v1766_v20 = vadd.f32 0.014752088, %v1765_v22  ;;  %v1523_v58 = vmul.f32 3.8918573e-05, %v3725_v43  ;;  %v1233_v36 = vpop.f32.mrf.mxu3 }
 0x239   : > { %v2195_v57 = vclamps-f32 %v1467_v56, 1.0  ;;  %vm1738_vm1 = vweird.f32 %v3696_v47  ;;  %v3745_v7 = vadd.f32 1.0, %v1491_v33  ;;  %v1514_v21 = vmul.f32 %v1513_v39, %v3725_v43 }
 0x23a   : > { %v1737_v10 = vadd.f32 %v2378_v46, %v1736_v1  ;;  %v1745_v50 = vor.u32 1.1754944e-38, %v1744_v8  ;;  %v1479_v53 = vadd.f32 0.18741608, %v1478_v14  ;;  %v1767_v45 = vmul.f32 %v1766_v20, %v3714_v32  ;;  %vm1740_vm2 = vmor %vm1738_vm1, %vm1739_vm0  ;;  %v3789_v1 = vld [vmem:[#allocation7 + $0x1] ss:$0 sm:$0xff] }
 0x23b   : > { %v1914_v15 = vadd.f32 1.0, %v2195_v57  ;;  %2379 = vrcp.f32 %v3745_v7  ;;  %v1524_v23 = vadd.f32 0.001143296, %v1523_v58  ;;  %v3752_v13 = vadd.f32 %v3367_v12, %v1230_v42 }
 0x23c   : > { %v1741_v47 = vsel %vm1740_vm2, %v2378_v46, %v1737_v10  ;;  %vm1743_vm3 = vcmp.eq.f32.partialorder %v1742_v26, 8.507059e+37  ;;  %v1756_v18 = vmul.f32 %v1755_v25, %v3714_v32  ;;  %v1768_v37 = vadd.f32 0.112945676, %v1767_v45 }
 0x23d   : > { %v1930_v3 = vmul.f32 %v1914_v15, %v3706_v16  ;;  %v1746_v6 = vsel %vm1743_vm3, %v1745_v50, %v1741_v47  ;;  %v1515_v11 = vadd.f32 0.0036580483, %v1514_v21  ;;  %v1480_v48 = vmul.f32 %v1479_v53, %v3657_v4 }
 0x23e   : > { %v1747_v9 = vmul.f32 %v1746_v6, %v1722_v60  ;;  %v1769_v41 = vmul.f32 %v1768_v37, %v3714_v32  ;;  %v1525_v40 = vmul.f32 %v1524_v23, %v3725_v43  ;;  %v3761_v0 = vmul.f32 0.70710677, %v3752_v13 }
 0x23f   : > { %1946 = vst [vmem:[%s3489_s23 + $0x20] sm:$0xff] %v1930_v3  ;;  %v1757_v31 = vadd.f32 0.05243302, %v1756_v18  ;;  %v1249_v52 = vmul.f32 0.5, %v3568_v35  ;;  %v1516_v16 = vmul.f32 %v1515_v11, %v3725_v43  ;;  %v3768_v30 = vmul.f32 0.5, %v3622_v34 }
 0x240   : > { %v2202_v24 = vclamps-f32 %v1747_v9, 1.0  ;;  %v1770_v28 = vadd.f32 0.4994258, %v1769_v41  ;;  %v1526_v46 = vadd.f32 0.014752088, %v1525_v40  ;;  %v1790_v4 = vmul.f32 %v3761_v0, %v3761_v0 }
 0x241   : > { %v2380_v62 = vpop.eup %2379  ;;  %v1481_v59 = vadd.f32 1.1283791, %v1480_v48  ;;  %v1502_v49 = vand.u32 2147483647, %v3745_v7  ;;  %v1504_v44 = vand.u32 2147483648, %v3745_v7  ;;  %v1758_v34 = vmul.f32 %v1757_v31, %v3714_v32 }
 0x242   : > { %v1921_v60 = vadd.f32 1.0, %v2202_v24  ;;  %v1494_v63 = vmul.f32 %v2380_v62, %v3745_v7  ;;  %v1771_v26 = vmul.f32 %v1770_v28, %v3714_v32  ;;  %v1527_v35 = vmul.f32 %v1526_v46, %v3725_v43 }
 0x243   : > { %v3774_v8 = vmin.f32 %v1790_v4, 16.0  ;;  %v1517_v17 = vadd.f32 0.05243302, %v1516_v16  ;;  %v3781_v14 = vadd.f32 %v3367_v12, %v1215_v27  ;;  %vm1499_vm4 = vweird.f32 %v2380_v62 }
 0x244   : > { %v1937_v38 = vmul.f32 %v1921_v60, %v1249_v52  ;;  %v1495_v5 = vsub.f32 1.0, %v1494_v63  ;;  %v3778_v54 = vadd.f32 1.0, %v1771_v26  ;;  %v1528_v2 = vadd.f32 0.112945676, %v1527_v35 }
 0x245   : > { %v1792_v56 = vmul.f32 2.1237322e-06, %v3774_v8  ;;  %v1803_v33 = vmul.f32 3.8918573e-05, %v3774_v8  ;;  %v1482_v39 = vmul.f32 %v1481_v59, %v3634_v19  ;;  %vm1498_vm5 = vweird.f32 %v3745_v7 }
 0x246   : > { %1953 = vst [vmem:[%s3489_s23 + $0x58] sm:$0xff] %v1937_v38  ;;  %v1496_v22 = vmul.f32 %v2380_v62, %v1495_v5  ;;  %2381 = vrcp.f32 %v3778_v54  ;;  %v3792_v25 = vadd.f32 %v3789_v1, %v1233_v36  ;;  %v1759_v20 = vadd.f32 0.18741608, %v1758_v34  ;;  %vm1500_vm6 = vmor %vm1498_vm5, %vm1499_vm4 }
 0x247   : > { %v1529_v58 = vmul.f32 %v1528_v2, %v3725_v43  ;;  %v1793_v42 = vadd.f32 0.00028619796, %v1792_v56  ;;  %vm1503_vm7 = vcmp.eq.f32.partialorder %v1502_v49, 8.507059e+37  ;;  %v1505_v57 = vor.u32 1.1754944e-38, %v1504_v44 }
 0x248   : > { %v1497_v12 = vadd.f32 %v2380_v62, %v1496_v22  ;;  %v1804_v21 = vadd.f32 0.001143296, %v1803_v33  ;;  %v3796_v19 = vmul.f32 0.70710677, %v3781_v14  ;;  %v1518_v10 = vmul.f32 %v1517_v17, %v3725_v43 }
 0x249   : > { %v1530_v50 = vadd.f32 0.4994258, %v1529_v58  ;;  %v1794_v53 = vmul.f32 %v1793_v42, %v3774_v8  ;;  %v3804_v47 = vmul.f32 0.70710677, %v3792_v25  ;;  %v1760_v37 = vmul.f32 %v1759_v20, %v3714_v32 }
 0x24a   : > { %v1501_v7 = vsel %vm1500_vm6, %v2380_v62, %v1497_v12  ;;  %v1805_v15 = vmul.f32 %v1804_v21, %v3774_v8  ;;  %v1550_v23 = vmul.f32 %v3796_v19, %v3796_v19  ;;  %v3809_v9 = vmul.f32 0.5, %v3679_v29 }
 0x24b   : > { %v1506_v45 = vsel %vm1503_vm7, %v1505_v57, %v1501_v7  ;;  %v1531_v3 = vmul.f32 %v1530_v50, %v3725_v43  ;;  %v1795_v6 = vadd.f32 0.0036580483, %v1794_v53  ;;  %v1830_v40 = vmul.f32 %v3804_v47, %v3804_v47 }
 0x24c   : > { %v1507_v18 = vmul.f32 %v1506_v45, %v1482_v39  ;;  %v2382_v11 = vpop.eup %2381  ;;  %v1806_v48 = vadd.f32 0.014752088, %v1805_v15  ;;  %v3811_v41 = vmin.f32 %v1550_v23, 16.0  ;;  %v1519_v28 = vadd.f32 0.18741608, %v1518_v10 }
 0x24d   : > { %v1774_v31 = vmul.f32 %v2382_v11, %v3778_v54  ;;  %v3816_v62 = vadd.f32 1.0, %v1531_v3  ;;  %v1796_v32 = vmul.f32 %v1795_v6, %v3774_v8  ;;  %v1761_v4 = vadd.f32 1.1283791, %v1760_v37 }
 0x24e   : > { %v2196_v24 = vclamps-f32 %v1507_v18, 1.0  ;;  %v1807_v52 = vmul.f32 %v1806_v48, %v3774_v8  ;;  %v1552_v16 = vmul.f32 2.1237322e-06, %v3811_v41  ;;  %v1563_v29 = vmul.f32 3.8918573e-05, %v3811_v41  ;;  %v1235_v18 = vpop.f32.mrf.mxu3 }
 0x24f   : > { %v1775_v60 = vsub.f32 1.0, %v1774_v31  ;;  %2383 = vrcp.f32 %v3816_v62  ;;  %vm1779_vm8 = vweird.f32 %v2382_v11  ;;  %v1782_v59 = vand.u32 2147483647, %v3778_v54 }
 0x250   : > { %v1915_v46 = vadd.f32 1.0, %v2196_v24  ;;  %v1784_v63 = vand.u32 2147483648, %v3778_v54  ;;  %v3825_v27 = vmin.f32 %v1830_v40, 16.0  ;;  %v1808_v35 = vadd.f32 0.112945676, %v1807_v52 }
 0x251   : > { %v1776_v26 = vmul.f32 %v2382_v11, %v1775_v60  ;;  %v1553_v38 = vadd.f32 0.00028619796, %v1552_v16  ;;  %vm1778_vm9 = vweird.f32 %v3778_v54  ;;  %v1520_v5 = vmul.f32 %v1519_v28, %v3725_v43 }
 0x252   : > { %v1931_v49 = vmul.f32 %v1915_v46, %v3768_v30  ;;  %v1797_v44 = vadd.f32 0.05243302, %v1796_v32  ;;  %v1564_v34 = vadd.f32 0.001143296, %v1563_v29  ;;  %v1809_v17 = vmul.f32 %v1808_v35, %v3774_v8  ;;  %vm1780_vm10 = vmor %vm1778_vm9, %vm1779_vm8 }
 0x253   : > { %v1777_v36 = vadd.f32 %v2382_v11, %v1776_v26  ;;  %v1554_v2 = vmul.f32 %v1553_v38, %v3811_v41  ;;  %v1832_v22 = vmul.f32 2.1237322e-06, %v3825_v27  ;;  %v1762_v56 = vmul.f32 %v1761_v4, %v3692_v61 }
 0x254   : > { %1947 = vst [vmem:[%s3489_s23 + $0x28] sm:$0xff] %v1931_v49  ;;  %v1785_v30 = vor.u32 1.1754944e-38, %v1784_v63  ;;  %v1565_v33 = vmul.f32 %v1564_v34, %v3811_v41  ;;  %v1843_v54 = vmul.f32 3.8918573e-05, %v3825_v27  ;;  %vm1783_vm11 = vcmp.eq.f32.partialorder %v1782_v59, 8.507059e+37 }
 0x255   : > { %v2384_v43 = vpop.eup %2383  ;;  %v1781_v39 = vsel %vm1780_vm10, %v2382_v11, %v1777_v36  ;;  %v1810_v12 = vadd.f32 0.4994258, %v1809_v17  ;;  %v1833_v20 = vadd.f32 0.00028619796, %v1832_v22  ;;  %v1521_v42 = vadd.f32 1.1283791, %v1520_v5 }
 0x256   : > { %v1786_v58 = vsel %vm1783_vm11, %v1785_v30, %v1781_v39  ;;  %v1534_v57 = vmul.f32 %v2384_v43, %v3816_v62  ;;  %v1798_v21 = vmul.f32 %v1797_v44, %v3774_v8  ;;  %v1555_v10 = vadd.f32 0.0036580483, %v1554_v2 }
 0x257   : > { %v1787_v7 = vmul.f32 %v1786_v58, %v1762_v56  ;;  %v1811_v61 = vmul.f32 %v1810_v12, %v3774_v8  ;;  %v1566_v50 = vadd.f32 0.014752088, %v1565_v33  ;;  %v1542_v45 = vand.u32 2147483647, %v3816_v62 }
 0x258   : > { %v1535_v53 = vsub.f32 1.0, %v1534_v57  ;;  %v1834_v15 = vmul.f32 %v1833_v20, %v3825_v27  ;;  %v1844_v23 = vadd.f32 0.001143296, %v1843_v54  ;;  %v1544_v3 = vand.u32 2147483648, %v3816_v62 }
 0x259   : > { %v2203_v37 = vclamps-f32 %v1787_v7, 1.0  ;;  %v3844_v6 = vadd.f32 1.0, %v1811_v61  ;;  %v1567_v11 = vmul.f32 %v1566_v50, %v3811_v41  ;;  %vm1539_vm12 = vweird.f32 %v2384_v43 }
 0x25a   : > { %v1536_v48 = vmul.f32 %v2384_v43, %v1535_v53  ;;  %v1799_v40 = vadd.f32 0.18741608, %v1798_v21  ;;  %v1845_v24 = vmul.f32 %v1844_v23, %v3825_v27  ;;  %v1556_v28 = vmul.f32 %v1555_v10, %v3811_v41 }
 0x25b   : > { %v1922_v31 = vadd.f32 1.0, %v2203_v37  ;;  %2385 = vrcp.f32 %v3844_v6  ;;  %v3851_v32 = vadd.f32 %v3789_v1, %v1235_v18  ;;  %vm1538_vm13 = vweird.f32 %v3816_v62 }
 0x25c   : > { %v1537_v52 = vadd.f32 %v2384_v43, %v1536_v48  ;;  %v1568_v16 = vadd.f32 0.112945676, %v1567_v11  ;;  %v1835_v29 = vadd.f32 0.0036580483, %v1834_v15  ;;  %v1522_v4 = vmul.f32 %v1521_v42, %v3699_v55  ;;  %vm1540_vm14 = vmor %vm1538_vm13, %vm1539_vm12 }
 0x25d   : > { %v1938_v46 = vmul.f32 %v1922_v31, %v3809_v9  ;;  %v1545_v60 = vor.u32 1.1754944e-38, %v1544_v3  ;;  %v1846_v59 = vadd.f32 0.014752088, %v1845_v24  ;;  %vm1543_vm15 = vcmp.eq.f32.partialorder %v1542_v45, 8.507059e+37 }
 0x25e   : > { %v1541_v63 = vsel %vm1540_vm14, %v2384_v43, %v1537_v52  ;;  %v1800_v49 = vmul.f32 %v1799_v40, %v3774_v8  ;;  %v1569_v26 = vmul.f32 %v1568_v16, %v3811_v41  ;;  %v1557_v35 = vadd.f32 0.05243302, %v1556_v28 }
 0x25f   : > { %1954 = vst [vmem:[%s3489_s23 + $0x60] sm:$0xff] %v1938_v46  ;;  %v1546_v1 = vsel %vm1543_vm15, %v1545_v60, %v1541_v63  ;;  %v1847_v62 = vmul.f32 %v1846_v59, %v3825_v27  ;;  %v3861_v38 = vmul.f32 0.70710677, %v3851_v32  ;;  %v1836_v55 = vmul.f32 %v1835_v29, %v3825_v27 }
 0x260   : > { %v1547_v9 = vmul.f32 %v1546_v1, %v1522_v4  ;;  %v1570_v5 = vadd.f32 0.4994258, %v1569_v26  ;;  %v1244_v8 = vmul.f32 0.5, %v3682_v51  ;;  %v1801_v2 = vadd.f32 1.1283791, %v1800_v49 }
 0x261   : > { %v2386_v44 = vpop.eup %2385  ;;  %v1848_v34 = vadd.f32 0.112945676, %v1847_v62  ;;  %v1870_v36 = vmul.f32 %v3861_v38, %v3861_v38  ;;  %v1558_v56 = vmul.f32 %v1557_v35, %v3811_v41  ;;  %v1822_v12 = vand.u32 2147483647, %v3844_v6 }
 0x262   : > { %v2197_v17 = vclamps-f32 %v1547_v9, 1.0  ;;  %v1814_v22 = vmul.f32 %v2386_v44, %v3844_v6  ;;  %v1571_v30 = vmul.f32 %v1570_v5, %v3811_v41  ;;  %v1837_v20 = vadd.f32 0.05243302, %v1836_v55 }
 0x263   : > { %v1849_v33 = vmul.f32 %v1848_v34, %v3825_v27  ;;  %v3871_v54 = vmin.f32 %v1870_v36, 16.0  ;;  %v1824_v51 = vand.u32 2147483648, %v3844_v6  ;;  %vm1819_vm0 = vweird.f32 %v2386_v44 }
 0x264   : > { %v1916_v43 = vadd.f32 1.0, %v2197_v17  ;;  %v1815_v39 = vsub.f32 1.0, %v1814_v22  ;;  %v1572_v58 = vadd.f32 1.0, %v1571_v30  ;;  %vm1818_vm1 = vweird.f32 %v3844_v6 }
 0x265   : > { %v1850_v42 = vadd.f32 0.4994258, %v1849_v33  ;;  %v1872_v57 = vmul.f32 2.1237322e-06, %v3871_v54  ;;  %v1883_v61 = vmul.f32 3.8918573e-05, %v3871_v54  ;;  %v1838_v53 = vmul.f32 %v1837_v20, %v3825_v27  ;;  %vm1820_vm2 = vmor %vm1818_vm1, %vm1819_vm0 }
 0x266   : > { %v1932_v21 = vmul.f32 %v1916_v43, %v1244_v8  ;;  %v1816_v7 = vmul.f32 %v2386_v44, %v1815_v39  ;;  %v1559_v10 = vadd.f32 0.18741608, %v1558_v56  ;;  %2387 = vrcp.f32 %v1572_v58 }
 0x267   : > { %v1851_v45 = vmul.f32 %v1850_v42, %v3825_v27  ;;  %v1873_v15 = vadd.f32 0.00028619796, %v1872_v57  ;;  %v1802_v23 = vmul.f32 %v1801_v2, %v3761_v0  ;;  %v1825_v18 = vor.u32 1.1754944e-38, %v1824_v51 }
 0x268   : > { %1948 = vst [vmem:[%s3489_s23 + $0x30] sm:$0xff] %v1932_v21  ;;  %v1817_v50 = vadd.f32 %v2386_v44, %v1816_v7  ;;  %v1884_v37 = vadd.f32 0.001143296, %v1883_v61  ;;  %vm1823_vm3 = vcmp.eq.f32.partialorder %v1822_v12, 8.507059e+37  ;;  %v1560_v31 = vmul.f32 %v1559_v10, %v3811_v41 }
 0x269   : > { %v1852_v11 = vadd.f32 1.0, %v1851_v45  ;;  %v1874_v48 = vmul.f32 %v1873_v15, %v3871_v54  ;;  %v1839_v28 = vadd.f32 0.18741608, %v1838_v53  ;;  %v1251_v4 = vmul.f32 0.5, %v3752_v13 }
 0x26a   : > { %v1821_v3 = vsel %vm1820_vm2, %v2386_v44, %v1817_v50  ;;  %v1885_v40 = vmul.f32 %v1884_v37, %v3871_v54  ;;  %v1561_v63 = vadd.f32 1.1283791, %v1560_v31  ;;  %v1582_v1 = vand.u32 2147483647, %v1572_v58 }
 0x26b   : > { %v1826_v6 = vsel %vm1823_vm3, %v1825_v18, %v1821_v3  ;;  %2389 = vrcp.f32 %v1852_v11  ;;  %v1875_v46 = vadd.f32 0.0036580483, %v1874_v48  ;;  %v1840_v26 = vmul.f32 %v1839_v28, %v3825_v27 }
 0x26c   : > { %v1827_v24 = vmul.f32 %v1826_v6, %v1802_v23  ;;  %v2388_v52 = vpop.eup %2387  ;;  %v1886_v16 = vadd.f32 0.014752088, %v1885_v40  ;;  %v1584_v35 = vand.u32 2147483648, %v1572_v58  ;;  %v1562_v34 = vmul.f32 %v1561_v63, %v3796_v19 }
 0x26d   : > { %v1574_v0 = vmul.f32 %v2388_v52, %v1572_v58  ;;  %vm1579_vm4 = vweird.f32 %v2388_v52  ;;  %v1876_v55 = vmul.f32 %v1875_v46, %v3871_v54  ;;  %vm1578_vm5 = vweird.f32 %v1572_v58 }
 0x26e   : > { %v2204_v29 = vclamps-f32 %v1827_v24, 1.0  ;;  %v1887_v60 = vmul.f32 %v1886_v16, %v3871_v54  ;;  %v1841_v8 = vadd.f32 1.1283791, %v1840_v26  ;;  %vm1580_vm6 = vmor %vm1578_vm5, %vm1579_vm4  ;;  %vm1583_vm7 = vcmp.eq.f32.partialorder %v1582_v1, 8.507059e+37 }
 0x26f   : > { %v1575_v49 = vsub.f32 1.0, %v1574_v0  ;;  %v1585_v27 = vor.u32 1.1754944e-38, %v1584_v35  ;;  %v1862_v56 = vand.u32 2147483647, %v1852_v11  ;;  %v1864_v30 = vand.u32 2147483648, %v1852_v11 }
 0x270   : > { %v1923_v59 = vadd.f32 1.0, %v2204_v29  ;;  %v1888_v41 = vadd.f32 0.112945676, %v1887_v60  ;;  %v1877_v33 = vadd.f32 0.05243302, %v1876_v55  ;;  %vm1858_vm9 = vweird.f32 %v1852_v11 }
 0x271   : > { %v2390_v62 = vpop.eup %2389  ;;  %v1576_v5 = vmul.f32 %v2388_v52, %v1575_v49  ;;  %v1865_v42 = vor.u32 1.1754944e-38, %v1864_v30  ;;  %v1842_v21 = vmul.f32 %v1841_v8, %v3804_v47  ;;  %vm1863_vm11 = vcmp.eq.f32.partialorder %v1862_v56, 8.507059e+37 }
 0x272   : > { %v1939_v9 = vmul.f32 %v1923_v59, %v1251_v4  ;;  %v1854_v44 = vmul.f32 %v2390_v62, %v1852_v11  ;;  %v1889_v13 = vmul.f32 %v1888_v41, %v3871_v54  ;;  %vm1859_vm8 = vweird.f32 %v2390_v62 }
 0x273   : > { %v1577_v36 = vadd.f32 %v2388_v52, %v1576_v5  ;;  %vm1860_vm10 = vmor %vm1858_vm9, %vm1859_vm8  ;;  %v1878_v57 = vmul.f32 %v1877_v33, %v3871_v54  ;;  %v1245_v61 = vmul.f32 0.5, %v3781_v14  ;;  %v1252_v37 = vmul.f32 0.5, %v3792_v25 }
 0x274   : > { %1955 = vst [vmem:[%s3489_s23 + $0x68] sm:$0xff] %v1939_v9  ;;  %v1855_v17 = vsub.f32 1.0, %v1854_v44  ;;  %v1890_v2 = vadd.f32 0.4994258, %v1889_v13  ;;  %v1253_v46 = vmul.f32 0.5, %v3851_v32 }
 0x275   : > { %v1581_v22 = vsel %vm1580_vm6, %v2388_v52, %v1577_v36  ;;  %v1879_v15 = vadd.f32 0.18741608, %v1878_v57 }
 0x276   : > { %v1586_v43 = vsel %vm1583_vm7, %v1585_v27, %v1581_v22  ;;  %v1856_v39 = vmul.f32 %v2390_v62, %v1855_v17  ;;  %v1891_v12 = vmul.f32 %v1890_v2, %v3871_v54 }
 0x277   : > { %v1587_v20 = vmul.f32 %v1586_v43, %v1562_v34  ;;  %v1880_v47 = vmul.f32 %v1879_v15, %v3871_v54 }
 0x278   : > { %v1857_v51 = vadd.f32 %v2390_v62, %v1856_v39  ;;  %v1892_v19 = vadd.f32 1.0, %v1891_v12 }
 0x279   : > { %v2198_v58 = vclamps-f32 %v1587_v20, 1.0  ;;  %v1881_v14 = vadd.f32 1.1283791, %v1880_v47 }
 0x27a   : > { %v1861_v7 = vsel %vm1860_vm10, %v2390_v62, %v1857_v51  ;;  %2391 = vrcp.f32 %v1892_v19  ;;  %v1904_v40 = vand.u32 2147483648, %v1892_v19  ;;  %v1902_v31 = vand.u32 2147483647, %v1892_v19 }
 0x27b   : > { %v1917_v10 = vadd.f32 1.0, %v2198_v58  ;;  %v1866_v50 = vsel %vm1863_vm11, %v1865_v42, %v1861_v7  ;;  %vm1898_vm13 = vweird.f32 %v1892_v19  ;;  %v1882_v25 = vmul.f32 %v1881_v14, %v3861_v38 }
 0x27c   : > { %v1867_v53 = vmul.f32 %v1866_v50, %v1842_v21  ;;  %v1905_v52 = vor.u32 1.1754944e-38, %v1904_v40  ;;  %vm1903_vm15 = vcmp.eq.f32.partialorder %v1902_v31, 8.507059e+37 }
 0x27d   : > { %v1933_v45 = vmul.f32 %v1917_v10, %v1245_v61 }
 0x27e   : > { %v2205_v23 = vclamps-f32 %v1867_v53, 1.0 }
 0x27f   : > { %1949 = vst [vmem:[%s3489_s23 + $0x38] sm:$0xff] %v1933_v45 }
 0x280   : > { %v2392_v18 = vpop.eup %2391  ;;  %v1924_v3 = vadd.f32 1.0, %v2205_v23 }
 0x281   : > { %v1894_v11 = vmul.f32 %v2392_v18, %v1892_v19  ;;  %vm1899_vm12 = vweird.f32 %v2392_v18 }
 0x282   : > { %v1940_v48 = vmul.f32 %v1924_v3, %v1252_v37  ;;  %vm1900_vm14 = vmor %vm1898_vm13, %vm1899_vm12 }
 0x283   : > { %v1895_v6 = vsub.f32 1.0, %v1894_v11 }
 0x284   : > { %1956 = vst [vmem:[%s3489_s23 + $0x70] sm:$0xff] %v1940_v48 }
 0x285   : > { %v1896_v24 = vmul.f32 %v2392_v18, %v1895_v6 }
 0x287   : > { %v1897_v28 = vadd.f32 %v2392_v18, %v1896_v24 }
 0x289   : > { %v1901_v54 = vsel %vm1900_vm14, %v2392_v18, %v1897_v28 }
 0x28a   : > { %v1906_v16 = vsel %vm1903_vm15, %v1905_v52, %v1901_v54 }
 0x28b   : > { %v1907_v29 = vmul.f32 %v1906_v16, %v1882_v25 }
 0x28d   : > { %v2206_v0 = vclamps-f32 %v1907_v29, 1.0 }
 0x28f   : > { %v1925_v4 = vadd.f32 1.0, %v2206_v0 }
 0x291   : > { %v1941_v60 = vmul.f32 %v1925_v4, %v1253_v46 }
 0x293   : > { %1957 = vst [vmem:[%s3489_s23 + $0x78] sm:$0xff] %v1941_v60 }
 0x294   : > { %2511 = shalt.err (!%p2508_p10)
}
 0x295   : > { %s2562_s20 = smov 128   ;;  %s2563_s27 = smov 8  }
 0x296   : > { %2264 = dma.vmem_to_hbm [thread:$0]  (%p2655_p3), %s1972_s5, 2048, %s1974_s6, %s1959_s16, %s2562_s20, %s2562_s20, %s2563_s27  }
 0x297 PF: > { %p2286_p11 = scmp.ge.s32.totalorder %s2554_s15, 2  ;;  %s1988_s7 = sand.u32 1, %s2542_s12  }
 0x298   : > { %s1989_s18 = scalar_lea.sflag [#allocation4], %s1988_s7 }
 0x299   : > { %p2278_p12 = pnand %p2286_p11, %p2619_p6 }
 0x29b   : > { %p2279_p13 = pneg %p2278_p12 }
 0x29d   : > { %2537 = dma.done.wait (%p2279_p13), %s1989_s18, 2048  }
 0x29e   : > { %2539 = vsyncadd (%p2279_p13), %s1989_s18, 4294965248  ;;  %p17_p0 = scmp.ge.s32.totalorder %s2642_s8, 5   ;;  %s4015_s12 = smov %s2546_s13 }
 0x29f   : > { %s4016_s13 = smov %s2550_s14  ;;  %s4017_s14 = smov %s2651_s11 }
 0x2a0   : > { %s4018_s15 = smov %s2642_s8  ;;  %19 = sbr.rel (!%p17_p0) target bundleno = 6 (0x6), region = 87 }
 0x2a5   :  { %1995 = vsyncpa [#allocation3], 1 }
 0x2a6   :  { %1997 = vsyncpa [#allocation3 + $0x1], 1 }
 0x2a7   :  { %1998 = vsyncpa [#allocation6], 1 }
 0x2a8   :  { %1999 = vsyncpa [#allocation4], 1 }
 0x2a9   :  { %2001 = vsyncpa [#allocation4 + $0x1], 1 }

</bundles_post_ra>
